<compile_context>
chip_gen: v6e
topology: v6e:2x2x1
jax: 0.10.0
libtpu: 0.0.40
codegen_flags: <defaults>
</compile_context>

<pallas_src>
from functools import partial

import numpy as np
import jax
import jax.numpy as jnp
from jax.experimental import pallas as pl
from jax.experimental.pallas import tpu as pltpu


# ----------------------------------------------------------------------------
# Kernel
# ----------------------------------------------------------------------------
def _bev_scatter_kernel(idx_ref, feat_ref, out_ref, acc_ref, *,
                        tile_n, chunk, n_chunks, num_cams, cp):
    """One grid step = one (batch, BEV-cell tile).

    idx_ref  : VMEM (N, HW_pad)        int32  flat BEV cell per pixel
                                              (sentinel n_cells = invalid)
    feat_ref : VMEM (N, HW_pad, 2*Cp)  bf16   pixel-major [hi | lo] features
    out_ref  : VMEM (tile_n, Cp)       f32    output BEV tile (cells on sublanes)
    acc_ref  : VMEM (tile_n, 2*Cp)     f32    scratch accumulator
    """
    j = pl.program_id(1)

    acc_ref[...] = jnp.zeros_like(acc_ref)

    # Global cell index of every row of this output tile, broadcast along the
    # pixel-chunk (lane) axis.  Hoisted out of both loops.
    cell_row = (jax.lax.broadcasted_iota(jnp.int32, (tile_n, chunk), 0)
                + j * tile_n)

    for cam in range(num_cams):                      # static unroll, N is small
        def chunk_body(k, carry):
            p0 = pl.multiple_of(k * chunk, chunk)
            # Lane-dense flat cell indices for this pixel chunk: (1, chunk).
            flat_row = idx_ref[pl.ds(cam, 1), pl.ds(p0, chunk)]
            # One-hot scatter matrix (local BEV cell x pixel chunk), bf16
            # ({0, 1} is exact in bf16).  Invalid pixels (sentinel index)
            # match no row of any tile; duplicates accumulate in the matmul,
            # reproducing the reference's serial "+=" scatter semantics.
            onehot = (flat_row == cell_row).astype(jnp.bfloat16)
            # Fused hi/lo feature chunk, pixel-major: (chunk, 2*Cp).
            f = feat_ref[cam, pl.ds(p0, chunk), :]
            acc_ref[...] += jnp.dot(onehot, f,
                                    preferred_element_type=jnp.float32)
            return carry

        jax.lax.fori_loop(0, n_chunks, chunk_body, 0)

    # Combine the error-compensated hi/lo halves and write the tile once.
    out_ref[...] = acc_ref[:, :cp] + acc_ref[:, cp:2 * cp]


# ----------------------------------------------------------------------------
# Wrapper-side helpers
# ----------------------------------------------------------------------------
def _world_from_pixel_params(intrinsics, extrinsics):
    """Per-(batch,camera) M = R @ K^-1 (3x3) and t = E[:3, 3]."""
    k_inv = jnp.linalg.inv(intrinsics.astype(jnp.float32))           # (B,N,3,3)
    rot = extrinsics[..., :3, :3].astype(jnp.float32)
    m = jnp.einsum("...ij,...jk->...ik", rot, k_inv)                 # (B,N,3,3)
    t = extrinsics[..., :3, 3].astype(jnp.float32)                   # (B,N,3)
    return m, t


def _choose_tile_n(n_cells, cp, n_cams, hw_pad, chunk, vmem_budget):
    """Largest BEV-cell tile (multiple of 256, dividing n_cells) whose VMEM
    footprint (blocks + scratch + in-body temporaries) fits the budget."""
    def lanes(v):                       # VMEM minor-dim padding to 128 lanes
        return max(v, 128)

    fixed = 2 * n_cams * hw_pad * 4                          # idx int32, 2 bufs
    fixed += 2 * n_cams * hw_pad * lanes(2 * cp) * 2         # feat bf16, 2 bufs

    def need(t):
        b = fixed
        b += 2 * t * lanes(cp) * 4                           # out block, 2 bufs
        b += t * lanes(2 * cp) * 4                           # f32 accumulator
        b += t * chunk * 4                                   # hoisted cell iota
        b += t * chunk * (4 + 2)                             # compare + onehot
        return b

    cands = [t for t in range(256, min(n_cells, 8192) + 1, 256)
             if n_cells % t == 0]
    if not cands:
        cands = [t for t in range(128, min(n_cells, 8192) + 1, 128)
                 if n_cells % t == 0]
    if not cands:
        cands = [n_cells]
    tile = cands[0]
    for t in cands:
        if need(t) <= vmem_budget:
            tile = t
    return tile, need(tile)


def view_transform(feature_maps, intrinsics, extrinsics,
                   bev_size=(256, 128), pixel_size=0.5):
    """Pallas implementation of ViewTransform.forward.

    feature_maps: (B, N, C, H, W) float32
    intrinsics:   (B, N, 3, 3)    float32
    extrinsics:   (B, N, 4, 4)    float32
    returns:      (B, C, H_bev, W_bev) float32
    """
    B, N, C, H, W = feature_maps.shape
    Hb, Wb = bev_size
    HW = H * W
    n_cells = Hb * Wb

    Cp = max(8, ((C + 7) // 8) * 8)          # channel pad (f32/bf16 friendly)

    # Pixel chunk (MXU K dim); pad HW up to a multiple of it.
    chunk = min(512, ((HW + 127) // 128) * 128)
    HW_pad = ((HW + chunk - 1) // chunk) * chunk
    n_chunks = HW_pad // chunk

    # ---- per-(b, n, pixel) flat BEV cell index (plain XLA, f32) ------------
    m, t = _world_from_pixel_params(intrinsics, extrinsics)
    pidx = jnp.arange(HW, dtype=jnp.int32)
    px = (pidx % W).astype(jnp.float32)                      # (HW,)
    py = (pidx // W).astype(jnp.float32)
    wx = (m[:, :, 0, 0, None] * px + m[:, :, 0, 1, None] * py
          + m[:, :, 0, 2, None] + t[:, :, 0, None])          # (B,N,HW)
    wy = (m[:, :, 1, 0, None] * px + m[:, :, 1, 1, None] * py
          + m[:, :, 1, 2, None] + t[:, :, 1, None])
    # Division (not multiply-by-inverse) to match the reference; clamp before
    # the float->int cast so overflow cannot wrap into the valid range.
    bev_x = jnp.clip(wx / pixel_size, -2.0 ** 30, 2.0 ** 30).astype(jnp.int32) + Wb // 2
    bev_y = jnp.clip(wy / pixel_size, -2.0 ** 30, 2.0 ** 30).astype(jnp.int32) + Hb // 2
    valid = (bev_x >= 0) & (bev_x < Wb) & (bev_y >= 0) & (bev_y < Hb)
    flat = jnp.where(valid,
                     jnp.clip(bev_y, 0, Hb - 1) * Wb + jnp.clip(bev_x, 0, Wb - 1),
                     n_cells).astype(jnp.int32)               # sentinel: no cell
    if HW_pad != HW:
        flat = jnp.pad(flat, ((0, 0), (0, 0), (0, HW_pad - HW)),
                       constant_values=n_cells)

    # ---- bf16 hi/lo error-compensated split, pixel-major -------------------
    feat = jnp.transpose(
        feature_maps.astype(jnp.float32).reshape(B, N, C, HW), (0, 1, 3, 2))
    hi = feat.astype(jnp.bfloat16)
    lo = (feat - hi.astype(jnp.float32)).astype(jnp.bfloat16)
    if Cp != C:
        pad_c = ((0, 0), (0, 0), (0, 0), (0, Cp - C))
        hi = jnp.pad(hi, pad_c)
        lo = jnp.pad(lo, pad_c)
    feat_hilo = jnp.concatenate([hi, lo], axis=-1)            # (B,N,HW,2Cp)
    if HW_pad != HW:
        feat_hilo = jnp.pad(feat_hilo,
                            ((0, 0), (0, 0), (0, HW_pad - HW), (0, 0)))

    # ---- tile and VMEM budget per generation --------------------------------
    try:
        vmem_cap = int(pltpu.get_tpu_info().vmem_capacity_bytes)
    except Exception:
        vmem_cap = 64 << 20                                   # v7x-conservative
    budget = min(int(vmem_cap * 6 // 10), 96 << 20)
    tile_n, vmem_need = _choose_tile_n(n_cells, Cp, N, HW_pad, chunk, budget)
    # v7x megacore: keep the parallel grid extent >= 2 even at B == 1.
    if B * (n_cells // tile_n) < 2:
        half = tile_n // 2
        if half >= 128 and n_cells % half == 0:
            tile_n = half
    n_tiles = n_cells // tile_n
    vmem_limit = int(min(max(vmem_need * 5 // 4, 16 << 20) + (4 << 20),
                         vmem_cap - (4 << 20)))

    kernel = partial(_bev_scatter_kernel, tile_n=tile_n, chunk=chunk,
                     n_chunks=n_chunks, num_cams=N, cp=Cp)

    grid_spec = pltpu.PrefetchScalarGridSpec(
        num_scalar_prefetch=0,
        grid=(B, n_tiles),                   # cell tiles innermost
        in_specs=[
            # Flat cell indices: full camera stack, resident per batch.
            pl.BlockSpec((pl.Squeezed(), N, HW_pad), lambda b, j: (b, 0, 0)),
            # Pixel-major hi/lo features: full camera stack, resident per
            # batch -> the feature tensor is read from HBM once per batch.
            pl.BlockSpec((pl.Squeezed(), N, HW_pad, 2 * Cp),
                         lambda b, j: (b, 0, 0, 0)),
        ],
        out_specs=pl.BlockSpec((pl.Squeezed(), tile_n, Cp),
                               lambda b, j: (b, j, 0)),
        scratch_shapes=[pltpu.VMEM((tile_n, 2 * Cp), jnp.float32)],
    )

    out = pl.pallas_call(
        kernel,
        out_shape=jax.ShapeDtypeStruct((B, n_cells, Cp), jnp.float32),
        grid_spec=grid_spec,
        compiler_params=pltpu.CompilerParams(
            dimension_semantics=("parallel", "parallel"),
            vmem_limit_bytes=vmem_limit),
    )(flat, feat_hilo)

    # (B, n_cells, Cp) -> (B, C, H_bev, W_bev)
    return jnp.transpose(out[:, :, :C], (0, 2, 1)).reshape(B, C, Hb, Wb)


# ----------------------------------------------------------------------------
# Pure numpy reference of the intended forward semantics
# ----------------------------------------------------------------------------
def _reference_bev(m, t, feature_maps, bev_size, pixel_size):
    m = np.asarray(m, np.float32)
    t = np.asarray(t, np.float32)
    fm = np.asarray(feature_maps, np.float32)
    B, N, C, H, W = fm.shape
    Hb, Wb = bev_size
    HW = H * W
    bev = np.zeros((B, C, Hb, Wb), np.float32)
    idx = np.arange(HW)
    pxs = (idx % W).astype(np.float32)
    pys = (idx // W).astype(np.float32)
    for b in range(B):
        for n in range(N):
            mm, tt = m[b, n], t[b, n]
            wx = mm[0, 0] * pxs + mm[0, 1] * pys + mm[0, 2] + tt[0]
            wy = mm[1, 0] * pxs + mm[1, 1] * pys + mm[1, 2] + tt[1]
            bx = (wx / pixel_size).astype(np.int32) + Wb // 2
            by = (wy / pixel_size).astype(np.int32) + Hb // 2
            ok = (bx >= 0) & (bx < Wb) & (by >= 0) & (by < Hb)
            feat = fm[b, n].reshape(C, HW)
            np.add.at(bev[b], (slice(None), by[ok], bx[ok]), feat[:, ok])
    return bev


if __name__ == "__main__":
    key = jax.random.PRNGKey(0)
    B, N, C, H, W = 2, 2, 4, 16, 16
    bev_size = (32, 16)
    pixel_size = 0.5

    k_feat, k_fx, k_fy, k_rot, k_t = jax.random.split(key, 5)

    feature_maps = jax.random.normal(k_feat, (B, N, C, H, W), jnp.float32)

    # Deterministic synthetic intrinsics (pinhole) and extrinsics.
    fx = 8.0 + 4.0 * jax.random.uniform(k_fx, (B, N))
    fy = 8.0 + 4.0 * jax.random.uniform(k_fy, (B, N))
    cx = (W - 1) / 2.0
    cy = (H - 1) / 2.0
    intrinsics = jnp.zeros((B, N, 3, 3), jnp.float32)
    intrinsics = intrinsics.at[:, :, 0, 0].set(fx)
    intrinsics = intrinsics.at[:, :, 1, 1].set(fy)
    intrinsics = intrinsics.at[:, :, 0, 2].set(cx)
    intrinsics = intrinsics.at[:, :, 1, 2].set(cy)
    intrinsics = intrinsics.at[:, :, 2, 2].set(1.0)

    rot = jnp.eye(3, dtype=jnp.float32)[None, None] + \
        0.1 * jax.random.normal(k_rot, (B, N, 3, 3), jnp.float32)
    trans = 2.0 * jax.random.uniform(k_t, (B, N, 3), jnp.float32) - 1.0
    extrinsics = jnp.zeros((B, N, 4, 4), jnp.float32)
    extrinsics = extrinsics.at[:, :, :3, :3].set(rot)
    extrinsics = extrinsics.at[:, :, :3, 3].set(trans)
    extrinsics = extrinsics.at[:, :, 3, 3].set(1.0)

    bev = view_transform(feature_maps, intrinsics, extrinsics,
                         bev_size=bev_size, pixel_size=pixel_size)
    bev = jax.block_until_ready(bev)

    # Verify against a numpy reference of the intended semantics (same M, t so
    # the check exercises the scatter path, not the 3x3 inverse's ulps).
    # Tolerance 1e-3: the kernel uses a fused 2-term bf16 error-compensated
    # matmul (~16 mantissa bits) with f32 accumulation.
    m_np, t_np = _world_from_pixel_params(intrinsics, extrinsics)
    ref = _reference_bev(m_np, t_np, feature_maps, bev_size, pixel_size)
    np.testing.assert_allclose(np.asarray(bev), ref, rtol=1e-3, atol=1e-3)

    print("KERNEL_OK")
</pallas_src>

<mosaic_0001>
module attributes {stable_mosaic.version = 11 : i64} {
  func.func @_bev_scatter_kernel(%arg0: i32, %arg1: i32, %arg2: memref<1x2x256xi32, #tpu.memory_space<vmem>>, %arg3: memref<1x2x256x16xbf16, #tpu.memory_space<vmem>>, %arg4: memref<1x512x8xf32, #tpu.memory_space<vmem>>, %arg5: memref<512x16xf32, #tpu.memory_space<vmem>>) attributes {dimension_semantics = [#tpu.dimension_semantics<parallel>, #tpu.dimension_semantics<parallel>], iteration_bounds = array<i64: 2, 1>, scalar_prefetch = 0 : i64, scratch_operands = 1 : i64, tpu.core_type = #tpu.core_type<tc>, window_params = [{transform_indices = @transform_0, window_bounds = array<i64: 1, 2, 256>}, {transform_indices = @transform_1, window_bounds = array<i64: 1, 2, 256, 16>}, {transform_indices = @transform_2, window_bounds = array<i64: 1, 512, 8>}]} {
    %cst = arith.constant 0.000000e+00 : f32
    %0 = vector.broadcast %cst : f32 to vector<512x16xf32>
    %c0 = arith.constant 0 : index
    %c0_0 = arith.constant 0 : index
    %1 = vector.load %arg5[%c0, %c0_0] : memref<512x16xf32, #tpu.memory_space<vmem>>, vector<512x16xf32>
    tpu.vector_store %arg5[%c0, %c0_0], %0 {strides = array<i32>} : memref<512x16xf32, #tpu.memory_space<vmem>>, vector<512x16xf32>,
    %2 = tpu.iota {dimensions = array<i32: 0>} : vector<512x256xi32>
    %c512_i32 = arith.constant 512 : i32
    %3 = arith.muli %arg1, %c512_i32 : i32
    %4 = vector.broadcast %3 : i32 to vector<512x256xi32>
    %5 = arith.addi %2, %4 : vector<512x256xi32>
    %c0_i32 = arith.constant 0 : i32
    %c256_i32 = arith.constant 256 : i32
    %6 = arith.muli %c0_i32, %c256_i32 : i32
    %7 = tpu.assume_multiple %6, 256 : i32
    %c0_1 = arith.constant 0 : index
    %c0_2 = arith.constant 0 : index
    %8 = arith.index_cast %7 : i32 to index
    %9 = vector.load %arg2[%c0_1, %c0_2, %8] : memref<1x2x256xi32, #tpu.memory_space<vmem>>, vector<1x1x256xi32>
    %10 = vector.shape_cast %9 : vector<1x1x256xi32> to vector<1x256xi32>
    %11 = vector.broadcast %10 : vector<1x256xi32> to vector<512x256xi32>
    %12 = arith.cmpi eq, %11, %5 : vector<512x256xi32>
    %13 = arith.extui %12 : vector<512x256xi1> to vector<512x256xi32>
    %14 = arith.sitofp %13 : vector<512x256xi32> to vector<512x256xf32>
    %15 = arith.truncf %14 : vector<512x256xf32> to vector<512x256xbf16>
    %c0_3 = arith.constant 0 : index
    %c0_4 = arith.constant 0 : index
    %16 = arith.index_cast %7 : i32 to index
    %c0_5 = arith.constant 0 : index
    %17 = vector.load %arg3[%c0_3, %c0_4, %16, %c0_5] : memref<1x2x256x16xbf16, #tpu.memory_space<vmem>>, vector<1x1x256x16xbf16>
    %18 = vector.shape_cast %17 : vector<1x1x256x16xbf16> to vector<256x16xbf16>
    %c0_6 = arith.constant 0 : index
    %c0_7 = arith.constant 0 : index
    %19 = vector.load %arg5[%c0_6, %c0_7] : memref<512x16xf32, #tpu.memory_space<vmem>>, vector<512x16xf32>
    %cst_8 = arith.constant dense<0.000000e+00> : vector<512x16xf32>
    %20 = tpu.matmul %15, %18, %cst_8 {dimension_numbers = #tpu.dot_dimension_numbers<[1], [0], [0], [1], [0, 0, 1, 1], [], []>} : vector<512x256xbf16>, vector<256x16xbf16>, vector<512x16xf32> -> vector<512x16xf32>
    %21 = arith.addf %19, %20 : vector<512x16xf32>
    %c0_9 = arith.constant 0 : index
    %c0_10 = arith.constant 0 : index
    %22 = vector.load %arg5[%c0_9, %c0_10] : memref<512x16xf32, #tpu.memory_space<vmem>>, vector<512x16xf32>
    tpu.vector_store %arg5[%c0_9, %c0_10], %21 {strides = array<i32>} : memref<512x16xf32, #tpu.memory_space<vmem>>, vector<512x16xf32>,
    %c1_i32 = arith.constant 1 : i32
    %c0_i32_11 = arith.constant 0 : i32
    %c256_i32_12 = arith.constant 256 : i32
    %23 = arith.muli %c0_i32_11, %c256_i32_12 : i32
    %24 = tpu.assume_multiple %23, 256 : i32
    %c0_13 = arith.constant 0 : index
    %c1 = arith.constant 1 : index
    %25 = arith.index_cast %24 : i32 to index
    %26 = vector.load %arg2[%c0_13, %c1, %25] : memref<1x2x256xi32, #tpu.memory_space<vmem>>, vector<1x1x256xi32>
    %27 = vector.shape_cast %26 : vector<1x1x256xi32> to vector<1x256xi32>
    %28 = vector.broadcast %27 : vector<1x256xi32> to vector<512x256xi32>
    %29 = arith.cmpi eq, %28, %5 : vector<512x256xi32>
    %30 = arith.extui %29 : vector<512x256xi1> to vector<512x256xi32>
    %31 = arith.sitofp %30 : vector<512x256xi32> to vector<512x256xf32>
    %32 = arith.truncf %31 : vector<512x256xf32> to vector<512x256xbf16>
    %c0_14 = arith.constant 0 : index
    %c1_15 = arith.constant 1 : index
    %33 = arith.index_cast %24 : i32 to index
    %c0_16 = arith.constant 0 : index
    %34 = vector.load %arg3[%c0_14, %c1_15, %33, %c0_16] : memref<1x2x256x16xbf16, #tpu.memory_space<vmem>>, vector<1x1x256x16xbf16>
    %35 = vector.shape_cast %34 : vector<1x1x256x16xbf16> to vector<256x16xbf16>
    %c0_17 = arith.constant 0 : index
    %c0_18 = arith.constant 0 : index
    %36 = vector.load %arg5[%c0_17, %c0_18] : memref<512x16xf32, #tpu.memory_space<vmem>>, vector<512x16xf32>
    %cst_19 = arith.constant dense<0.000000e+00> : vector<512x16xf32>
    %37 = tpu.matmul %32, %35, %cst_19 {dimension_numbers = #tpu.dot_dimension_numbers<[1], [0], [0], [1], [0, 0, 1, 1], [], []>} : vector<512x256xbf16>, vector<256x16xbf16>, vector<512x16xf32> -> vector<512x16xf32>
    %38 = arith.addf %36, %37 : vector<512x16xf32>
    %c0_20 = arith.constant 0 : index
    %c0_21 = arith.constant 0 : index
    %39 = vector.load %arg5[%c0_20, %c0_21] : memref<512x16xf32, #tpu.memory_space<vmem>>, vector<512x16xf32>
    tpu.vector_store %arg5[%c0_20, %c0_21], %38 {strides = array<i32>} : memref<512x16xf32, #tpu.memory_space<vmem>>, vector<512x16xf32>,
    %c1_i32_22 = arith.constant 1 : i32
    %c0_23 = arith.constant 0 : index
    %c0_24 = arith.constant 0 : index
    %40 = vector.load %arg5[%c0_23, %c0_24] : memref<512x16xf32, #tpu.memory_space<vmem>>, vector<512x8xf32>
    %c0_25 = arith.constant 0 : index
    %c8 = arith.constant 8 : index
    %41 = vector.load %arg5[%c0_25, %c8] : memref<512x16xf32, #tpu.memory_space<vmem>>, vector<512x8xf32>
    %42 = arith.addf %40, %41 : vector<512x8xf32>
    %c0_26 = arith.constant 0 : index
    %c0_27 = arith.constant 0 : index
    %c0_28 = arith.constant 0 : index
    %43 = vector.load %arg4[%c0_26, %c0_27, %c0_28] : memref<1x512x8xf32, #tpu.memory_space<vmem>>, vector<1x512x8xf32>
    %44 = vector.shape_cast %43 : vector<1x512x8xf32> to vector<512x8xf32>
    %45 = vector.shape_cast %42 : vector<512x8xf32> to vector<1x512x8xf32>
    tpu.vector_store %arg4[%c0_26, %c0_27, %c0_28], %45 {strides = array<i32>} : memref<1x512x8xf32, #tpu.memory_space<vmem>>, vector<1x512x8xf32>,
    return
  }
  func.func @transform_0(%arg0: i32, %arg1: i32) -> (i32, i32, i32) {
    %c0_i32 = arith.constant 0 : i32
    %c0_i32_0 = arith.constant 0 : i32
    %c0_i32_1 = arith.constant 0 : i32
    return %arg0, %c0_i32, %c0_i32_0 : i32, i32, i32
  }
  func.func @transform_1(%arg0: i32, %arg1: i32) -> (i32, i32, i32, i32) {
    %c0_i32 = arith.constant 0 : i32
    %c0_i32_0 = arith.constant 0 : i32
    %c0_i32_1 = arith.constant 0 : i32
    %c0_i32_2 = arith.constant 0 : i32
    return %arg0, %c0_i32, %c0_i32_0, %c0_i32_1 : i32, i32, i32, i32
  }
  func.func @transform_2(%arg0: i32, %arg1: i32) -> (i32, i32, i32) {
    %c0_i32 = arith.constant 0 : i32
    %c0_i32_0 = arith.constant 0 : i32
    return %arg0, %arg1, %c0_i32 : i32, i32, i32
  }
}

</mosaic_0001>

<bundles_post_ra>
// kernel: tpu_custom_call.1
= control target key start
LH: loop header
LB: loop body
LE: loop exit
PB: predicated region body
PF: predicated region fallthrough
CT: control target
= control target key end

     0   :  { %s3759_s9 = smov 0   ;;  %s3761_s10 = smov 0   ;;  %s5245_s0 = inlined_call_operand.vmem [shape: s32[2,2,256], index: 0, kind: input, shape index: {}]   ;;  %s5246_s1 = inlined_call_operand.vmem [shape: bf16[2,2,256,16], index: 1, kind: input, shape index: {}]   ;;  %s5247_s2 = inlined_call_operand.vmem [shape: f32[2,512,8], index: 2, kind: output, shape index: {}]  }
   0x1   :  { %s3763_s11 = smov 0  }
   0x2 LB: > { %s24_s12 = sadd.s32 1, %s3734_s10  ;;  %p3067_p0 = scmp.ge.s32.totalorder %s3738_s11, 1  ;;  %s3738_s11 = sphi %s3763_s11, %s12_s11   ;;  %s3734_s10 = sphi %s3761_s10, %s5257_s10   ;;  %s3730_s9 = sphi %s3759_s9, %s5256_s9  }
   0x3   : > { %p26_p1 = scmp.ge.s32.totalorder %s24_s12, 2  ;;  %p136_p2 = scmp.lt.s32.totalorder %s3738_s11, 3 }
   0x5   : > { %s5259_s12 = smov (%p26_p1, %s24_s12), 0  ;;  %p137_p3 = pnand %p3067_p0, %p136_p2 }
   0x6   : > { %p167_p4 = scmp.lt.s32.totalorder (!%p137_p3), %s3730_s9, 1  ;;  %s3743_s21 = smov (!%p137_p3), 120  }
   0x7   : > { %140 = sbr.rel (%p137_p3) target bundleno = 668 (0x29c), region = 28 }
   0xc   : > { %v3740_v0 = vmov 0   ;;  %s5261_s9 = smov (!%p167_p4, %s3730_s9), 1  ;;  %v253_v13 = vlaneseq  ;;  %v3741_v29 = vmov 1.0|1.0  }
   0xd   : > { %1033 = vmatprep.subr.bf16.mxu0 %v3740_v0  ;;  %2103 = vmatprep.subr.bf16.mxu1 %v3740_v0  ;;  %s3654_s13 = sshll.u32 %s5261_s9, 8  ;;  %s3653_s17 = sshll.u32 %s5261_s9, 2 }
   0xe   : > { %s3785_s16 = scalar_lea.vmem %s5246_s1, %s3654_s13  ;;  %v3812_v16 = vshrl.u32 %v253_v13, 7  ;;  %s171_s20 = scalar_lea.vmem %s5245_s0, %s3653_s17 }
   0xf   : > { %v3684_v1 = vld [vmem:[%s3785_s16 + $0x38] sm:$0xff]   ;;  %v3685_v2 = vld [vmem:[%s3785_s16 + $0x30] sm:$0xff]   ;;  %v3687_v5 = vld [vmem:[%s3785_s16 + $0x28] sm:$0xff]   ;;  %s3655_s22 = sshll.u32 %s5261_s9, 9 }
  0x10   : > { %1034 = vmatpush1.bf16.msra.mxu0 %v3684_v1  ;;  %v3686_v3 = vld [vmem:[%s3785_s16 + $0xb8] sm:$0xff]   ;;  %v3688_v4 = vld [vmem:[%s3785_s16 + $0xb0] sm:$0xff]   ;;  %v3690_v6 = vld [vmem:[%s3785_s16 + $0xa8] sm:$0xff]   ;;  %v391_v19 = vsub.s32 1, %v3812_v16  ;;  %v3826_v21 = vadd.s32 8, %v3812_v16  ;;  %v387_v37 = vsub.s32 0, %v3812_v16  ;;  %s4839_s25 = scalar_lea.vmem %s5247_s2, %s3655_s22 }
  0x11   : > { %1035 = vmatprep.subr.bf16.mxu0 %v3740_v0  ;;  %2104 = vmatpush1.bf16.msra.mxu1 %v3686_v3  ;;  %v3689_v7 = vld [vmem:[%s3785_s16 + $0x20] sm:$0xff]   ;;  %v3691_v9 = vld [vmem:[%s3785_s16 + $0x18] sm:$0xff]   ;;  %v3693_v11 = vld [vmem:[%s3785_s16 + $0x10] sm:$0xff]   ;;  %v256_v42 = vadd.s32 16, %v3812_v16  ;;  %v257_v43 = vadd.s32 24, %v3812_v16  ;;  %v258_v47 = vadd.s32 32, %v3812_v16 }
  0x12   : > { %2105 = vmatprep.subr.bf16.mxu1 %v3740_v0  ;;  %v3692_v8 = vld [vmem:[%s3785_s16 + $0xa0] sm:$0xff]   ;;  %v3694_v10 = vld [vmem:[%s3785_s16 + $0x98] sm:$0xff]   ;;  %v3696_v12 = vld [vmem:[%s3785_s16 + $0x90] sm:$0xff]   ;;  %v259_v48 = vadd.s32 40, %v3812_v16  ;;  %v260_v49 = vadd.s32 48, %v3812_v16  ;;  %v261_v50 = vadd.s32 56, %v3812_v16 }
  0x13   : > { %v3695_v14 = vld [vmem:[%s3785_s16 + $0x8] sm:$0xff]   ;;  %v3697_v17 = vld [vmem:[%s3785_s16] sm:$0xff]   ;;  %v3699_v20 = vld [vmem:[%s3785_s16 + $0x78] sm:$0xff]   ;;  %v262_v51 = vadd.s32 64, %v3812_v16  ;;  %v263_v52 = vadd.s32 72, %v3812_v16  ;;  %v264_v53 = vadd.s32 80, %v3812_v16 }
  0x14   : > { %1036 = vmatpush1.bf16.msra.mxu0 %v3685_v2  ;;  %v3698_v15 = vld [vmem:[%s3785_s16 + $0x88] sm:$0xff]   ;;  %v3700_v18 = vld [vmem:[%s3785_s16 + $0x80] sm:$0xff]   ;;  %v3702_v23 = vld [vmem:[%s3785_s16 + $0xf8] sm:$0xff]   ;;  %v265_v54 = vadd.s32 88, %v3812_v16  ;;  %v266_v55 = vadd.s32 96, %v3812_v16  ;;  %v267_v56 = vadd.s32 104, %v3812_v16 }
  0x15   : > { %1037 = vmatprep.subr.bf16.mxu0 %v3740_v0  ;;  %2106 = vmatpush1.bf16.msra.mxu1 %v3688_v4  ;;  %v384_v22 = vld [vmem:[%s171_s20] ss:$2 sm:$0x3]  ;;  %v3346_v25 = vld [vmem:[%s171_s20 + $0x1] ss:$2 sm:$0x3] }
  0x16   : > { %2107 = vmatprep.subr.bf16.mxu1 %v3740_v0  ;;  %v3830_v24 = vrot.slane %v384_v22, %v391_v19  ;;  %v3833_v26 = vrot.slane %v3346_v25, %v391_v19  ;;  %v3701_v27 = vld [vmem:[%s3785_s16 + $0x70] sm:$0xff]   ;;  %v3703_v30 = vld [vmem:[%s3785_s16 + $0x68] sm:$0xff]   ;;  %v3705_v32 = vld [vmem:[%s3785_s16 + $0x60] sm:$0xff]   ;;  %v3868_v40 = vrot.slane %v384_v22, %v387_v37  ;;  %v3874_v44 = vrot.slane %v3346_v25, %v387_v37 }
  0x17   : > { %v3704_v28 = vld [vmem:[%s3785_s16 + $0xf0] sm:$0xff]   ;;  %v3706_v31 = vld [vmem:[%s3785_s16 + $0xe8] sm:$0xff]   ;;  %v3708_v33 = vld [vmem:[%s3785_s16 + $0xe0] sm:$0xff]   ;;  %v268_v57 = vadd.s32 112, %v3812_v16  ;;  %v269_v58 = vadd.s32 120, %v3812_v16  ;;  %v3977_v59 = vadd.s32 128, %v3812_v16 }
  0x18   : > { %1038 = vmatpush1.bf16.msra.mxu0 %v3687_v5  ;;  %vm394_vm0 = vcmp.eq.s32.totalorder %v3830_v24, %v3812_v16  ;;  %vm396_vm1 = vcmp.eq.s32.totalorder %v3830_v24, %v3826_v21  ;;  %vm1461_vm3 = vcmp.eq.s32.totalorder %v3833_v26, %v3812_v16  ;;  %vm1463_vm4 = vcmp.eq.s32.totalorder %v3833_v26, %v3826_v21  ;;  %v3707_v34 = vld [vmem:[%s3785_s16 + $0x58] sm:$0xff]   ;;  %v3709_v36 = vld [vmem:[%s3785_s16 + $0x50] sm:$0xff]   ;;  %v3711_v39 = vld [vmem:[%s3785_s16 + $0x48] sm:$0xff]  }
  0x19   : > { %1039 = vmatprep.subr.bf16.mxu0 %v3740_v0  ;;  %2108 = vmatpush1.bf16.msra.mxu1 %v3690_v6  ;;  %vm3218_vm2 = vmpackc.low %vm396_vm1, %vm394_vm0  ;;  %v3710_v35 = vld [vmem:[%s3785_s16 + $0xd8] sm:$0xff]   ;;  %v3712_v38 = vld [vmem:[%s3785_s16 + $0xd0] sm:$0xff]   ;;  %vm393_vm6 = vcmp.eq.s32.totalorder %v3868_v40, %v3812_v16  ;;  %vm395_vm7 = vcmp.eq.s32.totalorder %v3868_v40, %v3826_v21  ;;  %vm398_vm8 = vcmp.eq.s32.totalorder %v3830_v24, %v256_v42  ;;  %v3980_v60 = vadd.s32 136, %v3812_v16 }
  0x1a   : > { %2109 = vmatprep.subr.bf16.mxu1 %v3740_v0  ;;  %3219 = vmatprep.mubr.msk.bf16.mxu0 %vm3218_vm2, %v3741_v29  ;;  %vm3523_vm5 = vmpackc.low %vm1463_vm4, %vm1461_vm3  ;;  %v3714_v41 = vld [vmem:[%s3785_s16 + $0xc8] sm:$0xff]   ;;  %v3713_v45 = vld [vmem:[%s3785_s16 + $0x40] sm:$0xff]   ;;  %vm400_vm9 = vcmp.eq.s32.totalorder %v3830_v24, %v257_v43  ;;  %vm1460_vm10 = vcmp.eq.s32.totalorder %v3874_v44, %v3812_v16  ;;  %vm1462_vm11 = vcmp.eq.s32.totalorder %v3874_v44, %v3826_v21  ;;  %v3999_v61 = vadd.s32 144, %v3812_v16 }
  0x1b   : > { %3524 = vmatprep.mubr.msk.bf16.mxu1 %vm3523_vm5, %v3741_v29  ;;  %v3715_v46 = vld [vmem:[%s3785_s16 + $0xc0] sm:$0xff]   ;;  %vm3220_vm12 = vmpackc.low %vm395_vm7, %vm393_vm6  ;;  %vm1465_vm13 = vcmp.eq.s32.totalorder %v3833_v26, %v256_v42  ;;  %vm1467_vm14 = vcmp.eq.s32.totalorder %v3833_v26, %v257_v43  ;;  %vm397_vm2 = vcmp.eq.s32.totalorder %v3868_v40, %v256_v42  ;;  %vm399_vm3 = vcmp.eq.s32.totalorder %v3868_v40, %v257_v43 }
  0x1c   : > { %1040 = vmatpush1.bf16.msra.mxu0 %v3689_v7  ;;  %vm3222_vm15 = vmpackc.low %vm400_vm9, %vm398_vm8  ;;  %vm402_vm4 = vcmp.eq.s32.totalorder %v3830_v24, %v258_v47  ;;  %vm404_vm5 = vcmp.eq.s32.totalorder %v3830_v24, %v259_v48  ;;  %vm1464_vm6 = vcmp.eq.s32.totalorder %v3874_v44, %v256_v42  ;;  %vm1466_vm7 = vcmp.eq.s32.totalorder %v3874_v44, %v257_v43 }
  0x1d   : > { %1041 = vmatprep.subr.bf16.mxu0 %v3740_v0  ;;  %2110 = vmatpush1.bf16.msra.mxu1 %v3692_v8  ;;  %vm3525_vm0 = vmpackc.low %vm1462_vm11, %vm1460_vm10  ;;  %vm1469_vm9 = vcmp.eq.s32.totalorder %v3833_v26, %v258_v47  ;;  %vm1471_vm10 = vcmp.eq.s32.totalorder %v3833_v26, %v259_v48  ;;  %v4002_v62 = vadd.s32 152, %v3812_v16  ;;  %v274_v1 = vadd.s32 160, %v3812_v16 }
  0x1e   : > { %2111 = vmatprep.subr.bf16.mxu1 %v3740_v0  ;;  %vm3527_vm1 = vmpackc.low %vm1467_vm14, %vm1465_vm13  ;;  %vm401_vm14 = vcmp.eq.s32.totalorder %v3868_v40, %v258_v47  ;;  %v275_v2 = vadd.s32 168, %v3812_v16  ;;  %v276_v3 = vadd.s32 176, %v3812_v16  ;;  %v277_v4 = vadd.s32 184, %v3812_v16 }
  0x1f   : > { %vm3224_vm8 = vmpackc.low %vm399_vm3, %vm397_vm2  ;;  %vm1468_vm2 = vcmp.eq.s32.totalorder %v3874_v44, %v258_v47  ;;  %vm1470_vm3 = vcmp.eq.s32.totalorder %v3874_v44, %v259_v48  ;;  %v278_v5 = vadd.s32 192, %v3812_v16  ;;  %v279_v6 = vadd.s32 200, %v3812_v16 }
  0x20   : > { %1042 = vmatpush1.bf16.msra.mxu0 %v3691_v9  ;;  %vm3226_vm11 = vmpackc.low %vm404_vm5, %vm402_vm4  ;;  %vm1473_vm5 = vcmp.eq.s32.totalorder %v3833_v26, %v260_v49  ;;  %v280_v7 = vadd.s32 208, %v3812_v16  ;;  %v281_v8 = vadd.s32 216, %v3812_v16  ;;  %v282_v9 = vadd.s32 224, %v3812_v16 }
  0x21   : > { %1043 = vmatprep.subr.bf16.mxu0 %v3740_v0  ;;  %2112 = vmatpush1.bf16.msra.mxu1 %v3694_v10  ;;  %vm3531_vm13 = vmpackc.low %vm1471_vm10, %vm1469_vm9  ;;  %vm405_vm10 = vcmp.eq.s32.totalorder %v3868_v40, %v260_v49  ;;  %v283_v10 = vadd.s32 232, %v3812_v16  ;;  %v286_v13 = vadd.s32 256, %v3812_v16  ;;  %v291_v19 = vadd.s32 296, %v3812_v16 }
  0x22   : > { %2113 = vmatprep.subr.bf16.mxu1 %v3740_v0  ;;  %v293_v21 = vadd.s32 312, %v3812_v16  ;;  %v294_v22 = vadd.s32 320, %v3812_v16  ;;  %v296_v25 = vadd.s32 336, %v3812_v16 }
  0x24   : > { %1044 = vmatpush1.bf16.msra.mxu0 %v3693_v11  ;;  %v284_v11 = vadd.s32 240, %v3812_v16 }
  0x25   : > { %1045 = vmatprep.subr.bf16.mxu0 %v3740_v0  ;;  %2114 = vmatpush1.bf16.msra.mxu1 %v3696_v12  ;;  %v285_v12 = vadd.s32 248, %v3812_v16 }
  0x26   : > { %2115 = vmatprep.subr.bf16.mxu1 %v3740_v0 }
  0x28   : > { %1046 = vmatpush1.bf16.msra.mxu0 %v3695_v14  ;;  %v287_v14 = vadd.s32 264, %v3812_v16 }
  0x29   : > { %1047 = vmatprep.subr.bf16.mxu0 %v3740_v0  ;;  %2116 = vmatpush1.bf16.msra.mxu1 %v3698_v15  ;;  %v288_v15 = vadd.s32 272, %v3812_v16 }
  0x2a   : > { %2117 = vmatprep.subr.bf16.mxu1 %v3740_v0 }
  0x2c   : > { %1048 = vmatpush1.bf16.msra.mxu0 %v3697_v17  ;;  %v289_v17 = vadd.s32 280, %v3812_v16 }
  0x2d   : > { %1049 = vmatprep.subr.bf16.mxu0 %v3740_v0  ;;  %2118 = vmatpush1.bf16.msra.mxu1 %v3700_v18  ;;  %v290_v18 = vadd.s32 288, %v3812_v16 }
  0x2e   : > { %2119 = vmatprep.subr.bf16.mxu1 %v3740_v0 }
  0x30   : > { %1050 = vmatpush2.bf16.msra.mxu0 %v3699_v20  ;;  %v292_v20 = vadd.s32 304, %v3812_v16 }
  0x31   : > { %1051 = vmatprep.subr.bf16.mxu0 %v3740_v0  ;;  %2120 = vmatpush2.bf16.msra.mxu1 %v3702_v23  ;;  %v295_v23 = vadd.s32 328, %v3812_v16 }
  0x32   : > { %2121 = vmatprep.subr.bf16.mxu1 %v3740_v0 }
  0x34   : > { %1052 = vmatpush2.bf16.msra.mxu0 %v3701_v27  ;;  %v297_v27 = vadd.s32 344, %v3812_v16 }
  0x35   : > { %1053 = vmatprep.subr.bf16.mxu0 %v3740_v0  ;;  %2122 = vmatpush2.bf16.msra.mxu1 %v3704_v28  ;;  %v298_v28 = vadd.s32 352, %v3812_v16 }
  0x36   : > { %2123 = vmatprep.subr.bf16.mxu1 %v3740_v0 }
  0x38   : > { %1054 = vmatpush2.bf16.msra.mxu0 %v3703_v30  ;;  %v299_v30 = vadd.s32 360, %v3812_v16 }
  0x39   : > { %1055 = vmatprep.subr.bf16.mxu0 %v3740_v0  ;;  %2124 = vmatpush2.bf16.msra.mxu1 %v3706_v31  ;;  %v300_v31 = vadd.s32 368, %v3812_v16 }
  0x3a   : > { %2125 = vmatprep.subr.bf16.mxu1 %v3740_v0 }
  0x3c   : > { %1056 = vmatpush2.bf16.msra.mxu0 %v3705_v32  ;;  %v301_v32 = vadd.s32 376, %v3812_v16 }
  0x3d   : > { %1057 = vmatprep.subr.bf16.mxu0 %v3740_v0  ;;  %2126 = vmatpush2.bf16.msra.mxu1 %v3708_v33  ;;  %v302_v33 = vadd.s32 384, %v3812_v16 }
  0x3e   : > { %2127 = vmatprep.subr.bf16.mxu1 %v3740_v0 }
  0x40   : > { %1058 = vmatpush2.bf16.msra.mxu0 %v3707_v34  ;;  %v303_v34 = vadd.s32 392, %v3812_v16 }
  0x41   : > { %1059 = vmatprep.subr.bf16.mxu0 %v3740_v0  ;;  %2128 = vmatpush2.bf16.msra.mxu1 %v3710_v35  ;;  %v304_v35 = vadd.s32 400, %v3812_v16 }
  0x42   : > { %2129 = vmatprep.subr.bf16.mxu1 %v3740_v0 }
  0x44   : > { %1060 = vmatpush2.bf16.msra.mxu0 %v3709_v36  ;;  %v305_v36 = vadd.s32 408, %v3812_v16 }
  0x45   : > { %1061 = vmatprep.subr.bf16.mxu0 %v3740_v0  ;;  %2130 = vmatpush2.bf16.msra.mxu1 %v3712_v38  ;;  %v4393_v38 = vadd.s32 416, %v3812_v16 }
  0x46   : > { %2131 = vmatprep.subr.bf16.mxu1 %v3740_v0 }
  0x48   : > { %1062 = vmatpush2.bf16.msra.mxu0 %v3711_v39  ;;  %v4396_v39 = vadd.s32 424, %v3812_v16 }
  0x49   : > { %1063 = vmatprep.subr.bf16.mxu0 %v3740_v0  ;;  %2132 = vmatpush2.bf16.msra.mxu1 %v3714_v41 }
  0x4a   : > { %2133 = vmatprep.subr.bf16.mxu1 %v3740_v0  ;;  %v3742_v0 = vmov 0.0  }
  0x4c   : > { %1064 = vmatpush2.bf16.msra.mxu0 %v3713_v45 }
  0x4d   : > { %2134 = vmatpush2.bf16.msra.mxu1 %v3715_v46 }
  0x4f   : > { %3221 = vmatmul.mubr.msk.bf16.vlgmr.msra.gmra.mxu0 %vm3220_vm12, %v3741_v29  ;;  %vm3529_vm12 = vmpackc.low %vm1466_vm7, %vm1464_vm6  ;;  %vm1475_vm6 = vcmp.eq.s32.totalorder %v3833_v26, %v261_v50 }
  0x50   : > { %3223 = vmatprep.mubr.msk.bf16.mxu0 %vm3222_vm15, %v3741_v29  ;;  %3526 = vmatmul.mubr.msk.bf16.vlgmr.msra.gmra.mxu1 %vm3525_vm0, %v3741_v29  ;;  %vm403_vm15 = vcmp.eq.s32.totalorder %v3868_v40, %v259_v48  ;;  %vm406_vm0 = vcmp.eq.s32.totalorder %v3830_v24, %v260_v49  ;;  %vm3535_vm9 = vmpackc.low %vm1475_vm6, %vm1473_vm5  ;;  %vm409_vm6 = vcmp.eq.s32.totalorder %v3868_v40, %v262_v51 }
  0x51   : > { %3528 = vmatprep.mubr.msk.bf16.mxu1 %vm3527_vm1, %v3741_v29  ;;  %vm408_vm1 = vcmp.eq.s32.totalorder %v3830_v24, %v261_v50  ;;  %vm3228_vm4 = vmpackc.low %vm403_vm15, %vm401_vm14  ;;  %vm1472_vm14 = vcmp.eq.s32.totalorder %v3874_v44, %v260_v49  ;;  %vm1474_vm15 = vcmp.eq.s32.totalorder %v3874_v44, %v261_v50 }
  0x52   : > { %vm3230_vm7 = vmpackc.low %vm408_vm1, %vm406_vm0  ;;  %vm1477_vm1 = vcmp.eq.s32.totalorder %v3833_v26, %v262_v51 }
  0x57   : > { %3225 = vmatmul.mubr.msk.bf16.gmra.mxu0 %vm3224_vm8, %v3741_v29  ;;  %vm3533_vm8 = vmpackc.low %vm1470_vm3, %vm1468_vm2  ;;  %vm1479_vm2 = vcmp.eq.s32.totalorder %v3833_v26, %v263_v52 }
  0x58   : > { %3227 = vmatprep.mubr.msk.bf16.mxu0 %vm3226_vm11, %v3741_v29  ;;  %3530 = vmatmul.mubr.msk.bf16.gmra.mxu1 %vm3529_vm12, %v3741_v29  ;;  %vm407_vm11 = vcmp.eq.s32.totalorder %v3868_v40, %v261_v50  ;;  %vm410_vm12 = vcmp.eq.s32.totalorder %v3830_v24, %v262_v51  ;;  %vm3539_vm5 = vmpackc.low %vm1479_vm2, %vm1477_vm1  ;;  %vm413_vm2 = vcmp.eq.s32.totalorder %v3868_v40, %v264_v53 }
  0x59   : > { %3532 = vmatprep.mubr.msk.bf16.mxu1 %vm3531_vm13, %v3741_v29  ;;  %vm412_vm13 = vcmp.eq.s32.totalorder %v3830_v24, %v263_v52  ;;  %vm3232_vm0 = vmpackc.low %vm407_vm11, %vm405_vm10  ;;  %vm1476_vm10 = vcmp.eq.s32.totalorder %v3874_v44, %v262_v51  ;;  %vm1478_vm11 = vcmp.eq.s32.totalorder %v3874_v44, %v263_v52 }
  0x5a   : > { %vm3234_vm3 = vmpackc.low %vm412_vm13, %vm410_vm12  ;;  %vm1481_vm13 = vcmp.eq.s32.totalorder %v3833_v26, %v264_v53 }
  0x5f   : > { %3229 = vmatmul.mubr.msk.bf16.gmra.mxu0 %vm3228_vm4, %v3741_v29  ;;  %vm3537_vm4 = vmpackc.low %vm1474_vm15, %vm1472_vm14  ;;  %vm1483_vm14 = vcmp.eq.s32.totalorder %v3833_v26, %v265_v54 }
  0x60   : > { %3231 = vmatprep.mubr.msk.bf16.mxu0 %vm3230_vm7, %v3741_v29  ;;  %3534 = vmatmul.mubr.msk.bf16.gmra.mxu1 %vm3533_vm8, %v3741_v29  ;;  %vm411_vm7 = vcmp.eq.s32.totalorder %v3868_v40, %v263_v52  ;;  %vm414_vm8 = vcmp.eq.s32.totalorder %v3830_v24, %v264_v53  ;;  %vm3543_vm1 = vmpackc.low %vm1483_vm14, %vm1481_vm13  ;;  %vm417_vm14 = vcmp.eq.s32.totalorder %v3868_v40, %v266_v55 }
  0x61   : > { %3536 = vmatprep.mubr.msk.bf16.mxu1 %vm3535_vm9, %v3741_v29  ;;  %vm416_vm9 = vcmp.eq.s32.totalorder %v3830_v24, %v265_v54  ;;  %vm3236_vm12 = vmpackc.low %vm411_vm7, %vm409_vm6  ;;  %vm1480_vm6 = vcmp.eq.s32.totalorder %v3874_v44, %v264_v53  ;;  %vm1482_vm7 = vcmp.eq.s32.totalorder %v3874_v44, %v265_v54  ;;  %v4417_v53 = vadd.s32 432, %v3812_v16 }
  0x62   : > { %vm3238_vm15 = vmpackc.low %vm416_vm9, %vm414_vm8  ;;  %vm1485_vm9 = vcmp.eq.s32.totalorder %v3833_v26, %v266_v55 }
  0x67   : > { %3233 = vmatmul.mubr.msk.bf16.gmra.mxu0 %vm3232_vm0, %v3741_v29  ;;  %vm3541_vm0 = vmpackc.low %vm1478_vm11, %vm1476_vm10  ;;  %vm1487_vm10 = vcmp.eq.s32.totalorder %v3833_v26, %v267_v56 }
  0x68   : > { %3235 = vmatprep.mubr.msk.bf16.mxu0 %vm3234_vm3, %v3741_v29  ;;  %3538 = vmatmul.mubr.msk.bf16.gmra.mxu1 %vm3537_vm4, %v3741_v29  ;;  %vm415_vm3 = vcmp.eq.s32.totalorder %v3868_v40, %v265_v54  ;;  %vm418_vm4 = vcmp.eq.s32.totalorder %v3830_v24, %v266_v55  ;;  %vm3547_vm13 = vmpackc.low %vm1487_vm10, %vm1485_vm9  ;;  %vm421_vm10 = vcmp.eq.s32.totalorder %v3868_v40, %v268_v57  ;;  %v4420_v54 = vadd.s32 440, %v3812_v16 }
  0x69   : > { %3540 = vmatprep.mubr.msk.bf16.mxu1 %vm3539_vm5, %v3741_v29  ;;  %vm420_vm5 = vcmp.eq.s32.totalorder %v3830_v24, %v267_v56  ;;  %vm3240_vm8 = vmpackc.low %vm415_vm3, %vm413_vm2  ;;  %vm1484_vm2 = vcmp.eq.s32.totalorder %v3874_v44, %v266_v55  ;;  %vm1486_vm3 = vcmp.eq.s32.totalorder %v3874_v44, %v267_v56 }
  0x6a   : > { %vm3242_vm11 = vmpackc.low %vm420_vm5, %vm418_vm4  ;;  %vm1489_vm5 = vcmp.eq.s32.totalorder %v3833_v26, %v268_v57 }
  0x6f   : > { %3237 = vmatmul.mubr.msk.bf16.gmra.mxu0 %vm3236_vm12, %v3741_v29  ;;  %vm3545_vm12 = vmpackc.low %vm1482_vm7, %vm1480_vm6  ;;  %vm1491_vm6 = vcmp.eq.s32.totalorder %v3833_v26, %v269_v58 }
  0x70   : > { %3239 = vmatprep.mubr.msk.bf16.mxu0 %vm3238_vm15, %v3741_v29  ;;  %3542 = vmatmul.mubr.msk.bf16.gmra.mxu1 %vm3541_vm0, %v3741_v29  ;;  %vm419_vm15 = vcmp.eq.s32.totalorder %v3868_v40, %v267_v56  ;;  %vm422_vm0 = vcmp.eq.s32.totalorder %v3830_v24, %v268_v57  ;;  %vm3551_vm9 = vmpackc.low %vm1491_vm6, %vm1489_vm5  ;;  %vm188_vm6 = vcmask 130048  }
  0x71   : > { %3544 = vmatprep.mubr.msk.bf16.mxu1 %vm3543_vm1, %v3741_v29  ;;  %vm424_vm1 = vcmp.eq.s32.totalorder %v3830_v24, %v269_v58  ;;  %vm3244_vm4 = vmpackc.low %vm419_vm15, %vm417_vm14  ;;  %vm1488_vm14 = vcmp.eq.s32.totalorder %v3874_v44, %v268_v57  ;;  %vm1490_vm15 = vcmp.eq.s32.totalorder %v3874_v44, %v269_v58  ;;  %189 = vst.msk [vmem:[#allocation2] sm:$0xff] %vm188_vm6, %v3742_v0 }
  0x72   : > { %vm3246_vm7 = vmpackc.low %vm424_vm1, %vm422_vm0  ;;  %vm1493_vm1 = vcmp.eq.s32.totalorder %v3833_v26, %v3977_v59  ;;  %190 = vst.msk [vmem:[#allocation2 + $0x8] sm:$0xff] %vm188_vm6, %v3742_v0 }
  0x73   : > { %191 = vst.msk [vmem:[#allocation2 + $0x10] sm:$0xff] %vm188_vm6, %v3742_v0  ;;  %192 = vst.msk [vmem:[#allocation2 + $0x18] sm:$0xff] %vm188_vm6, %v3742_v0 }
  0x74   : > { %193 = vst.msk [vmem:[#allocation2 + $0x20] sm:$0xff] %vm188_vm6, %v3742_v0  ;;  %194 = vst.msk [vmem:[#allocation2 + $0x28] sm:$0xff] %vm188_vm6, %v3742_v0 }
  0x75   : > { %195 = vst.msk [vmem:[#allocation2 + $0x30] sm:$0xff] %vm188_vm6, %v3742_v0  ;;  %196 = vst.msk [vmem:[#allocation2 + $0x38] sm:$0xff] %vm188_vm6, %v3742_v0 }
  0x76   : > { %197 = vst.msk [vmem:[#allocation2 + $0x40] sm:$0xff] %vm188_vm6, %v3742_v0  ;;  %198 = vst.msk [vmem:[#allocation2 + $0x48] sm:$0xff] %vm188_vm6, %v3742_v0 }
  0x77   : > { %3241 = vmatmul.mubr.msk.bf16.gmra.mxu0 %vm3240_vm8, %v3741_v29  ;;  %vm3549_vm8 = vmpackc.low %vm1486_vm3, %vm1484_vm2  ;;  %vm1495_vm2 = vcmp.eq.s32.totalorder %v3833_v26, %v3980_v60  ;;  %199 = vst.msk [vmem:[#allocation2 + $0x50] sm:$0xff] %vm188_vm6, %v3742_v0 }
  0x78   : > { %3243 = vmatprep.mubr.msk.bf16.mxu0 %vm3242_vm11, %v3741_v29  ;;  %3546 = vmatmul.mubr.msk.bf16.gmra.mxu1 %vm3545_vm12, %v3741_v29  ;;  %vm423_vm11 = vcmp.eq.s32.totalorder %v3868_v40, %v269_v58  ;;  %vm426_vm12 = vcmp.eq.s32.totalorder %v3830_v24, %v3977_v59  ;;  %vm4005_vm5 = vmpackc.low %vm1495_vm2, %vm1493_vm1  ;;  %200 = vst.msk [vmem:[#allocation2 + $0x58] sm:$0xff] %vm188_vm6, %v3742_v0  ;;  %v873_v37 = vld [vmem:[#allocation2] sm:$0xff] }
  0x79   : > { %3548 = vmatprep.mubr.msk.bf16.mxu1 %vm3547_vm13, %v3741_v29  ;;  %vm428_vm13 = vcmp.eq.s32.totalorder %v3830_v24, %v3980_v60  ;;  %vm3248_vm0 = vmpackc.low %vm423_vm11, %vm421_vm10  ;;  %201 = vst.msk [vmem:[#allocation2 + $0x60] sm:$0xff] %vm188_vm6, %v3742_v0  ;;  %vm432_vm10 = vcmp.eq.s32.totalorder %v3830_v24, %v4002_v62  ;;  %vm1492_vm11 = vcmp.eq.s32.totalorder %v3874_v44, %v3977_v59  ;;  %v874_v45 = vld [vmem:[#allocation2 + $0x8] sm:$0xff] }
  0x7a   : > { %vm3250_vm3 = vmpackc.low %vm428_vm13, %vm426_vm12  ;;  %202 = vst.msk [vmem:[#allocation2 + $0x68] sm:$0xff] %vm188_vm6, %v3742_v0  ;;  %vm1494_vm12 = vcmp.eq.s32.totalorder %v3874_v44, %v3980_v60  ;;  %v875_v51 = vld [vmem:[#allocation2 + $0x10] sm:$0xff] }
  0x7b   : > { %203 = vst.msk [vmem:[#allocation2 + $0x70] sm:$0xff] %vm188_vm6, %v3742_v0  ;;  %204 = vst.msk [vmem:[#allocation2 + $0x78] sm:$0xff] %vm188_vm6, %v3742_v0 }
  0x7c   : > { %205 = vst.msk [vmem:[#allocation2 + $0x80] sm:$0xff] %vm188_vm6, %v3742_v0  ;;  %206 = vst.msk [vmem:[#allocation2 + $0x88] sm:$0xff] %vm188_vm6, %v3742_v0 }
  0x7d   : > { %207 = vst.msk [vmem:[#allocation2 + $0x90] sm:$0xff] %vm188_vm6, %v3742_v0  ;;  %208 = vst.msk [vmem:[#allocation2 + $0x98] sm:$0xff] %vm188_vm6, %v3742_v0 }
  0x7e   : > { %209 = vst.msk [vmem:[#allocation2 + $0xa0] sm:$0xff] %vm188_vm6, %v3742_v0  ;;  %210 = vst.msk [vmem:[#allocation2 + $0xa8] sm:$0xff] %vm188_vm6, %v3742_v0 }
  0x7f   : > { %3245 = vmatmul.mubr.msk.bf16.gmra.mxu0 %vm3244_vm4, %v3741_v29  ;;  %vm3553_vm4 = vmpackc.low %vm1490_vm15, %vm1488_vm14  ;;  %211 = vst.msk [vmem:[#allocation2 + $0xb0] sm:$0xff] %vm188_vm6, %v3742_v0  ;;  %vm1497_vm14 = vcmp.eq.s32.totalorder %v3833_v26, %v3999_v61  ;;  %vm1499_vm15 = vcmp.eq.s32.totalorder %v3833_v26, %v4002_v62 }
  0x80   : > { %3247 = vmatprep.mubr.msk.bf16.mxu0 %vm3246_vm7, %v3741_v29  ;;  %3550 = vmatmul.mubr.msk.bf16.gmra.mxu1 %vm3549_vm8, %v3741_v29  ;;  %vm425_vm7 = vcmp.eq.s32.totalorder %v3868_v40, %v3977_v59  ;;  %vm427_vm8 = vcmp.eq.s32.totalorder %v3868_v40, %v3980_v60  ;;  %212 = vst.msk [vmem:[#allocation2 + $0xb8] sm:$0xff] %vm188_vm6, %v3742_v0  ;;  %213 = vst.msk [vmem:[#allocation2 + $0xc0] sm:$0xff] %vm188_vm6, %v3742_v0  ;;  %v876_v60 = vld [vmem:[#allocation2 + $0x18] sm:$0xff] }
  0x81   : > { %3552 = vmatprep.mubr.msk.bf16.mxu1 %vm3551_vm9, %v3741_v29  ;;  %214 = vst.msk [vmem:[#allocation2 + $0xc8] sm:$0xff] %vm188_vm6, %v3742_v0  ;;  %215 = vst.msk [vmem:[#allocation2 + $0xd0] sm:$0xff] %vm188_vm6, %v3742_v0  ;;  %vm430_vm9 = vcmp.eq.s32.totalorder %v3830_v24, %v3999_v61 }
  0x82   : > { %216 = vst.msk [vmem:[#allocation2 + $0xd8] sm:$0xff] %vm188_vm6, %v3742_v0  ;;  %217 = vst.msk [vmem:[#allocation2 + $0xe0] sm:$0xff] %vm188_vm6, %v3742_v0 }
  0x83   : > { %218 = vst.msk [vmem:[#allocation2 + $0xe8] sm:$0xff] %vm188_vm6, %v3742_v0  ;;  %219 = vst.msk [vmem:[#allocation2 + $0xf0] sm:$0xff] %vm188_vm6, %v3742_v0 }
  0x84   : > { %220 = vst.msk [vmem:[#allocation2 + $0xf8] sm:$0xff] %vm188_vm6, %v3742_v0  ;;  %221 = vst.msk [vmem:[#allocation2 + $0x100] sm:$0xff] %vm188_vm6, %v3742_v0 }
  0x85   : > { %222 = vst.msk [vmem:[#allocation2 + $0x108] sm:$0xff] %vm188_vm6, %v3742_v0  ;;  %223 = vst.msk [vmem:[#allocation2 + $0x110] sm:$0xff] %vm188_vm6, %v3742_v0 }
  0x86   : > { %224 = vst.msk [vmem:[#allocation2 + $0x118] sm:$0xff] %vm188_vm6, %v3742_v0  ;;  %225 = vst.msk [vmem:[#allocation2 + $0x120] sm:$0xff] %vm188_vm6, %v3742_v0 }
  0x87   : > { %3249 = vmatmul.mubr.msk.bf16.gmra.mxu0 %vm3248_vm0, %v3741_v29  ;;  %226 = vst.msk [vmem:[#allocation2 + $0x128] sm:$0xff] %vm188_vm6, %v3742_v0  ;;  %227 = vst.msk [vmem:[#allocation2 + $0x130] sm:$0xff] %vm188_vm6, %v3742_v0 }
  0x88   : > { %3251 = vmatprep.mubr.msk.bf16.mxu0 %vm3250_vm3, %v3741_v29  ;;  %3554 = vmatmul.mubr.msk.bf16.gmra.mxu1 %vm3553_vm4, %v3741_v29  ;;  %228 = vst.msk [vmem:[#allocation2 + $0x138] sm:$0xff] %vm188_vm6, %v3742_v0  ;;  %229 = vst.msk [vmem:[#allocation2 + $0x140] sm:$0xff] %vm188_vm6, %v3742_v0  ;;  %vm429_vm3 = vcmp.eq.s32.totalorder %v3868_v40, %v3999_v61  ;;  %vm431_vm4 = vcmp.eq.s32.totalorder %v3868_v40, %v4002_v62 }
  0x89   : > { %230 = vst.msk [vmem:[#allocation2 + $0x148] sm:$0xff] %vm188_vm6, %v3742_v0  ;;  %231 = vst.msk [vmem:[#allocation2 + $0x150] sm:$0xff] %vm188_vm6, %v3742_v0  ;;  %3556 = vmatprep.mubr.msk.bf16.mxu1 %vm4005_vm5, %v3741_v29  ;;  %vm434_vm5 = vcmp.eq.s32.totalorder %v3830_v24, %v274_v1 }
  0x8a   : > { %232 = vst.msk [vmem:[#allocation2 + $0x158] sm:$0xff] %vm188_vm6, %v3742_v0  ;;  %233 = vst.msk [vmem:[#allocation2 + $0x160] sm:$0xff] %vm188_vm6, %v3742_v0 }
  0x8b   : > { %234 = vst.msk [vmem:[#allocation2 + $0x168] sm:$0xff] %vm188_vm6, %v3742_v0  ;;  %235 = vst.msk [vmem:[#allocation2 + $0x170] sm:$0xff] %vm188_vm6, %v3742_v0 }
  0x8c   : > { %236 = vst.msk [vmem:[#allocation2 + $0x178] sm:$0xff] %vm188_vm6, %v3742_v0  ;;  %237 = vst.msk [vmem:[#allocation2 + $0x180] sm:$0xff] %vm188_vm6, %v3742_v0 }
  0x8d   : > { %238 = vst.msk [vmem:[#allocation2 + $0x188] sm:$0xff] %vm188_vm6, %v3742_v0  ;;  %239 = vst.msk [vmem:[#allocation2 + $0x190] sm:$0xff] %vm188_vm6, %v3742_v0 }
  0x8e   : > { %240 = vst.msk [vmem:[#allocation2 + $0x198] sm:$0xff] %vm188_vm6, %v3742_v0  ;;  %241 = vst.msk [vmem:[#allocation2 + $0x1a0] sm:$0xff] %vm188_vm6, %v3742_v0 }
  0x8f   : > { %242 = vst.msk [vmem:[#allocation2 + $0x1a8] sm:$0xff] %vm188_vm6, %v3742_v0  ;;  %243 = vst.msk [vmem:[#allocation2 + $0x1b0] sm:$0xff] %vm188_vm6, %v3742_v0 }
  0x90   : > { %244 = vst.msk [vmem:[#allocation2 + $0x1b8] sm:$0xff] %vm188_vm6, %v3742_v0  ;;  %245 = vst.msk [vmem:[#allocation2 + $0x1c0] sm:$0xff] %vm188_vm6, %v3742_v0 }
  0x91   : > { %246 = vst.msk [vmem:[#allocation2 + $0x1c8] sm:$0xff] %vm188_vm6, %v3742_v0  ;;  %247 = vst.msk [vmem:[#allocation2 + $0x1d0] sm:$0xff] %vm188_vm6, %v3742_v0 }
  0x92   : > { %248 = vst.msk [vmem:[#allocation2 + $0x1d8] sm:$0xff] %vm188_vm6, %v3742_v0  ;;  %249 = vst.msk [vmem:[#allocation2 + $0x1e0] sm:$0xff] %vm188_vm6, %v3742_v0 }
  0x93   : > { %250 = vst.msk [vmem:[#allocation2 + $0x1e8] sm:$0xff] %vm188_vm6, %v3742_v0  ;;  %251 = vst.msk [vmem:[#allocation2 + $0x1f0] sm:$0xff] %vm188_vm6, %v3742_v0 }
  0x94   : > { %252 = vst.msk [vmem:[#allocation2 + $0x1f8] sm:$0xff] %vm188_vm6, %v3742_v0  ;;  %vm3252_vm13 = vmpackc.low %vm427_vm8, %vm425_vm7  ;;  %vm436_vm7 = vcmp.eq.s32.totalorder %v3830_v24, %v275_v2  ;;  %vm1496_vm8 = vcmp.eq.s32.totalorder %v3874_v44, %v3999_v61 }
  0x95   : > { %vm3254_vm0 = vmpackc.low %vm432_vm10, %vm430_vm9  ;;  %3253 = vmatmul.mubr.msk.bf16.gmra.mxu0 %vm3252_vm13, %v3741_v29  ;;  %vm1498_vm9 = vcmp.eq.s32.totalorder %v3874_v44, %v4002_v62 }
  0x96   : > { %vm3557_vm1 = vmpackc.low %vm1494_vm12, %vm1492_vm11  ;;  %3255 = vmatprep.mubr.msk.bf16.mxu0 %vm3254_vm0, %v3741_v29  ;;  %vm1501_vm11 = vcmp.eq.s32.totalorder %v3833_v26, %v274_v1  ;;  %vm1503_vm12 = vcmp.eq.s32.totalorder %v3833_v26, %v275_v2  ;;  %vm433_vm0 = vcmp.eq.s32.totalorder %v3868_v40, %v274_v1 }
  0x97   : > { %vm3559_vm2 = vmpackc.low %vm1499_vm15, %vm1497_vm14  ;;  %3558 = vmatmul.mubr.msk.bf16.gmra.mxu1 %vm3557_vm1, %v3741_v29  ;;  %vm435_vm1 = vcmp.eq.s32.totalorder %v3868_v40, %v275_v2 }
  0x98   : > { %3560 = vmatprep.mubr.msk.bf16.mxu1 %vm3559_vm2, %v3741_v29  ;;  %vm3256_vm10 = vmpackc.low %vm431_vm4, %vm429_vm3  ;;  %vm438_vm2 = vcmp.eq.s32.totalorder %v3830_v24, %v276_v3  ;;  %vm440_vm3 = vcmp.eq.s32.totalorder %v3830_v24, %v277_v4  ;;  %vm1500_vm4 = vcmp.eq.s32.totalorder %v3874_v44, %v274_v1 }
  0x99   : > { %vm3258_vm13 = vmpackc.low %vm436_vm7, %vm434_vm5  ;;  %vm1502_vm5 = vcmp.eq.s32.totalorder %v3874_v44, %v275_v2 }
  0x9a   : > { %vm3561_vm14 = vmpackc.low %vm1498_vm9, %vm1496_vm8  ;;  %vm1505_vm8 = vcmp.eq.s32.totalorder %v3833_v26, %v276_v3  ;;  %vm1507_vm9 = vcmp.eq.s32.totalorder %v3833_v26, %v277_v4 }
  0x9b   : > { %vm3563_vm15 = vmpackc.low %vm1503_vm12, %vm1501_vm11 }
  0x9c   : > { %vm3260_vm7 = vmpackc.low %vm435_vm1, %vm433_vm0  ;;  %vm444_vm0 = vcmp.eq.s32.totalorder %v3830_v24, %v279_v6  ;;  %vm1504_vm1 = vcmp.eq.s32.totalorder %v3874_v44, %v276_v3 }
  0x9d   : > { %3257 = vmatmul.mubr.msk.bf16.gmra.mxu0 %vm3256_vm10, %v3741_v29  ;;  %vm3262_vm10 = vmpackc.low %vm440_vm3, %vm438_vm2  ;;  %vm1506_vm2 = vcmp.eq.s32.totalorder %v3874_v44, %v277_v4 }
  0x9e   : > { %3259 = vmatprep.mubr.msk.bf16.mxu0 %vm3258_vm13, %v3741_v29  ;;  %vm3565_vm11 = vmpackc.low %vm1502_vm5, %vm1500_vm4  ;;  %vm437_vm13 = vcmp.eq.s32.totalorder %v3868_v40, %v276_v3  ;;  %vm1509_vm4 = vcmp.eq.s32.totalorder %v3833_v26, %v278_v5  ;;  %vm1511_vm5 = vcmp.eq.s32.totalorder %v3833_v26, %v279_v6 }
  0x9f   : > { %3562 = vmatmul.mubr.msk.bf16.gmra.mxu1 %vm3561_vm14, %v3741_v29  ;;  %vm3567_vm12 = vmpackc.low %vm1507_vm9, %vm1505_vm8  ;;  %vm439_vm14 = vcmp.eq.s32.totalorder %v3868_v40, %v277_v4  ;;  %v877_v4 = vld [vmem:[#allocation2 + $0x20] sm:$0xff] }
  0xa0   : > { %3564 = vmatprep.mubr.msk.bf16.mxu1 %vm3563_vm15, %v3741_v29  ;;  %vm442_vm15 = vcmp.eq.s32.totalorder %v3830_v24, %v278_v5  ;;  %vm3264_vm3 = vmpackc.low %vm439_vm14, %vm437_vm13  ;;  %vm448_vm13 = vcmp.eq.s32.totalorder %v3830_v24, %v281_v8  ;;  %vm1508_vm14 = vcmp.eq.s32.totalorder %v3874_v44, %v278_v5 }
  0xa1   : > { %vm3569_vm8 = vmpackc.low %vm1506_vm2, %vm1504_vm1  ;;  %vm1513_vm1 = vcmp.eq.s32.totalorder %v3833_v26, %v280_v7  ;;  %vm1515_vm2 = vcmp.eq.s32.totalorder %v3833_v26, %v281_v8 }
  0xa2   : > { %vm3571_vm9 = vmpackc.low %vm1511_vm5, %vm1509_vm4 }
  0xa3   : > { %vm3575_vm5 = vmpackc.low %vm1515_vm2, %vm1513_vm1 }
  0xa5   : > { %3261 = vmatmul.mubr.msk.bf16.gmra.mxu0 %vm3260_vm7, %v3741_v29  ;;  %vm3266_vm7 = vmpackc.low %vm444_vm0, %vm442_vm15  ;;  %vm1510_vm15 = vcmp.eq.s32.totalorder %v3874_v44, %v279_v6 }
  0xa6   : > { %3263 = vmatprep.mubr.msk.bf16.mxu0 %vm3262_vm10, %v3741_v29  ;;  %vm441_vm10 = vcmp.eq.s32.totalorder %v3868_v40, %v278_v5  ;;  %vm3573_vm4 = vmpackc.low %vm1510_vm15, %vm1508_vm14  ;;  %vm1517_vm14 = vcmp.eq.s32.totalorder %v3833_v26, %v282_v9  ;;  %vm1519_vm15 = vcmp.eq.s32.totalorder %v3833_v26, %v283_v10 }
  0xa7   : > { %3566 = vmatmul.mubr.msk.bf16.gmra.mxu1 %vm3565_vm11, %v3741_v29  ;;  %vm443_vm11 = vcmp.eq.s32.totalorder %v3868_v40, %v279_v6  ;;  %vm3579_vm2 = vmpackc.low %vm1519_vm15, %vm1517_vm14 }
  0xa8   : > { %3568 = vmatprep.mubr.msk.bf16.mxu1 %vm3567_vm12, %v3741_v29  ;;  %vm446_vm12 = vcmp.eq.s32.totalorder %v3830_v24, %v280_v7  ;;  %vm3268_vm0 = vmpackc.low %vm443_vm11, %vm441_vm10  ;;  %vm452_vm10 = vcmp.eq.s32.totalorder %v3830_v24, %v283_v10  ;;  %vm1512_vm11 = vcmp.eq.s32.totalorder %v3874_v44, %v280_v7 }
  0xad   : > { %3265 = vmatmul.mubr.msk.bf16.gmra.mxu0 %vm3264_vm3, %v3741_v29  ;;  %vm3270_vm3 = vmpackc.low %vm448_vm13, %vm446_vm12  ;;  %vm1514_vm12 = vcmp.eq.s32.totalorder %v3874_v44, %v281_v8 }
  0xae   : > { %3267 = vmatprep.mubr.msk.bf16.mxu0 %vm3266_vm7, %v3741_v29  ;;  %vm445_vm7 = vcmp.eq.s32.totalorder %v3868_v40, %v280_v7  ;;  %vm3577_vm1 = vmpackc.low %vm1514_vm12, %vm1512_vm11  ;;  %vm1521_vm11 = vcmp.eq.s32.totalorder %v3833_v26, %v284_v11  ;;  %vm1523_vm12 = vcmp.eq.s32.totalorder %v3833_v26, %v285_v12  ;;  %v4449_v7 = vadd.s32 448, %v3812_v16 }
  0xaf   : > { %3570 = vmatmul.mubr.msk.bf16.gmra.mxu1 %vm3569_vm8, %v3741_v29  ;;  %vm447_vm8 = vcmp.eq.s32.totalorder %v3868_v40, %v281_v8  ;;  %vm3583_vm15 = vmpackc.low %vm1523_vm12, %vm1521_vm11  ;;  %v4452_v8 = vadd.s32 456, %v3812_v16 }
  0xb0   : > { %3572 = vmatprep.mubr.msk.bf16.mxu1 %vm3571_vm9, %v3741_v29  ;;  %vm450_vm9 = vcmp.eq.s32.totalorder %v3830_v24, %v282_v9  ;;  %vm3272_vm13 = vmpackc.low %vm447_vm8, %vm445_vm7  ;;  %vm456_vm7 = vcmp.eq.s32.totalorder %v3830_v24, %v285_v12  ;;  %vm1516_vm8 = vcmp.eq.s32.totalorder %v3874_v44, %v282_v9 }
  0xb5   : > { %3269 = vmatmul.mubr.msk.bf16.gmra.mxu0 %vm3268_vm0, %v3741_v29  ;;  %vm3274_vm0 = vmpackc.low %vm452_vm10, %vm450_vm9  ;;  %vm1518_vm9 = vcmp.eq.s32.totalorder %v3874_v44, %v283_v10 }
  0xb6   : > { %3271 = vmatprep.mubr.msk.bf16.mxu0 %vm3270_vm3, %v3741_v29  ;;  %vm449_vm3 = vcmp.eq.s32.totalorder %v3868_v40, %v282_v9  ;;  %vm3581_vm14 = vmpackc.low %vm1518_vm9, %vm1516_vm8  ;;  %vm1525_vm8 = vcmp.eq.s32.totalorder %v3833_v26, %v286_v13  ;;  %vm1527_vm9 = vcmp.eq.s32.totalorder %v3833_v26, %v287_v14 }
  0xb7   : > { %3574 = vmatmul.mubr.msk.bf16.gmra.mxu1 %vm3573_vm4, %v3741_v29  ;;  %vm451_vm4 = vcmp.eq.s32.totalorder %v3868_v40, %v283_v10  ;;  %vm3587_vm12 = vmpackc.low %vm1527_vm9, %vm1525_vm8 }
  0xb8   : > { %3576 = vmatprep.mubr.msk.bf16.mxu1 %vm3575_vm5, %v3741_v29  ;;  %vm454_vm5 = vcmp.eq.s32.totalorder %v3830_v24, %v284_v11  ;;  %vm3276_vm10 = vmpackc.low %vm451_vm4, %vm449_vm3  ;;  %vm460_vm3 = vcmp.eq.s32.totalorder %v3830_v24, %v287_v14  ;;  %vm1520_vm4 = vcmp.eq.s32.totalorder %v3874_v44, %v284_v11 }
  0xbd   : > { %3273 = vmatmul.mubr.msk.bf16.gmra.mxu0 %vm3272_vm13, %v3741_v29  ;;  %vm3278_vm13 = vmpackc.low %vm456_vm7, %vm454_vm5  ;;  %vm1522_vm5 = vcmp.eq.s32.totalorder %v3874_v44, %v285_v12 }
  0xbe   : > { %3275 = vmatprep.mubr.msk.bf16.mxu0 %vm3274_vm0, %v3741_v29  ;;  %vm453_vm0 = vcmp.eq.s32.totalorder %v3868_v40, %v284_v11  ;;  %vm3585_vm11 = vmpackc.low %vm1522_vm5, %vm1520_vm4  ;;  %vm1529_vm4 = vcmp.eq.s32.totalorder %v3833_v26, %v288_v15  ;;  %vm1531_vm5 = vcmp.eq.s32.totalorder %v3833_v26, %v289_v17 }
  0xbf   : > { %3578 = vmatmul.mubr.msk.bf16.gmra.mxu1 %vm3577_vm1, %v3741_v29  ;;  %vm455_vm1 = vcmp.eq.s32.totalorder %v3868_v40, %v285_v12  ;;  %vm3591_vm9 = vmpackc.low %vm1531_vm5, %vm1529_vm4 }
  0xc0   : > { %3580 = vmatprep.mubr.msk.bf16.mxu1 %vm3579_vm2, %v3741_v29  ;;  %vm458_vm2 = vcmp.eq.s32.totalorder %v3830_v24, %v286_v13  ;;  %vm3280_vm7 = vmpackc.low %vm455_vm1, %vm453_vm0  ;;  %vm464_vm0 = vcmp.eq.s32.totalorder %v3830_v24, %v289_v17  ;;  %vm1524_vm1 = vcmp.eq.s32.totalorder %v3874_v44, %v286_v13 }
  0xc5   : > { %3277 = vmatmul.mubr.msk.bf16.gmra.mxu0 %vm3276_vm10, %v3741_v29  ;;  %vm3282_vm10 = vmpackc.low %vm460_vm3, %vm458_vm2  ;;  %vm1526_vm2 = vcmp.eq.s32.totalorder %v3874_v44, %v287_v14 }
  0xc6   : > { %3279 = vmatprep.mubr.msk.bf16.mxu0 %vm3278_vm13, %v3741_v29  ;;  %vm457_vm13 = vcmp.eq.s32.totalorder %v3868_v40, %v286_v13  ;;  %vm3589_vm8 = vmpackc.low %vm1526_vm2, %vm1524_vm1  ;;  %vm1533_vm1 = vcmp.eq.s32.totalorder %v3833_v26, %v290_v18  ;;  %vm1535_vm2 = vcmp.eq.s32.totalorder %v3833_v26, %v291_v19 }
  0xc7   : > { %3582 = vmatmul.mubr.msk.bf16.gmra.mxu1 %vm3581_vm14, %v3741_v29  ;;  %vm459_vm14 = vcmp.eq.s32.totalorder %v3868_v40, %v287_v14  ;;  %vm3595_vm5 = vmpackc.low %vm1535_vm2, %vm1533_vm1  ;;  %v878_v14 = vld [vmem:[#allocation2 + $0x28] sm:$0xff] }
  0xc8   : > { %3584 = vmatprep.mubr.msk.bf16.mxu1 %vm3583_vm15, %v3741_v29  ;;  %vm462_vm15 = vcmp.eq.s32.totalorder %v3830_v24, %v288_v15  ;;  %vm3284_vm3 = vmpackc.low %vm459_vm14, %vm457_vm13  ;;  %vm468_vm13 = vcmp.eq.s32.totalorder %v3830_v24, %v291_v19  ;;  %vm1528_vm14 = vcmp.eq.s32.totalorder %v3874_v44, %v288_v15 }
  0xcd   : > { %3281 = vmatmul.mubr.msk.bf16.gmra.mxu0 %vm3280_vm7, %v3741_v29  ;;  %vm3286_vm7 = vmpackc.low %vm464_vm0, %vm462_vm15  ;;  %vm1530_vm15 = vcmp.eq.s32.totalorder %v3874_v44, %v289_v17 }
  0xce   : > { %3283 = vmatprep.mubr.msk.bf16.mxu0 %vm3282_vm10, %v3741_v29  ;;  %vm461_vm10 = vcmp.eq.s32.totalorder %v3868_v40, %v288_v15  ;;  %vm3593_vm4 = vmpackc.low %vm1530_vm15, %vm1528_vm14  ;;  %vm1537_vm14 = vcmp.eq.s32.totalorder %v3833_v26, %v292_v20  ;;  %vm1539_vm15 = vcmp.eq.s32.totalorder %v3833_v26, %v293_v21 }
  0xcf   : > { %3586 = vmatmul.mubr.msk.bf16.gmra.mxu1 %vm3585_vm11, %v3741_v29  ;;  %vm463_vm11 = vcmp.eq.s32.totalorder %v3868_v40, %v289_v17  ;;  %vm3599_vm2 = vmpackc.low %vm1539_vm15, %vm1537_vm14 }
  0xd0   : > { %3588 = vmatprep.mubr.msk.bf16.mxu1 %vm3587_vm12, %v3741_v29  ;;  %vm466_vm12 = vcmp.eq.s32.totalorder %v3830_v24, %v290_v18  ;;  %vm3288_vm0 = vmpackc.low %vm463_vm11, %vm461_vm10  ;;  %vm472_vm10 = vcmp.eq.s32.totalorder %v3830_v24, %v293_v21  ;;  %vm1532_vm11 = vcmp.eq.s32.totalorder %v3874_v44, %v290_v18 }
  0xd5   : > { %3285 = vmatmul.mubr.msk.bf16.gmra.mxu0 %vm3284_vm3, %v3741_v29  ;;  %vm3290_vm3 = vmpackc.low %vm468_vm13, %vm466_vm12  ;;  %vm1534_vm12 = vcmp.eq.s32.totalorder %v3874_v44, %v291_v19 }
  0xd6   : > { %3287 = vmatprep.mubr.msk.bf16.mxu0 %vm3286_vm7, %v3741_v29  ;;  %vm465_vm7 = vcmp.eq.s32.totalorder %v3868_v40, %v290_v18  ;;  %vm3597_vm1 = vmpackc.low %vm1534_vm12, %vm1532_vm11  ;;  %vm1541_vm11 = vcmp.eq.s32.totalorder %v3833_v26, %v294_v22  ;;  %vm1543_vm12 = vcmp.eq.s32.totalorder %v3833_v26, %v295_v23 }
  0xd7   : > { %3590 = vmatmul.mubr.msk.bf16.gmra.mxu1 %vm3589_vm8, %v3741_v29  ;;  %vm467_vm8 = vcmp.eq.s32.totalorder %v3868_v40, %v291_v19  ;;  %vm3603_vm15 = vmpackc.low %vm1543_vm12, %vm1541_vm11 }
  0xd8   : > { %3592 = vmatprep.mubr.msk.bf16.mxu1 %vm3591_vm9, %v3741_v29  ;;  %vm470_vm9 = vcmp.eq.s32.totalorder %v3830_v24, %v292_v20  ;;  %vm3292_vm13 = vmpackc.low %vm467_vm8, %vm465_vm7  ;;  %vm476_vm7 = vcmp.eq.s32.totalorder %v3830_v24, %v295_v23  ;;  %vm1536_vm8 = vcmp.eq.s32.totalorder %v3874_v44, %v292_v20 }
  0xdd   : > { %3289 = vmatmul.mubr.msk.bf16.gmra.mxu0 %vm3288_vm0, %v3741_v29  ;;  %vm3294_vm0 = vmpackc.low %vm472_vm10, %vm470_vm9  ;;  %vm1538_vm9 = vcmp.eq.s32.totalorder %v3874_v44, %v293_v21 }
  0xde   : > { %3291 = vmatprep.mubr.msk.bf16.mxu0 %vm3290_vm3, %v3741_v29  ;;  %vm469_vm3 = vcmp.eq.s32.totalorder %v3868_v40, %v292_v20  ;;  %vm3601_vm14 = vmpackc.low %vm1538_vm9, %vm1536_vm8  ;;  %vm1545_vm8 = vcmp.eq.s32.totalorder %v3833_v26, %v296_v25  ;;  %vm1547_vm9 = vcmp.eq.s32.totalorder %v3833_v26, %v297_v27 }
  0xdf   : > { %3594 = vmatmul.mubr.msk.bf16.gmra.mxu1 %vm3593_vm4, %v3741_v29  ;;  %vm471_vm4 = vcmp.eq.s32.totalorder %v3868_v40, %v293_v21  ;;  %vm3607_vm12 = vmpackc.low %vm1547_vm9, %vm1545_vm8 }
  0xe0   : > { %3596 = vmatprep.mubr.msk.bf16.mxu1 %vm3595_vm5, %v3741_v29  ;;  %vm474_vm5 = vcmp.eq.s32.totalorder %v3830_v24, %v294_v22  ;;  %vm3296_vm10 = vmpackc.low %vm471_vm4, %vm469_vm3  ;;  %vm480_vm3 = vcmp.eq.s32.totalorder %v3830_v24, %v297_v27  ;;  %vm1540_vm4 = vcmp.eq.s32.totalorder %v3874_v44, %v294_v22 }
  0xe5   : > { %3293 = vmatmul.mubr.msk.bf16.gmra.mxu0 %vm3292_vm13, %v3741_v29  ;;  %vm3298_vm13 = vmpackc.low %vm476_vm7, %vm474_vm5  ;;  %vm1542_vm5 = vcmp.eq.s32.totalorder %v3874_v44, %v295_v23 }
  0xe6   : > { %3295 = vmatprep.mubr.msk.bf16.mxu0 %vm3294_vm0, %v3741_v29  ;;  %vm473_vm0 = vcmp.eq.s32.totalorder %v3868_v40, %v294_v22  ;;  %vm3605_vm11 = vmpackc.low %vm1542_vm5, %vm1540_vm4  ;;  %vm1549_vm4 = vcmp.eq.s32.totalorder %v3833_v26, %v298_v28  ;;  %vm1551_vm5 = vcmp.eq.s32.totalorder %v3833_v26, %v299_v30 }
  0xe7   : > { %3598 = vmatmul.mubr.msk.bf16.gmra.mxu1 %vm3597_vm1, %v3741_v29  ;;  %vm475_vm1 = vcmp.eq.s32.totalorder %v3868_v40, %v295_v23  ;;  %vm3611_vm9 = vmpackc.low %vm1551_vm5, %vm1549_vm4 }
  0xe8   : > { %3600 = vmatprep.mubr.msk.bf16.mxu1 %vm3599_vm2, %v3741_v29  ;;  %vm478_vm2 = vcmp.eq.s32.totalorder %v3830_v24, %v296_v25  ;;  %vm3300_vm7 = vmpackc.low %vm475_vm1, %vm473_vm0  ;;  %vm484_vm0 = vcmp.eq.s32.totalorder %v3830_v24, %v299_v30  ;;  %vm1544_vm1 = vcmp.eq.s32.totalorder %v3874_v44, %v296_v25 }
  0xed   : > { %3297 = vmatmul.mubr.msk.bf16.gmra.mxu0 %vm3296_vm10, %v3741_v29  ;;  %vm3302_vm10 = vmpackc.low %vm480_vm3, %vm478_vm2  ;;  %vm1546_vm2 = vcmp.eq.s32.totalorder %v3874_v44, %v297_v27 }
  0xee   : > { %3299 = vmatprep.mubr.msk.bf16.mxu0 %vm3298_vm13, %v3741_v29  ;;  %vm477_vm13 = vcmp.eq.s32.totalorder %v3868_v40, %v296_v25  ;;  %vm3609_vm8 = vmpackc.low %vm1546_vm2, %vm1544_vm1  ;;  %vm1553_vm1 = vcmp.eq.s32.totalorder %v3833_v26, %v300_v31  ;;  %vm1555_vm2 = vcmp.eq.s32.totalorder %v3833_v26, %v301_v32  ;;  %v879_v25 = vld [vmem:[#allocation2 + $0x30] sm:$0xff] }
  0xef   : > { %3602 = vmatmul.mubr.msk.bf16.gmra.mxu1 %vm3601_vm14, %v3741_v29  ;;  %vm479_vm14 = vcmp.eq.s32.totalorder %v3868_v40, %v297_v27  ;;  %vm3615_vm5 = vmpackc.low %vm1555_vm2, %vm1553_vm1 }
  0xf0   : > { %3604 = vmatprep.mubr.msk.bf16.mxu1 %vm3603_vm15, %v3741_v29  ;;  %vm482_vm15 = vcmp.eq.s32.totalorder %v3830_v24, %v298_v28  ;;  %vm3304_vm3 = vmpackc.low %vm479_vm14, %vm477_vm13  ;;  %vm488_vm13 = vcmp.eq.s32.totalorder %v3830_v24, %v301_v32  ;;  %vm1548_vm14 = vcmp.eq.s32.totalorder %v3874_v44, %v298_v28 }
  0xf5   : > { %3301 = vmatmul.mubr.msk.bf16.gmra.mxu0 %vm3300_vm7, %v3741_v29  ;;  %vm3306_vm7 = vmpackc.low %vm484_vm0, %vm482_vm15  ;;  %vm1550_vm15 = vcmp.eq.s32.totalorder %v3874_v44, %v299_v30 }
  0xf6   : > { %3303 = vmatprep.mubr.msk.bf16.mxu0 %vm3302_vm10, %v3741_v29  ;;  %vm481_vm10 = vcmp.eq.s32.totalorder %v3868_v40, %v298_v28  ;;  %vm3613_vm4 = vmpackc.low %vm1550_vm15, %vm1548_vm14  ;;  %vm1557_vm14 = vcmp.eq.s32.totalorder %v3833_v26, %v302_v33  ;;  %vm1559_vm15 = vcmp.eq.s32.totalorder %v3833_v26, %v303_v34 }
  0xf7   : > { %3606 = vmatmul.mubr.msk.bf16.gmra.mxu1 %vm3605_vm11, %v3741_v29  ;;  %vm483_vm11 = vcmp.eq.s32.totalorder %v3868_v40, %v299_v30  ;;  %vm3619_vm2 = vmpackc.low %vm1559_vm15, %vm1557_vm14 }
  0xf8   : > { %3608 = vmatprep.mubr.msk.bf16.mxu1 %vm3607_vm12, %v3741_v29  ;;  %vm486_vm12 = vcmp.eq.s32.totalorder %v3830_v24, %v300_v31  ;;  %vm3308_vm0 = vmpackc.low %vm483_vm11, %vm481_vm10  ;;  %vm492_vm10 = vcmp.eq.s32.totalorder %v3830_v24, %v303_v34  ;;  %vm1552_vm11 = vcmp.eq.s32.totalorder %v3874_v44, %v300_v31 }
  0xfd   : > { %3305 = vmatmul.mubr.msk.bf16.gmra.mxu0 %vm3304_vm3, %v3741_v29  ;;  %vm3310_vm3 = vmpackc.low %vm488_vm13, %vm486_vm12  ;;  %vm1554_vm12 = vcmp.eq.s32.totalorder %v3874_v44, %v301_v32 }
  0xfe   : > { %3307 = vmatprep.mubr.msk.bf16.mxu0 %vm3306_vm7, %v3741_v29  ;;  %vm485_vm7 = vcmp.eq.s32.totalorder %v3868_v40, %v300_v31  ;;  %vm3617_vm1 = vmpackc.low %vm1554_vm12, %vm1552_vm11  ;;  %vm1561_vm11 = vcmp.eq.s32.totalorder %v3833_v26, %v304_v35  ;;  %vm1563_vm12 = vcmp.eq.s32.totalorder %v3833_v26, %v305_v36  ;;  %v4508_v31 = vadd.s32 464, %v3812_v16 }
  0xff   : > { %3610 = vmatmul.mubr.msk.bf16.gmra.mxu1 %vm3609_vm8, %v3741_v29  ;;  %vm487_vm8 = vcmp.eq.s32.totalorder %v3868_v40, %v301_v32  ;;  %vm3623_vm15 = vmpackc.low %vm1563_vm12, %vm1561_vm11  ;;  %v4511_v32 = vadd.s32 472, %v3812_v16 }
 0x100   : > { %3612 = vmatprep.mubr.msk.bf16.mxu1 %vm3611_vm9, %v3741_v29  ;;  %vm490_vm9 = vcmp.eq.s32.totalorder %v3830_v24, %v302_v33  ;;  %vm3312_vm13 = vmpackc.low %vm487_vm8, %vm485_vm7  ;;  %vm496_vm7 = vcmp.eq.s32.totalorder %v3830_v24, %v305_v36  ;;  %vm1556_vm8 = vcmp.eq.s32.totalorder %v3874_v44, %v302_v33 }
 0x105   : > { %3309 = vmatmul.mubr.msk.bf16.gmra.mxu0 %vm3308_vm0, %v3741_v29  ;;  %vm3314_vm0 = vmpackc.low %vm492_vm10, %vm490_vm9  ;;  %vm1558_vm9 = vcmp.eq.s32.totalorder %v3874_v44, %v303_v34 }
 0x106   : > { %3311 = vmatprep.mubr.msk.bf16.mxu0 %vm3310_vm3, %v3741_v29  ;;  %vm489_vm3 = vcmp.eq.s32.totalorder %v3868_v40, %v302_v33  ;;  %vm3621_vm14 = vmpackc.low %vm1558_vm9, %vm1556_vm8  ;;  %vm1565_vm8 = vcmp.eq.s32.totalorder %v3833_v26, %v4393_v38  ;;  %vm1567_vm9 = vcmp.eq.s32.totalorder %v3833_v26, %v4396_v39 }
 0x107   : > { %3614 = vmatmul.mubr.msk.bf16.gmra.mxu1 %vm3613_vm4, %v3741_v29  ;;  %vm491_vm4 = vcmp.eq.s32.totalorder %v3868_v40, %v303_v34  ;;  %vm3627_vm12 = vmpackc.low %vm1567_vm9, %vm1565_vm8 }
 0x108   : > { %3616 = vmatprep.mubr.msk.bf16.mxu1 %vm3615_vm5, %v3741_v29  ;;  %vm494_vm5 = vcmp.eq.s32.totalorder %v3830_v24, %v304_v35  ;;  %vm3316_vm10 = vmpackc.low %vm491_vm4, %vm489_vm3  ;;  %vm500_vm3 = vcmp.eq.s32.totalorder %v3830_v24, %v4396_v39  ;;  %vm1560_vm4 = vcmp.eq.s32.totalorder %v3874_v44, %v304_v35 }
 0x10d   : > { %3313 = vmatmul.mubr.msk.bf16.gmra.mxu0 %vm3312_vm13, %v3741_v29  ;;  %vm3318_vm13 = vmpackc.low %vm496_vm7, %vm494_vm5  ;;  %vm1562_vm5 = vcmp.eq.s32.totalorder %v3874_v44, %v305_v36 }
 0x10e   : > { %3315 = vmatprep.mubr.msk.bf16.mxu0 %vm3314_vm0, %v3741_v29  ;;  %vm493_vm0 = vcmp.eq.s32.totalorder %v3868_v40, %v304_v35  ;;  %vm3625_vm11 = vmpackc.low %vm1562_vm5, %vm1560_vm4  ;;  %vm1569_vm4 = vcmp.eq.s32.totalorder %v3833_v26, %v4417_v53  ;;  %vm1571_vm5 = vcmp.eq.s32.totalorder %v3833_v26, %v4420_v54 }
 0x10f   : > { %3618 = vmatmul.mubr.msk.bf16.gmra.mxu1 %vm3617_vm1, %v3741_v29  ;;  %v1067_v41 = vpop.f32.mrf.mxu0  ;;  %vm495_vm1 = vcmp.eq.s32.totalorder %v3868_v40, %v305_v36  ;;  %vm3631_vm9 = vmpackc.low %vm1571_vm5, %vm1569_vm4 }
 0x110   : > { %3620 = vmatprep.mubr.msk.bf16.mxu1 %vm3619_vm2, %v3741_v29  ;;  %v1322_v42 = vadd.f32 %v1067_v41, %v873_v37  ;;  %v2137_v46 = vpop.f32.mrf.mxu1  ;;  %vm498_vm2 = vcmp.eq.s32.totalorder %v3830_v24, %v4393_v38  ;;  %vm3320_vm7 = vmpackc.low %vm495_vm1, %vm493_vm0  ;;  %vm504_vm0 = vcmp.eq.s32.totalorder %v3830_v24, %v4420_v54  ;;  %vm1564_vm1 = vcmp.eq.s32.totalorder %v3874_v44, %v4393_v38 }
 0x111   : > { %v1069_v43 = vpop.f32.mrf.mxu0 }
 0x112   : > { %1386 = vst.msk [vmem:[#allocation2] sm:$0xff] %vm188_vm6, %v1322_v42  ;;  %v2139_v48 = vpop.f32.mrf.mxu1 }
 0x113   : > { %v1070_v47 = vpop.f32.mrf.mxu0 }
 0x114   : > { %v1323_v49 = vadd.f32 %v1070_v47, %v874_v45  ;;  %v2140_v52 = vpop.f32.mrf.mxu1 }
 0x115   : > { %3317 = vmatmul.mubr.msk.bf16.gmra.mxu0 %vm3316_vm10, %v3741_v29  ;;  %v1072_v50 = vpop.f32.mrf.mxu0  ;;  %vm3322_vm10 = vmpackc.low %vm500_vm3, %vm498_vm2  ;;  %vm1566_vm2 = vcmp.eq.s32.totalorder %v3874_v44, %v4396_v39 }
 0x116   : > { %3319 = vmatprep.mubr.msk.bf16.mxu0 %vm3318_vm13, %v3741_v29  ;;  %1387 = vst.msk [vmem:[#allocation2 + $0x8] sm:$0xff] %vm188_vm6, %v1323_v49  ;;  %v2142_v56 = vpop.f32.mrf.mxu1  ;;  %vm497_vm13 = vcmp.eq.s32.totalorder %v3868_v40, %v4393_v38  ;;  %vm3629_vm8 = vmpackc.low %vm1566_vm2, %vm1564_vm1  ;;  %vm1573_vm1 = vcmp.eq.s32.totalorder %v3833_v26, %v4449_v7  ;;  %vm1575_vm2 = vcmp.eq.s32.totalorder %v3833_v26, %v4452_v8  ;;  %v881_v50 = vld [vmem:[#allocation2 + $0x40] sm:$0xff] }
 0x117   : > { %3622 = vmatmul.mubr.msk.bf16.gmra.mxu1 %vm3621_vm14, %v3741_v29  ;;  %v1075_v55 = vpop.f32.mrf.mxu0  ;;  %vm499_vm14 = vcmp.eq.s32.totalorder %v3868_v40, %v4396_v39  ;;  %vm3635_vm5 = vmpackc.low %vm1575_vm2, %vm1573_vm1  ;;  %v880_v39 = vld [vmem:[#allocation2 + $0x38] sm:$0xff] }
 0x118   : > { %3624 = vmatprep.mubr.msk.bf16.mxu1 %vm3623_vm15, %v3741_v29  ;;  %v1324_v57 = vadd.f32 %v1075_v55, %v875_v51  ;;  %v2145_v61 = vpop.f32.mrf.mxu1  ;;  %vm502_vm15 = vcmp.eq.s32.totalorder %v3830_v24, %v4417_v53  ;;  %vm3324_vm3 = vmpackc.low %vm499_vm14, %vm497_vm13  ;;  %vm508_vm13 = vcmp.eq.s32.totalorder %v3830_v24, %v4452_v8  ;;  %vm1568_vm14 = vcmp.eq.s32.totalorder %v3874_v44, %v4417_v53 }
 0x119   : > { %v1943_v58 = vld [vmem:[#allocation2] sm:$0xff]  ;;  %v1077_v59 = vpop.f32.mrf.mxu0  ;;  %v4573_v55 = vadd.s32 488, %v3812_v16 }
 0x11a   : > { %v2392_v62 = vadd.f32 %v2137_v46, %v1943_v58  ;;  %1388 = vst.msk [vmem:[#allocation2 + $0x10] sm:$0xff] %vm188_vm6, %v1324_v57  ;;  %v2147_v0 = vpop.f32.mrf.mxu1 }
 0x11b   : > { %v1078_v63 = vpop.f32.mrf.mxu0 }
 0x11c   : > { %2456 = vst.msk [vmem:[#allocation2] sm:$0xff] %vm188_vm6, %v2392_v62  ;;  %v1325_v1 = vadd.f32 %v1078_v63, %v876_v60  ;;  %v2148_v5 = vpop.f32.mrf.mxu1  ;;  %v882_v62 = vld [vmem:[#allocation2 + $0x48] sm:$0xff] }
 0x11d   : > { %3321 = vmatmul.mubr.msk.bf16.gmra.mxu0 %vm3320_vm7, %v3741_v29  ;;  %v1944_v2 = vld [vmem:[#allocation2 + $0x8] sm:$0xff]  ;;  %v1080_v3 = vpop.f32.mrf.mxu0  ;;  %vm3326_vm7 = vmpackc.low %vm504_vm0, %vm502_vm15  ;;  %vm1570_vm15 = vcmp.eq.s32.totalorder %v3874_v44, %v4420_v54 }
 0x11e   : > { %3323 = vmatprep.mubr.msk.bf16.mxu0 %vm3322_vm10, %v3741_v29  ;;  %v2393_v6 = vadd.f32 %v2140_v52, %v1944_v2  ;;  %1389 = vst.msk [vmem:[#allocation2 + $0x18] sm:$0xff] %vm188_vm6, %v1325_v1  ;;  %v2150_v10 = vpop.f32.mrf.mxu1  ;;  %vm501_vm10 = vcmp.eq.s32.totalorder %v3868_v40, %v4417_v53  ;;  %vm4503_vm4 = vmpackc.low %vm1570_vm15, %vm1568_vm14  ;;  %vm1577_vm14 = vcmp.eq.s32.totalorder %v3833_v26, %v4508_v31 }
 0x11f   : > { %3626 = vmatmul.mubr.msk.bf16.gmra.mxu1 %vm3625_vm11, %v3741_v29  ;;  %v1083_v9 = vpop.f32.mrf.mxu0  ;;  %vm503_vm11 = vcmp.eq.s32.totalorder %v3868_v40, %v4420_v54  ;;  %vm1579_vm15 = vcmp.eq.s32.totalorder %v3833_v26, %v4511_v32  ;;  %v4570_v54 = vadd.s32 480, %v3812_v16 }
 0x120   : > { %3628 = vmatprep.mubr.msk.bf16.mxu1 %vm3627_vm12, %v3741_v29  ;;  %2457 = vst.msk [vmem:[#allocation2 + $0x8] sm:$0xff] %vm188_vm6, %v2393_v6  ;;  %v1326_v11 = vadd.f32 %v1083_v9, %v877_v4  ;;  %v2153_v15 = vpop.f32.mrf.mxu1  ;;  %vm506_vm12 = vcmp.eq.s32.totalorder %v3830_v24, %v4449_v7  ;;  %vm3328_vm0 = vmpackc.low %vm503_vm11, %vm501_vm10  ;;  %vm512_vm10 = vcmp.eq.s32.totalorder %v3830_v24, %v4511_v32 }
 0x121   : > { %v1945_v12 = vld [vmem:[#allocation2 + $0x10] sm:$0xff]  ;;  %v1085_v13 = vpop.f32.mrf.mxu0  ;;  %vm1572_vm11 = vcmp.eq.s32.totalorder %v3874_v44, %v4449_v7  ;;  %vm3639_vm2 = vmpackc.low %vm1579_vm15, %vm1577_vm14 }
 0x122   : > { %v2394_v17 = vadd.f32 %v2145_v61, %v1945_v12  ;;  %1390 = vst.msk [vmem:[#allocation2 + $0x20] sm:$0xff] %vm188_vm6, %v1326_v11  ;;  %v2155_v20 = vpop.f32.mrf.mxu1  ;;  %v4632_v11 = vadd.s32 496, %v3812_v16  ;;  %v4635_v12 = vadd.s32 504, %v3812_v16 }
 0x123   : > { %v1086_v18 = vpop.f32.mrf.mxu0  ;;  %v4471_v19 = vld [vmem:[#allocation2] sm:$0xff]  ;;  %v884_v20 = vld [vmem:[#allocation2 + $0x58] sm:$0xff] }
 0x124   : > { %2458 = vst.msk [vmem:[#allocation2 + $0x10] sm:$0xff] %vm188_vm6, %v2394_v17  ;;  %v1327_v21 = vadd.f32 %v1086_v18, %v878_v14  ;;  %2648 = vrot.lane.b32.xlu0 %v4471_v19, %s3743_s21  ;;  %v2156_v27 = vpop.f32.mrf.mxu1 }
 0x125   : > { %3325 = vmatmul.mubr.msk.bf16.gmra.mxu0 %vm3324_vm3, %v3741_v29  ;;  %v1946_v22 = vld [vmem:[#allocation2 + $0x18] sm:$0xff]  ;;  %v1088_v23 = vpop.f32.mrf.mxu0  ;;  %vm3330_vm3 = vmpackc.low %vm508_vm13, %vm506_vm12  ;;  %vm1574_vm12 = vcmp.eq.s32.totalorder %v3874_v44, %v4452_v8 }
 0x126   : > { %3327 = vmatprep.mubr.msk.bf16.mxu0 %vm3326_vm7, %v3741_v29  ;;  %v2395_v28 = vadd.f32 %v2148_v5, %v1946_v22  ;;  %1391 = vst.msk [vmem:[#allocation2 + $0x28] sm:$0xff] %vm188_vm6, %v1327_v21  ;;  %v2158_v35 = vpop.f32.mrf.mxu1  ;;  %vm505_vm7 = vcmp.eq.s32.totalorder %v3868_v40, %v4449_v7  ;;  %vm4565_vm1 = vmpackc.low %vm1574_vm12, %vm1572_vm11  ;;  %vm1581_vm11 = vcmp.eq.s32.totalorder %v3833_v26, %v4570_v54  ;;  %v883_v7 = vld [vmem:[#allocation2 + $0x50] sm:$0xff] }
 0x127   : > { %3630 = vmatmul.mubr.msk.bf16.gmra.mxu1 %vm3629_vm8, %v3741_v29  ;;  %v1091_v33 = vpop.f32.mrf.mxu0  ;;  %v4514_v34 = vld [vmem:[#allocation2 + $0x8] sm:$0xff]  ;;  %vm507_vm8 = vcmp.eq.s32.totalorder %v3868_v40, %v4452_v8  ;;  %vm1583_vm12 = vcmp.eq.s32.totalorder %v3833_v26, %v4573_v55 }
 0x128   : > { %3632 = vmatprep.mubr.msk.bf16.mxu1 %vm3631_vm9, %v3741_v29  ;;  %2459 = vst.msk [vmem:[#allocation2 + $0x18] sm:$0xff] %vm188_vm6, %v2395_v28  ;;  %v1328_v36 = vadd.f32 %v1091_v33, %v879_v25  ;;  %2650 = vrot.lane.b32.xlu0 %v4514_v34, %s3743_s21  ;;  %v2161_v41 = vpop.f32.mrf.mxu1  ;;  %vm510_vm9 = vcmp.eq.s32.totalorder %v3830_v24, %v4508_v31  ;;  %vm3332_vm13 = vmpackc.low %vm507_vm8, %vm505_vm7 }
 0x129   : > { %v1947_v37 = vld [vmem:[#allocation2 + $0x20] sm:$0xff]  ;;  %v1093_v38 = vpop.f32.mrf.mxu0  ;;  %vm516_vm7 = vcmp.eq.s32.totalorder %v3830_v24, %v4573_v55  ;;  %vm1576_vm8 = vcmp.eq.s32.totalorder %v3874_v44, %v4508_v31  ;;  %vm3643_vm15 = vmpackc.low %vm1583_vm12, %vm1581_vm11 }
 0x12a   : > { %v2396_v42 = vadd.f32 %v2153_v15, %v1947_v37  ;;  %1392 = vst.msk [vmem:[#allocation2 + $0x30] sm:$0xff] %vm188_vm6, %v1328_v36  ;;  %v2163_v46 = vpop.f32.mrf.mxu1 }
 0x12b   : > { %v1094_v43 = vpop.f32.mrf.mxu0  ;;  %v4539_v45 = vld [vmem:[#allocation2 + $0x10] sm:$0xff] }
 0x12c   : > { %2460 = vst.msk [vmem:[#allocation2 + $0x20] sm:$0xff] %vm188_vm6, %v2396_v42  ;;  %v1329_v47 = vadd.f32 %v1094_v43, %v880_v39  ;;  %2652 = vrot.lane.b32.xlu1 %v4539_v45, %s3743_s21  ;;  %v2164_v51 = vpop.f32.mrf.mxu1 }
 0x12d   : > { %3329 = vmatmul.mubr.msk.bf16.gmra.mxu0 %vm3328_vm0, %v3741_v29  ;;  %v1948_v48 = vld [vmem:[#allocation2 + $0x28] sm:$0xff]  ;;  %v1096_v49 = vpop.f32.mrf.mxu0  ;;  %vm3334_vm0 = vmpackc.low %vm512_vm10, %vm510_vm9  ;;  %vm1578_vm9 = vcmp.eq.s32.totalorder %v3874_v44, %v4511_v32 }
 0x12e   : > { %3331 = vmatprep.mubr.msk.bf16.mxu0 %vm3330_vm3, %v3741_v29  ;;  %v2397_v52 = vadd.f32 %v2156_v27, %v1948_v48  ;;  %1393 = vst.msk [vmem:[#allocation2 + $0x38] sm:$0xff] %vm188_vm6, %v1329_v47  ;;  %v2166_v58 = vpop.f32.mrf.mxu1  ;;  %vm509_vm3 = vcmp.eq.s32.totalorder %v3868_v40, %v4508_v31  ;;  %vm4627_vm14 = vmpackc.low %vm1578_vm9, %vm1576_vm8  ;;  %vm1585_vm8 = vcmp.eq.s32.totalorder %v3833_v26, %v4632_v11 }
 0x12f   : > { %3634 = vmatmul.mubr.msk.bf16.gmra.mxu1 %vm4503_vm4, %v3741_v29  ;;  %v1099_v56 = vpop.f32.mrf.mxu0  ;;  %v4576_v57 = vld [vmem:[#allocation2 + $0x18] sm:$0xff]  ;;  %vm511_vm4 = vcmp.eq.s32.totalorder %v3868_v40, %v4511_v32  ;;  %vm1587_vm9 = vcmp.eq.s32.totalorder %v3833_v26, %v4635_v12  ;;  %v885_v32 = vld [vmem:[#allocation2 + $0x60] sm:$0xff] }
 0x130   : > { %3636 = vmatprep.mubr.msk.bf16.mxu1 %vm3635_vm5, %v3741_v29  ;;  %2461 = vst.msk [vmem:[#allocation2 + $0x28] sm:$0xff] %vm188_vm6, %v2397_v52  ;;  %v1330_v59 = vadd.f32 %v1099_v56, %v881_v50  ;;  %2654 = vrot.lane.b32.xlu1 %v4576_v57, %s3743_s21  ;;  %v2169_v63 = vpop.f32.mrf.mxu1  ;;  %vm514_vm5 = vcmp.eq.s32.totalorder %v3830_v24, %v4570_v54  ;;  %vm3336_vm10 = vmpackc.low %vm511_vm4, %vm509_vm3 }
 0x131   : > { %v1949_v60 = vld [vmem:[#allocation2 + $0x30] sm:$0xff]  ;;  %v1101_v61 = vpop.f32.mrf.mxu0  ;;  %vm520_vm3 = vcmp.eq.s32.totalorder %v3830_v24, %v4635_v12  ;;  %vm1580_vm4 = vcmp.eq.s32.totalorder %v3874_v44, %v4570_v54  ;;  %vm3647_vm12 = vmpackc.low %vm1587_vm9, %vm1585_vm8 }
 0x132   : > { %v2398_v0 = vadd.f32 %v2161_v41, %v1949_v60  ;;  %1394 = vst.msk [vmem:[#allocation2 + $0x40] sm:$0xff] %vm188_vm6, %v1330_v59  ;;  %v2171_v3 = vpop.f32.mrf.mxu1  ;;  %v886_v41 = vld [vmem:[#allocation2 + $0x68] sm:$0xff]  ;;  %v888_v60 = vld [vmem:[#allocation2 + $0x78] sm:$0xff] }
 0x133   : > { %v1102_v1 = vpop.f32.mrf.mxu0  ;;  %v4601_v2 = vld [vmem:[#allocation2 + $0x20] sm:$0xff] }
 0x134   : > { %2462 = vst.msk [vmem:[#allocation2 + $0x30] sm:$0xff] %vm188_vm6, %v2398_v0  ;;  %v1331_v4 = vadd.f32 %v1102_v1, %v882_v62  ;;  %2656 = vrot.lane.b32.xlu0 %v4601_v2, %s3743_s21  ;;  %v2172_v8 = vpop.f32.mrf.mxu1 }
 0x135   : > { %3333 = vmatmul.mubr.msk.bf16.gmra.mxu0 %vm3332_vm13, %v3741_v29  ;;  %v1950_v5 = vld [vmem:[#allocation2 + $0x38] sm:$0xff]  ;;  %v1104_v6 = vpop.f32.mrf.mxu0  ;;  %vm3338_vm13 = vmpackc.low %vm516_vm7, %vm514_vm5  ;;  %vm1582_vm5 = vcmp.eq.s32.totalorder %v3874_v44, %v4573_v55 }
 0x136   : > { %3335 = vmatprep.mubr.msk.bf16.mxu0 %vm3334_vm0, %v3741_v29  ;;  %v2399_v9 = vadd.f32 %v2164_v51, %v1950_v5  ;;  %1395 = vst.msk [vmem:[#allocation2 + $0x48] sm:$0xff] %vm188_vm6, %v1331_v4  ;;  %v2174_v15 = vpop.f32.mrf.mxu1  ;;  %vm513_vm0 = vcmp.eq.s32.totalorder %v3868_v40, %v4570_v54  ;;  %vm3645_vm11 = vmpackc.low %vm1582_vm5, %vm1580_vm4  ;;  %v887_v51 = vld [vmem:[#allocation2 + $0x70] sm:$0xff]  ;;  %v889_v6 = vld [vmem:[#allocation2 + $0x80] sm:$0xff] }
 0x137   : > { %3638 = vmatmul.mubr.msk.bf16.gmra.mxu1 %vm4565_vm1, %v3741_v29  ;;  %v1107_v13 = vpop.f32.mrf.mxu0  ;;  %v4638_v14 = vld [vmem:[#allocation2 + $0x28] sm:$0xff]  ;;  %vm515_vm1 = vcmp.eq.s32.totalorder %v3868_v40, %v4573_v55 }
 0x138   : > { %3640 = vmatprep.mubr.msk.bf16.mxu1 %vm3639_vm2, %v3741_v29  ;;  %2463 = vst.msk [vmem:[#allocation2 + $0x38] sm:$0xff] %vm188_vm6, %v2399_v9  ;;  %v1332_v17 = vadd.f32 %v1107_v13, %v883_v7  ;;  %2658 = vrot.lane.b32.xlu1 %v4638_v14, %s3743_s21  ;;  %v2177_v21 = vpop.f32.mrf.mxu1  ;;  %vm518_vm2 = vcmp.eq.s32.totalorder %v3830_v24, %v4632_v11  ;;  %vm3340_vm7 = vmpackc.low %vm515_vm1, %vm513_vm0  ;;  %v890_v15 = vld [vmem:[#allocation2 + $0x88] sm:$0xff] }
 0x139   : > { %v1951_v16 = vld [vmem:[#allocation2 + $0x40] sm:$0xff]  ;;  %v1109_v18 = vpop.f32.mrf.mxu0  ;;  %vm1586_vm0 = vcmp.eq.s32.totalorder %v3874_v44, %v4635_v12 }
 0x13a   : > { %v2400_v22 = vadd.f32 %v2169_v63, %v1951_v16  ;;  %1396 = vst.msk [vmem:[#allocation2 + $0x50] sm:$0xff] %vm188_vm6, %v1332_v17  ;;  %v2179_v27 = vpop.f32.mrf.mxu1 }
 0x13b   : > { %v1110_v23 = vpop.f32.mrf.mxu0  ;;  %v4663_v25 = vld [vmem:[#allocation2 + $0x30] sm:$0xff] }
 0x13c   : > { %2464 = vst.msk [vmem:[#allocation2 + $0x40] sm:$0xff] %vm188_vm6, %v2400_v22  ;;  %v1333_v28 = vadd.f32 %v1110_v23, %v884_v20  ;;  %2660 = vrot.lane.b32.xlu0 %v4663_v25, %s3743_s21  ;;  %v2180_v33 = vpop.f32.mrf.mxu1 }
 0x13d   : > { %3337 = vmatmul.mubr.msk.bf16.gmra.mxu0 %vm3336_vm10, %v3741_v29  ;;  %v1952_v30 = vld [vmem:[#allocation2 + $0x48] sm:$0xff]  ;;  %v1112_v31 = vpop.f32.mrf.mxu0  ;;  %vm3342_vm10 = vmpackc.low %vm520_vm3, %vm518_vm2  ;;  %vm2904_vm3 = vcmask 64512  }
 0x13e   : > { %3339 = vmatprep.mubr.msk.bf16.mxu0 %vm3338_vm13, %v3741_v29  ;;  %v2401_v35 = vadd.f32 %v2172_v8, %v1952_v30  ;;  %1397 = vst.msk [vmem:[#allocation2 + $0x58] sm:$0xff] %vm188_vm6, %v1333_v28  ;;  %v2182_v37 = vpop.f32.mrf.mxu1  ;;  %vm517_vm13 = vcmp.eq.s32.totalorder %v3868_v40, %v4632_v11  ;;  %v891_v28 = vld [vmem:[#allocation2 + $0x90] sm:$0xff] }
 0x13f   : > { %3642 = vmatmul.mubr.msk.bf16.gmra.mxu1 %vm4627_vm14, %v3741_v29  ;;  %v1115_v36 = vpop.f32.mrf.mxu0  ;;  %v4690_v26 = vld [vmem:[#allocation2 + $0x38] sm:$0xff]  ;;  %vm519_vm14 = vcmp.eq.s32.totalorder %v3868_v40, %v4635_v12 }
 0x140   : > { %3644 = vmatprep.mubr.msk.bf16.mxu1 %vm3643_vm15, %v3741_v29  ;;  %2465 = vst.msk [vmem:[#allocation2 + $0x48] sm:$0xff] %vm188_vm6, %v2401_v35  ;;  %v1334_v38 = vadd.f32 %v1115_v36, %v885_v32  ;;  %2662 = vrot.lane.b32.xlu1 %v4690_v26, %s3743_s21  ;;  %v2185_v42 = vpop.f32.mrf.mxu1  ;;  %vm1584_vm15 = vcmp.eq.s32.totalorder %v3874_v44, %v4632_v11  ;;  %vm3344_vm1 = vmpackc.low %vm519_vm14, %vm517_vm13 }
 0x141   : > { %v1953_v24 = vld [vmem:[#allocation2 + $0x50] sm:$0xff]  ;;  %v1117_v39 = vpop.f32.mrf.mxu0  ;;  %vm3649_vm2 = vmpackc.low %vm1586_vm0, %vm1584_vm15 }
 0x142   : > { %v2402_v43 = vadd.f32 %v2177_v21, %v1953_v24  ;;  %1398 = vst.msk [vmem:[#allocation2 + $0x60] sm:$0xff] %vm188_vm6, %v1334_v38  ;;  %v2187_v48 = vpop.f32.mrf.mxu1  ;;  %v892_v24 = vld [vmem:[#allocation2 + $0x98] sm:$0xff] }
 0x143   : > { %v1118_v46 = vpop.f32.mrf.mxu0  ;;  %v4703_v47 = vld [vmem:[#allocation2 + $0x40] sm:$0xff] }
 0x144   : > { %2466 = vst.msk [vmem:[#allocation2 + $0x50] sm:$0xff] %vm188_vm6, %v2402_v43  ;;  %v1335_v49 = vadd.f32 %v1118_v46, %v886_v41  ;;  %2664 = vrot.lane.b32.xlu0 %v4703_v47, %s3743_s21  ;;  %v2188_v52 = vpop.f32.mrf.mxu1 }
 0x145   : > { %3341 = vmatmul.mubr.msk.bf16.gmra.mxu0 %vm3340_vm7, %v3741_v29  ;;  %v1954_v40 = vld [vmem:[#allocation2 + $0x58] sm:$0xff]  ;;  %v1120_v50 = vpop.f32.mrf.mxu0 }
 0x146   : > { %3343 = vmatprep.mubr.msk.bf16.mxu0 %vm3342_vm10, %v3741_v29  ;;  %v2403_v53 = vadd.f32 %v2180_v33, %v1954_v40  ;;  %1399 = vst.msk [vmem:[#allocation2 + $0x68] sm:$0xff] %vm188_vm6, %v1335_v49  ;;  %v2190_v44 = vpop.f32.mrf.mxu1  ;;  %v893_v50 = vld [vmem:[#allocation2 + $0xa0] sm:$0xff] }
 0x147   : > { %3646 = vmatmul.mubr.msk.bf16.gmra.mxu1 %vm3645_vm11, %v3741_v29  ;;  %v1123_v54 = vpop.f32.mrf.mxu0  ;;  %v4714_v55 = vld [vmem:[#allocation2 + $0x48] sm:$0xff] }
 0x148   : > { %3648 = vmatprep.mubr.msk.bf16.mxu1 %vm3647_vm12, %v3741_v29  ;;  %2467 = vst.msk [vmem:[#allocation2 + $0x58] sm:$0xff] %vm188_vm6, %v2403_v53  ;;  %v1336_v56 = vadd.f32 %v1123_v54, %v887_v51  ;;  %2666 = vrot.lane.b32.xlu1 %v4714_v55, %s3743_s21  ;;  %v2193_v61 = vpop.f32.mrf.mxu1 }
 0x149   : > { %v1955_v58 = vld [vmem:[#allocation2 + $0x60] sm:$0xff]  ;;  %v1125_v59 = vpop.f32.mrf.mxu0 }
 0x14a   : > { %v2404_v62 = vadd.f32 %v2185_v42, %v1955_v58  ;;  %1400 = vst.msk [vmem:[#allocation2 + $0x70] sm:$0xff] %vm188_vm6, %v1336_v56  ;;  %v2195_v1 = vpop.f32.mrf.mxu1 }
 0x14b   : > { %v1126_v63 = vpop.f32.mrf.mxu0  ;;  %v4721_v0 = vld [vmem:[#allocation2 + $0x50] sm:$0xff] }
 0x14c   : > { %2468 = vst.msk [vmem:[#allocation2 + $0x60] sm:$0xff] %vm188_vm6, %v2404_v62  ;;  %v1337_v3 = vadd.f32 %v1126_v63, %v888_v60  ;;  %2668 = vrot.lane.b32.xlu0 %v4721_v0, %s3743_s21  ;;  %v2196_v7 = vpop.f32.mrf.mxu1  ;;  %v894_v60 = vld [vmem:[#allocation2 + $0xa8] sm:$0xff] }
 0x14d   : > { %3345 = vmatmul.mubr.msk.bf16.gmra.mxu0 %vm3344_vm1, %v3741_v29  ;;  %v1956_v4 = vld [vmem:[#allocation2 + $0x68] sm:$0xff]  ;;  %v1128_v5 = vpop.f32.mrf.mxu0 }
 0x14e   : > { %v2405_v8 = vadd.f32 %v2188_v52, %v1956_v4  ;;  %1401 = vst.msk [vmem:[#allocation2 + $0x78] sm:$0xff] %vm188_vm6, %v1337_v3  ;;  %v2198_v10 = vpop.f32.mrf.mxu1 }
 0x14f   : > { %3650 = vmatmul.mubr.msk.bf16.gmra.mxu1 %vm3649_vm2, %v3741_v29  ;;  %v4727_v9 = vld [vmem:[#allocation2 + $0x58] sm:$0xff] }
 0x150   : > { %2469 = vst.msk [vmem:[#allocation2 + $0x68] sm:$0xff] %vm188_vm6, %v2405_v8  ;;  %2670 = vrot.lane.b32.xlu1 %v4727_v9, %s3743_s21 }
 0x151   : > { %v1957_v12 = vld [vmem:[#allocation2 + $0x70] sm:$0xff] }
 0x152   : > { %v2406_v16 = vadd.f32 %v2193_v61, %v1957_v12 }
 0x153   : > { %v4733_v20 = vld [vmem:[#allocation2 + $0x60] sm:$0xff] }
 0x154   : > { %2470 = vst.msk [vmem:[#allocation2 + $0x70] sm:$0xff] %vm188_vm6, %v2406_v16  ;;  %2672 = vrot.lane.b32.xlu0 %v4733_v20, %s3743_s21  ;;  %v896_v16 = vld [vmem:[#allocation2 + $0xb8] sm:$0xff] }
 0x155   : > { %v1131_v29 = vpop.f32.mrf.mxu0  ;;  %v1958_v23 = vld [vmem:[#allocation2 + $0x78] sm:$0xff] }
 0x156   : > { %v1338_v11 = vadd.f32 %v1131_v29, %v889_v6  ;;  %v2407_v31 = vadd.f32 %v2196_v7, %v1958_v23  ;;  %v895_v7 = vld [vmem:[#allocation2 + $0xb0] sm:$0xff] }
 0x157   : > { %v1133_v13 = vpop.f32.mrf.mxu0  ;;  %v2201_v17 = vpop.f32.mrf.mxu1  ;;  %v4739_v33 = vld [vmem:[#allocation2 + $0x68] sm:$0xff] }
 0x158   : > { %1402 = vst.msk [vmem:[#allocation2 + $0x80] sm:$0xff] %vm188_vm6, %v1338_v11  ;;  %2471 = vst.msk [vmem:[#allocation2 + $0x78] sm:$0xff] %vm188_vm6, %v2407_v31  ;;  %2674 = vrot.lane.b32.xlu1 %v4739_v33, %s3743_s21 }
 0x159   : > { %v1134_v18 = vpop.f32.mrf.mxu0  ;;  %v2203_v21 = vpop.f32.mrf.mxu1 }
 0x15a   : > { %v1339_v22 = vadd.f32 %v1134_v18, %v890_v15 }
 0x15b   : > { %v1136_v27 = vpop.f32.mrf.mxu0  ;;  %v2204_v30 = vpop.f32.mrf.mxu1  ;;  %v4745_v43 = vld [vmem:[#allocation2 + $0x70] sm:$0xff] }
 0x15c   : > { %1403 = vst.msk [vmem:[#allocation2 + $0x88] sm:$0xff] %vm188_vm6, %v1339_v22  ;;  %2676 = vrot.lane.b32.xlu0 %v4745_v43, %s3743_s21 }
 0x15d   : > { %v1139_v32 = vpop.f32.mrf.mxu0  ;;  %v2206_v35 = vpop.f32.mrf.mxu1 }
 0x15e   : > { %v1340_v36 = vadd.f32 %v1139_v32, %v891_v28  ;;  %v897_v32 = vld [vmem:[#allocation2 + $0xc0] sm:$0xff] }
 0x15f   : > { %v1959_v37 = vld [vmem:[#allocation2 + $0x80] sm:$0xff]  ;;  %v1141_v38 = vpop.f32.mrf.mxu0  ;;  %v2209_v39 = vpop.f32.mrf.mxu1  ;;  %v4751_v54 = vld [vmem:[#allocation2 + $0x78] sm:$0xff] }
 0x160   : > { %v2408_v41 = vadd.f32 %v2201_v17, %v1959_v37  ;;  %1404 = vst.msk [vmem:[#allocation2 + $0x90] sm:$0xff] %vm188_vm6, %v1340_v36  ;;  %2678 = vrot.lane.b32.xlu1 %v4751_v54, %s3743_s21 }
 0x161   : > { %v1142_v42 = vpop.f32.mrf.mxu0  ;;  %v2211_v46 = vpop.f32.mrf.mxu1 }
 0x162   : > { %2472 = vst.msk [vmem:[#allocation2 + $0x80] sm:$0xff] %vm188_vm6, %v2408_v41  ;;  %v1341_v48 = vadd.f32 %v1142_v42, %v892_v24  ;;  %v898_v46 = vld [vmem:[#allocation2 + $0xc8] sm:$0xff] }
 0x163   : > { %v1960_v49 = vld [vmem:[#allocation2 + $0x88] sm:$0xff]  ;;  %v1144_v40 = vpop.f32.mrf.mxu0  ;;  %v2212_v51 = vpop.f32.mrf.mxu1 }
 0x164   : > { %v2409_v52 = vadd.f32 %v2204_v30, %v1960_v49  ;;  %1405 = vst.msk [vmem:[#allocation2 + $0x98] sm:$0xff] %vm188_vm6, %v1341_v48 }
 0x165   : > { %v1147_v53 = vpop.f32.mrf.mxu0  ;;  %v2214_v44 = vpop.f32.mrf.mxu1 }
 0x166   : > { %2473 = vst.msk [vmem:[#allocation2 + $0x88] sm:$0xff] %vm188_vm6, %v2409_v52  ;;  %v1342_v56 = vadd.f32 %v1147_v53, %v893_v50 }
 0x167   : > { %v1961_v58 = vld [vmem:[#allocation2 + $0x90] sm:$0xff]  ;;  %v1149_v59 = vpop.f32.mrf.mxu0  ;;  %v2217_v61 = vpop.f32.mrf.mxu1 }
 0x168   : > { %v2410_v62 = vadd.f32 %v2209_v39, %v1961_v58  ;;  %1406 = vst.msk [vmem:[#allocation2 + $0xa0] sm:$0xff] %vm188_vm6, %v1342_v56  ;;  %v899_v56 = vld [vmem:[#allocation2 + $0xd0] sm:$0xff] }
 0x169   : > { %v1150_v63 = vpop.f32.mrf.mxu0  ;;  %v4757_v1 = vld [vmem:[#allocation2 + $0x80] sm:$0xff]  ;;  %v2219_v3 = vpop.f32.mrf.mxu1 }
 0x16a   : > { %2474 = vst.msk [vmem:[#allocation2 + $0x90] sm:$0xff] %vm188_vm6, %v2410_v62  ;;  %v1343_v4 = vadd.f32 %v1150_v63, %v894_v60  ;;  %2680 = vrot.lane.b32.xlu0 %v4757_v1, %s3743_s21 }
 0x16b   : > { %v1962_v5 = vld [vmem:[#allocation2 + $0x98] sm:$0xff]  ;;  %v1152_v6 = vpop.f32.mrf.mxu0  ;;  %v2220_v8 = vpop.f32.mrf.mxu1 }
 0x16c   : > { %v2411_v29 = vadd.f32 %v2212_v51, %v1962_v5  ;;  %1407 = vst.msk [vmem:[#allocation2 + $0xa8] sm:$0xff] %vm188_vm6, %v1343_v4  ;;  %v900_v5 = vld [vmem:[#allocation2 + $0xd8] sm:$0xff] }
 0x16d   : > { %v1155_v10 = vpop.f32.mrf.mxu0  ;;  %v4763_v11 = vld [vmem:[#allocation2 + $0x88] sm:$0xff]  ;;  %v2222_v12 = vpop.f32.mrf.mxu1 }
 0x16e   : > { %2475 = vst.msk [vmem:[#allocation2 + $0x98] sm:$0xff] %vm188_vm6, %v2411_v29  ;;  %v1344_v13 = vadd.f32 %v1155_v10, %v895_v7  ;;  %2682 = vrot.lane.b32.xlu1 %v4763_v11, %s3743_s21 }
 0x16f   : > { %v1963_v15 = vld [vmem:[#allocation2 + $0xa0] sm:$0xff]  ;;  %v1157_v17 = vpop.f32.mrf.mxu0  ;;  %v2225_v18 = vpop.f32.mrf.mxu1 }
 0x170   : > { %v2412_v21 = vadd.f32 %v2217_v61, %v1963_v15  ;;  %1408 = vst.msk [vmem:[#allocation2 + $0xb0] sm:$0xff] %vm188_vm6, %v1344_v13  ;;  %v901_v17 = vld [vmem:[#allocation2 + $0xe0] sm:$0xff] }
 0x171   : > { %v1158_v22 = vpop.f32.mrf.mxu0  ;;  %v4769_v23 = vld [vmem:[#allocation2 + $0x90] sm:$0xff]  ;;  %v2227_v27 = vpop.f32.mrf.mxu1 }
 0x172   : > { %2476 = vst.msk [vmem:[#allocation2 + $0xa0] sm:$0xff] %vm188_vm6, %v2412_v21  ;;  %v1345_v28 = vadd.f32 %v1158_v22, %v896_v16  ;;  %2684 = vrot.lane.b32.xlu0 %v4769_v23, %s3743_s21 }
 0x173   : > { %v1964_v30 = vld [vmem:[#allocation2 + $0xa8] sm:$0xff]  ;;  %v1160_v31 = vpop.f32.mrf.mxu0  ;;  %v2228_v35 = vpop.f32.mrf.mxu1 }
 0x174   : > { %v2413_v36 = vadd.f32 %v2220_v8, %v1964_v30  ;;  %1409 = vst.msk [vmem:[#allocation2 + $0xb8] sm:$0xff] %vm188_vm6, %v1345_v28 }
 0x175   : > { %v1163_v37 = vpop.f32.mrf.mxu0  ;;  %v4775_v38 = vld [vmem:[#allocation2 + $0x98] sm:$0xff]  ;;  %v2230_v24 = vpop.f32.mrf.mxu1 }
 0x176   : > { %2477 = vst.msk [vmem:[#allocation2 + $0xa8] sm:$0xff] %vm188_vm6, %v2413_v36  ;;  %v1346_v39 = vadd.f32 %v1163_v37, %v897_v32  ;;  %2686 = vrot.lane.b32.xlu1 %v4775_v38, %s3743_s21  ;;  %v902_v32 = vld [vmem:[#allocation2 + $0xe8] sm:$0xff] }
 0x177   : > { %v1965_v41 = vld [vmem:[#allocation2 + $0xb0] sm:$0xff]  ;;  %v1165_v42 = vpop.f32.mrf.mxu0  ;;  %v2233_v48 = vpop.f32.mrf.mxu1 }
 0x178   : > { %v2414_v49 = vadd.f32 %v2225_v18, %v1965_v41  ;;  %1410 = vst.msk [vmem:[#allocation2 + $0xc0] sm:$0xff] %vm188_vm6, %v1346_v39 }
 0x179   : > { %v1166_v40 = vpop.f32.mrf.mxu0  ;;  %v4781_v50 = vld [vmem:[#allocation2 + $0xa0] sm:$0xff]  ;;  %v2235_v51 = vpop.f32.mrf.mxu1 }
 0x17a   : > { %2478 = vst.msk [vmem:[#allocation2 + $0xb0] sm:$0xff] %vm188_vm6, %v2414_v49  ;;  %v1347_v52 = vadd.f32 %v1166_v40, %v898_v46  ;;  %2688 = vrot.lane.b32.xlu0 %v4781_v50, %s3743_s21 }
 0x17b   : > { %v1966_v53 = vld [vmem:[#allocation2 + $0xb8] sm:$0xff]  ;;  %v1168_v44 = vpop.f32.mrf.mxu0  ;;  %v2236_v58 = vpop.f32.mrf.mxu1 }
 0x17c   : > { %v2415_v59 = vadd.f32 %v2228_v35, %v1966_v53  ;;  %1411 = vst.msk [vmem:[#allocation2 + $0xc8] sm:$0xff] %vm188_vm6, %v1347_v52 }
 0x17d   : > { %v1171_v60 = vpop.f32.mrf.mxu0  ;;  %v4787_v61 = vld [vmem:[#allocation2 + $0xa8] sm:$0xff]  ;;  %v2238_v62 = vpop.f32.mrf.mxu1 }
 0x17e   : > { %2479 = vst.msk [vmem:[#allocation2 + $0xb8] sm:$0xff] %vm188_vm6, %v2415_v59  ;;  %v1348_v63 = vadd.f32 %v1171_v60, %v899_v56  ;;  %2690 = vrot.lane.b32.xlu1 %v4787_v61, %s3743_s21  ;;  %v904_v59 = vld [vmem:[#allocation2 + $0xf8] sm:$0xff] }
 0x17f   : > { %v1967_v3 = vld [vmem:[#allocation2 + $0xc0] sm:$0xff]  ;;  %v1173_v4 = vpop.f32.mrf.mxu0  ;;  %v2241_v6 = vpop.f32.mrf.mxu1 }
 0x180   : > { %v2416_v7 = vadd.f32 %v2233_v48, %v1967_v3  ;;  %1412 = vst.msk [vmem:[#allocation2 + $0xd0] sm:$0xff] %vm188_vm6, %v1348_v63  ;;  %v903_v48 = vld [vmem:[#allocation2 + $0xf0] sm:$0xff] }
 0x181   : > { %v1174_v8 = vpop.f32.mrf.mxu0  ;;  %v4793_v29 = vld [vmem:[#allocation2 + $0xb0] sm:$0xff]  ;;  %v2243_v10 = vpop.f32.mrf.mxu1 }
 0x182   : > { %2480 = vst.msk [vmem:[#allocation2 + $0xc0] sm:$0xff] %vm188_vm6, %v2416_v7  ;;  %v1349_v12 = vadd.f32 %v1174_v8, %v900_v5  ;;  %2692 = vrot.lane.b32.xlu0 %v4793_v29, %s3743_s21  ;;  %v905_v8 = vld [vmem:[#allocation2 + $0x100] sm:$0xff] }
 0x183   : > { %v1968_v13 = vld [vmem:[#allocation2 + $0xc8] sm:$0xff]  ;;  %v1176_v15 = vpop.f32.mrf.mxu0  ;;  %v2244_v16 = vpop.f32.mrf.mxu1 }
 0x184   : > { %v2417_v18 = vadd.f32 %v2236_v58, %v1968_v13  ;;  %1413 = vst.msk [vmem:[#allocation2 + $0xd8] sm:$0xff] %vm188_vm6, %v1349_v12 }
 0x185   : > { %v1179_v21 = vpop.f32.mrf.mxu0  ;;  %v4799_v22 = vld [vmem:[#allocation2 + $0xb8] sm:$0xff]  ;;  %v2246_v27 = vpop.f32.mrf.mxu1 }
 0x186   : > { %2481 = vst.msk [vmem:[#allocation2 + $0xc8] sm:$0xff] %vm188_vm6, %v2417_v18  ;;  %v1350_v28 = vadd.f32 %v1179_v21, %v901_v17  ;;  %2694 = vrot.lane.b32.xlu1 %v4799_v22, %s3743_s21  ;;  %v906_v27 = vld [vmem:[#allocation2 + $0x108] sm:$0xff] }
 0x187   : > { %v1969_v30 = vld [vmem:[#allocation2 + $0xd0] sm:$0xff]  ;;  %v1181_v31 = vpop.f32.mrf.mxu0  ;;  %v2249_v35 = vpop.f32.mrf.mxu1 }
 0x188   : > { %v2418_v36 = vadd.f32 %v2241_v6, %v1969_v30  ;;  %1414 = vst.msk [vmem:[#allocation2 + $0xe0] sm:$0xff] %vm188_vm6, %v1350_v28 }
 0x189   : > { %v1182_v37 = vpop.f32.mrf.mxu0  ;;  %v4805_v24 = vld [vmem:[#allocation2 + $0xc0] sm:$0xff]  ;;  %v2251_v39 = vpop.f32.mrf.mxu1 }
 0x18a   : > { %2482 = vst.msk [vmem:[#allocation2 + $0xd0] sm:$0xff] %vm188_vm6, %v2418_v36  ;;  %v1351_v41 = vadd.f32 %v1182_v37, %v902_v32  ;;  %2696 = vrot.lane.b32.xlu0 %v4805_v24, %s3743_s21 }
 0x18b   : > { %v1970_v42 = vld [vmem:[#allocation2 + $0xd8] sm:$0xff]  ;;  %v1184_v46 = vpop.f32.mrf.mxu0  ;;  %v2252_v49 = vpop.f32.mrf.mxu1 }
 0x18c   : > { %v2419_v40 = vadd.f32 %v2244_v16, %v1970_v42  ;;  %1415 = vst.msk [vmem:[#allocation2 + $0xe8] sm:$0xff] %vm188_vm6, %v1351_v41  ;;  %v907_v41 = vld [vmem:[#allocation2 + $0x110] sm:$0xff] }
 0x18d   : > { %v1187_v51 = vpop.f32.mrf.mxu0  ;;  %v4811_v52 = vld [vmem:[#allocation2 + $0xc8] sm:$0xff]  ;;  %v2254_v53 = vpop.f32.mrf.mxu1 }
 0x18e   : > { %2483 = vst.msk [vmem:[#allocation2 + $0xd8] sm:$0xff] %vm188_vm6, %v2419_v40  ;;  %v1352_v44 = vadd.f32 %v1187_v51, %v903_v48  ;;  %2698 = vrot.lane.b32.xlu1 %v4811_v52, %s3743_s21 }
 0x18f   : > { %v1971_v56 = vld [vmem:[#allocation2 + $0xe0] sm:$0xff]  ;;  %v1189_v58 = vpop.f32.mrf.mxu0  ;;  %v2257_v60 = vpop.f32.mrf.mxu1 }
 0x190   : > { %v2420_v62 = vadd.f32 %v2249_v35, %v1971_v56  ;;  %1416 = vst.msk [vmem:[#allocation2 + $0xf0] sm:$0xff] %vm188_vm6, %v1352_v44 }
 0x191   : > { %v1190_v63 = vpop.f32.mrf.mxu0  ;;  %v4817_v3 = vld [vmem:[#allocation2 + $0xd0] sm:$0xff]  ;;  %v2259_v4 = vpop.f32.mrf.mxu1 }
 0x192   : > { %2484 = vst.msk [vmem:[#allocation2 + $0xe0] sm:$0xff] %vm188_vm6, %v2420_v62  ;;  %v1353_v5 = vadd.f32 %v1190_v63, %v904_v59  ;;  %2700 = vrot.lane.b32.xlu0 %v4817_v3, %s3743_s21  ;;  %v908_v59 = vld [vmem:[#allocation2 + $0x118] sm:$0xff] }
 0x193   : > { %v1972_v6 = vld [vmem:[#allocation2 + $0xe8] sm:$0xff]  ;;  %v1192_v7 = vpop.f32.mrf.mxu0  ;;  %v2260_v10 = vpop.f32.mrf.mxu1 }
 0x194   : > { %v2421_v12 = vadd.f32 %v2252_v49, %v1972_v6  ;;  %1417 = vst.msk [vmem:[#allocation2 + $0xf8] sm:$0xff] %vm188_vm6, %v1353_v5 }
 0x195   : > { %v1195_v13 = vpop.f32.mrf.mxu0  ;;  %v4823_v15 = vld [vmem:[#allocation2 + $0xd8] sm:$0xff]  ;;  %v2262_v17 = vpop.f32.mrf.mxu1 }
 0x196   : > { %2485 = vst.msk [vmem:[#allocation2 + $0xe8] sm:$0xff] %vm188_vm6, %v2421_v12  ;;  %v1354_v16 = vadd.f32 %v1195_v13, %v905_v8  ;;  %2702 = vrot.lane.b32.xlu1 %v4823_v15, %s3743_s21  ;;  %v2649_v48 = vpop.permute.xlu0 %2648  ;;  %v909_v12 = vld [vmem:[#allocation2 + $0x120] sm:$0xff] }
 0x197   : > { %v1973_v18 = vld [vmem:[#allocation2 + $0xf0] sm:$0xff]  ;;  %v1197_v21 = vpop.f32.mrf.mxu0  ;;  %v2265_v28 = vpop.f32.mrf.mxu1  ;;  %v2840_v49 = vadd.f32 %v2649_v48, %v4471_v19 }
 0x198   : > { %v2422_v30 = vadd.f32 %v2257_v60, %v1973_v18  ;;  %1418 = vst.msk [vmem:[#allocation2 + $0x100] sm:$0xff] %vm188_vm6, %v1354_v16 }
 0x199   : > { %v1198_v31 = vpop.f32.mrf.mxu0  ;;  %v4829_v32 = vld [vmem:[#allocation2 + $0xe0] sm:$0xff]  ;;  %v2267_v35 = vpop.f32.mrf.mxu1  ;;  %2905 = vst.msk [vmem:[%s4839_s25] sm:$0xff] %vm2904_vm3, %v2840_v49 }
 0x19a   : > { %2486 = vst.msk [vmem:[#allocation2 + $0xf0] sm:$0xff] %vm188_vm6, %v2422_v30  ;;  %v1355_v36 = vadd.f32 %v1198_v31, %v906_v27  ;;  %2704 = vrot.lane.b32.xlu0 %v4829_v32, %s3743_s21  ;;  %v2651_v19 = vpop.permute.xlu0 %2650  ;;  %v910_v35 = vld [vmem:[#allocation2 + $0x128] sm:$0xff] }
 0x19b   : > { %v1974_v37 = vld [vmem:[#allocation2 + $0xf8] sm:$0xff]  ;;  %v1200_v39 = vpop.f32.mrf.mxu0  ;;  %v2268_v42 = vpop.f32.mrf.mxu1  ;;  %v2841_v63 = vadd.f32 %v2651_v19, %v4514_v34 }
 0x19c   : > { %v2423_v46 = vadd.f32 %v2260_v10, %v1974_v37  ;;  %1419 = vst.msk [vmem:[#allocation2 + $0x108] sm:$0xff] %vm188_vm6, %v1355_v36 }
 0x19d   : > { %v1203_v40 = vpop.f32.mrf.mxu0  ;;  %v4842_v51 = vld [vmem:[#allocation2 + $0xe8] sm:$0xff]  ;;  %v2270_v53 = vpop.f32.mrf.mxu1  ;;  %2906 = vst.msk [vmem:[%s4839_s25 + $0x8] sm:$0xff] %vm2904_vm3, %v2841_v63 }
 0x19e   : > { %2487 = vst.msk [vmem:[#allocation2 + $0xf8] sm:$0xff] %vm188_vm6, %v2423_v46  ;;  %v1356_v44 = vadd.f32 %v1203_v40, %v907_v41  ;;  %2706 = vrot.lane.b32.xlu1 %v4842_v51, %s3743_s21  ;;  %v2653_v34 = vpop.permute.xlu1 %2652  ;;  %v911_v53 = vld [vmem:[#allocation2 + $0x130] sm:$0xff] }
 0x19f   : > { %v1975_v56 = vld [vmem:[#allocation2 + $0x100] sm:$0xff]  ;;  %v1205_v58 = vpop.f32.mrf.mxu0  ;;  %v2273_v60 = vpop.f32.mrf.mxu1  ;;  %v2842_v16 = vadd.f32 %v2653_v34, %v4539_v45 }
 0x1a0   : > { %v2424_v62 = vadd.f32 %v2265_v28, %v1975_v56  ;;  %1420 = vst.msk [vmem:[#allocation2 + $0x110] sm:$0xff] %vm188_vm6, %v1356_v44 }
 0x1a1   : > { %v1206_v4 = vpop.f32.mrf.mxu0  ;;  %v4851_v5 = vld [vmem:[#allocation2 + $0xf0] sm:$0xff]  ;;  %v2275_v6 = vpop.f32.mrf.mxu1  ;;  %2907 = vst.msk [vmem:[%s4839_s25 + $0x10] sm:$0xff] %vm2904_vm3, %v2842_v16 }
 0x1a2   : > { %2488 = vst.msk [vmem:[#allocation2 + $0x100] sm:$0xff] %vm188_vm6, %v2424_v62  ;;  %v1357_v7 = vadd.f32 %v1206_v4, %v908_v59  ;;  %2708 = vrot.lane.b32.xlu0 %v4851_v5, %s3743_s21  ;;  %v2655_v45 = vpop.permute.xlu1 %2654  ;;  %v912_v6 = vld [vmem:[#allocation2 + $0x138] sm:$0xff] }
 0x1a3   : > { %v1976_v8 = vld [vmem:[#allocation2 + $0x108] sm:$0xff]  ;;  %v1208_v10 = vpop.f32.mrf.mxu0  ;;  %v2276_v13 = vpop.f32.mrf.mxu1  ;;  %v2843_v39 = vadd.f32 %v2655_v45, %v4576_v57 }
 0x1a4   : > { %v2425_v17 = vadd.f32 %v2268_v42, %v1976_v8  ;;  %1421 = vst.msk [vmem:[#allocation2 + $0x118] sm:$0xff] %vm188_vm6, %v1357_v7 }
 0x1a5   : > { %v1211_v18 = vpop.f32.mrf.mxu0  ;;  %v4860_v21 = vld [vmem:[#allocation2 + $0xf8] sm:$0xff]  ;;  %v2278_v27 = vpop.f32.mrf.mxu1  ;;  %2908 = vst.msk [vmem:[%s4839_s25 + $0x18] sm:$0xff] %vm2904_vm3, %v2843_v39 }
 0x1a6   : > { %2489 = vst.msk [vmem:[#allocation2 + $0x108] sm:$0xff] %vm188_vm6, %v2425_v17  ;;  %v1358_v28 = vadd.f32 %v1211_v18, %v909_v12  ;;  %2710 = vrot.lane.b32.xlu1 %v4860_v21, %s3743_s21  ;;  %v2657_v57 = vpop.permute.xlu0 %2656  ;;  %v913_v27 = vld [vmem:[#allocation2 + $0x140] sm:$0xff] }
 0x1a7   : > { %v1977_v30 = vld [vmem:[#allocation2 + $0x110] sm:$0xff]  ;;  %v1213_v31 = vpop.f32.mrf.mxu0  ;;  %v2281_v36 = vpop.f32.mrf.mxu1  ;;  %v2844_v58 = vadd.f32 %v2657_v57, %v4601_v2 }
 0x1a8   : > { %v2426_v37 = vadd.f32 %v2273_v60, %v1977_v30  ;;  %1422 = vst.msk [vmem:[#allocation2 + $0x120] sm:$0xff] %vm188_vm6, %v1358_v28 }
 0x1a9   : > { %v1214_v41 = vpop.f32.mrf.mxu0  ;;  %v4869_v42 = vld [vmem:[#allocation2 + $0x100] sm:$0xff]  ;;  %v2283_v46 = vpop.f32.mrf.mxu1  ;;  %2909 = vst.msk [vmem:[%s4839_s25 + $0x20] sm:$0xff] %vm2904_vm3, %v2844_v58 }
 0x1aa   : > { %2490 = vst.msk [vmem:[#allocation2 + $0x110] sm:$0xff] %vm188_vm6, %v2426_v37  ;;  %v1359_v48 = vadd.f32 %v1214_v41, %v910_v35  ;;  %2712 = vrot.lane.b32.xlu0 %v4869_v42, %s3743_s21  ;;  %v2659_v2 = vpop.permute.xlu1 %2658  ;;  %v914_v46 = vld [vmem:[#allocation2 + $0x148] sm:$0xff] }
 0x1ab   : > { %v1978_v49 = vld [vmem:[#allocation2 + $0x118] sm:$0xff]  ;;  %v1216_v40 = vpop.f32.mrf.mxu0  ;;  %v2284_v44 = vpop.f32.mrf.mxu1  ;;  %v2845_v10 = vadd.f32 %v2659_v2, %v4638_v14 }
 0x1ac   : > { %v2427_v56 = vadd.f32 %v2276_v13, %v1978_v49  ;;  %1423 = vst.msk [vmem:[#allocation2 + $0x128] sm:$0xff] %vm188_vm6, %v1359_v48 }
 0x1ad   : > { %v1219_v59 = vpop.f32.mrf.mxu0  ;;  %v4878_v60 = vld [vmem:[#allocation2 + $0x108] sm:$0xff]  ;;  %v2286_v62 = vpop.f32.mrf.mxu1  ;;  %2910 = vst.msk [vmem:[%s4839_s25 + $0x28] sm:$0xff] %vm2904_vm3, %v2845_v10 }
 0x1ae   : > { %2491 = vst.msk [vmem:[#allocation2 + $0x118] sm:$0xff] %vm188_vm6, %v2427_v56  ;;  %v1360_v19 = vadd.f32 %v1219_v59, %v911_v53  ;;  %2714 = vrot.lane.b32.xlu1 %v4878_v60, %s3743_s21  ;;  %v2661_v14 = vpop.permute.xlu0 %2660  ;;  %v915_v62 = vld [vmem:[#allocation2 + $0x150] sm:$0xff] }
 0x1af   : > { %v1979_v63 = vld [vmem:[#allocation2 + $0x120] sm:$0xff]  ;;  %v1221_v4 = vpop.f32.mrf.mxu0  ;;  %v2289_v7 = vpop.f32.mrf.mxu1  ;;  %v2846_v31 = vadd.f32 %v2661_v14, %v4663_v25 }
 0x1b0   : > { %v2428_v8 = vadd.f32 %v2281_v36, %v1979_v63  ;;  %1424 = vst.msk [vmem:[#allocation2 + $0x130] sm:$0xff] %vm188_vm6, %v1360_v19 }
 0x1b1   : > { %v1222_v12 = vpop.f32.mrf.mxu0  ;;  %v4887_v13 = vld [vmem:[#allocation2 + $0x110] sm:$0xff]  ;;  %v2291_v17 = vpop.f32.mrf.mxu1  ;;  %2911 = vst.msk [vmem:[%s4839_s25 + $0x30] sm:$0xff] %vm2904_vm3, %v2846_v31 }
 0x1b2   : > { %2492 = vst.msk [vmem:[#allocation2 + $0x120] sm:$0xff] %vm188_vm6, %v2428_v8  ;;  %v1361_v34 = vadd.f32 %v1222_v12, %v912_v6  ;;  %2716 = vrot.lane.b32.xlu0 %v4887_v13, %s3743_s21  ;;  %v2663_v25 = vpop.permute.xlu1 %2662  ;;  %v916_v17 = vld [vmem:[#allocation2 + $0x158] sm:$0xff] }
 0x1b3   : > { %v1980_v16 = vld [vmem:[#allocation2 + $0x128] sm:$0xff]  ;;  %v1224_v18 = vpop.f32.mrf.mxu0  ;;  %v2292_v28 = vpop.f32.mrf.mxu1  ;;  %v2847_v40 = vadd.f32 %v2663_v25, %v4690_v26 }
 0x1b4   : > { %v2429_v30 = vadd.f32 %v2284_v44, %v1980_v16  ;;  %1425 = vst.msk [vmem:[#allocation2 + $0x138] sm:$0xff] %vm188_vm6, %v1361_v34 }
 0x1b5   : > { %v1227_v35 = vpop.f32.mrf.mxu0  ;;  %v4896_v36 = vld [vmem:[#allocation2 + $0x118] sm:$0xff]  ;;  %v2294_v37 = vpop.f32.mrf.mxu1  ;;  %2912 = vst.msk [vmem:[%s4839_s25 + $0x38] sm:$0xff] %vm2904_vm3, %v2847_v40 }
 0x1b6   : > { %2493 = vst.msk [vmem:[#allocation2 + $0x128] sm:$0xff] %vm188_vm6, %v2429_v30  ;;  %v1362_v45 = vadd.f32 %v1227_v35, %v913_v27  ;;  %2718 = vrot.lane.b32.xlu1 %v4896_v36, %s3743_s21  ;;  %v2665_v26 = vpop.permute.xlu0 %2664  ;;  %v917_v37 = vld [vmem:[#allocation2 + $0x160] sm:$0xff] }
 0x1b7   : > { %v1981_v39 = vld [vmem:[#allocation2 + $0x130] sm:$0xff]  ;;  %v1229_v41 = vpop.f32.mrf.mxu0  ;;  %v2297_v48 = vpop.f32.mrf.mxu1  ;;  %v2848_v4 = vadd.f32 %v2665_v26, %v4703_v47 }
 0x1b8   : > { %v2430_v49 = vadd.f32 %v2289_v7, %v1981_v39  ;;  %1426 = vst.msk [vmem:[#allocation2 + $0x140] sm:$0xff] %vm188_vm6, %v1362_v45 }
 0x1b9   : > { %v1230_v53 = vpop.f32.mrf.mxu0  ;;  %v4905_v44 = vld [vmem:[#allocation2 + $0x120] sm:$0xff]  ;;  %v2299_v56 = vpop.f32.mrf.mxu1  ;;  %2913 = vst.msk [vmem:[%s4839_s25 + $0x40] sm:$0xff] %vm2904_vm3, %v2848_v4 }
 0x1ba   : > { %2494 = vst.msk [vmem:[#allocation2 + $0x130] sm:$0xff] %vm188_vm6, %v2430_v49  ;;  %v1363_v57 = vadd.f32 %v1230_v53, %v914_v46  ;;  %2720 = vrot.lane.b32.xlu0 %v4905_v44, %s3743_s21  ;;  %v2667_v47 = vpop.permute.xlu1 %2666  ;;  %v918_v56 = vld [vmem:[#allocation2 + $0x168] sm:$0xff] }
 0x1bb   : > { %v1982_v58 = vld [vmem:[#allocation2 + $0x138] sm:$0xff]  ;;  %v1232_v59 = vpop.f32.mrf.mxu0  ;;  %v2300_v19 = vpop.f32.mrf.mxu1  ;;  %v2849_v18 = vadd.f32 %v2667_v47, %v4714_v55 }
 0x1bc   : > { %v2431_v63 = vadd.f32 %v2292_v28, %v1982_v58  ;;  %1427 = vst.msk [vmem:[#allocation2 + $0x148] sm:$0xff] %vm188_vm6, %v1363_v57 }
 0x1bd   : > { %v1235_v6 = vpop.f32.mrf.mxu0  ;;  %v4914_v7 = vld [vmem:[#allocation2 + $0x128] sm:$0xff]  ;;  %v2302_v8 = vpop.f32.mrf.mxu1  ;;  %2914 = vst.msk [vmem:[%s4839_s25 + $0x48] sm:$0xff] %vm2904_vm3, %v2849_v18 }
 0x1be   : > { %2495 = vst.msk [vmem:[#allocation2 + $0x138] sm:$0xff] %vm188_vm6, %v2431_v63  ;;  %v1364_v2 = vadd.f32 %v1235_v6, %v915_v62  ;;  %2722 = vrot.lane.b32.xlu1 %v4914_v7, %s3743_s21  ;;  %v2669_v55 = vpop.permute.xlu0 %2668  ;;  %v919_v8 = vld [vmem:[#allocation2 + $0x170] sm:$0xff] }
 0x1bf   : > { %v1983_v10 = vld [vmem:[#allocation2 + $0x140] sm:$0xff]  ;;  %v1237_v12 = vpop.f32.mrf.mxu0  ;;  %v2305_v34 = vpop.f32.mrf.mxu1  ;;  %v2850_v41 = vadd.f32 %v2669_v55, %v4721_v0 }
 0x1c0   : > { %v2432_v16 = vadd.f32 %v2297_v48, %v1983_v10  ;;  %1428 = vst.msk [vmem:[#allocation2 + $0x150] sm:$0xff] %vm188_vm6, %v1364_v2 }
 0x1c1   : > { %v1238_v27 = vpop.f32.mrf.mxu0  ;;  %v4923_v28 = vld [vmem:[#allocation2 + $0x130] sm:$0xff]  ;;  %v2307_v30 = vpop.f32.mrf.mxu1  ;;  %2915 = vst.msk [vmem:[%s4839_s25 + $0x50] sm:$0xff] %vm2904_vm3, %v2850_v41 }
 0x1c2   : > { %2496 = vst.msk [vmem:[#allocation2 + $0x140] sm:$0xff] %vm188_vm6, %v2432_v16  ;;  %v1365_v14 = vadd.f32 %v1238_v27, %v916_v17  ;;  %2724 = vrot.lane.b32.xlu0 %v4923_v28, %s3743_s21  ;;  %v2671_v0 = vpop.permute.xlu1 %2670  ;;  %v920_v30 = vld [vmem:[#allocation2 + $0x178] sm:$0xff] }
 0x1c3   : > { %v1984_v31 = vld [vmem:[#allocation2 + $0x148] sm:$0xff]  ;;  %v1240_v35 = vpop.f32.mrf.mxu0  ;;  %v2308_v45 = vpop.f32.mrf.mxu1  ;;  %v2851_v59 = vadd.f32 %v2671_v0, %v4727_v9 }
 0x1c4   : > { %v2433_v39 = vadd.f32 %v2300_v19, %v1984_v31  ;;  %1429 = vst.msk [vmem:[#allocation2 + $0x158] sm:$0xff] %vm188_vm6, %v1365_v14 }
 0x1c5   : > { %v1243_v46 = vpop.f32.mrf.mxu0  ;;  %v4932_v48 = vld [vmem:[#allocation2 + $0x138] sm:$0xff]  ;;  %v2310_v49 = vpop.f32.mrf.mxu1  ;;  %2916 = vst.msk [vmem:[%s4839_s25 + $0x58] sm:$0xff] %vm2904_vm3, %v2851_v59 }
 0x1c6   : > { %2497 = vst.msk [vmem:[#allocation2 + $0x148] sm:$0xff] %vm188_vm6, %v2433_v39  ;;  %v1366_v25 = vadd.f32 %v1243_v46, %v917_v37  ;;  %2726 = vrot.lane.b32.xlu1 %v4932_v48, %s3743_s21  ;;  %v2673_v9 = vpop.permute.xlu0 %2672  ;;  %v921_v49 = vld [vmem:[#allocation2 + $0x180] sm:$0xff] }
 0x1c7   : > { %v1985_v40 = vld [vmem:[#allocation2 + $0x150] sm:$0xff]  ;;  %v1245_v53 = vpop.f32.mrf.mxu0  ;;  %v2313_v57 = vpop.f32.mrf.mxu1  ;;  %v2852_v12 = vadd.f32 %v2673_v9, %v4733_v20 }
 0x1c8   : > { %v2434_v58 = vadd.f32 %v2305_v34, %v1985_v40  ;;  %1430 = vst.msk [vmem:[#allocation2 + $0x160] sm:$0xff] %vm188_vm6, %v1366_v25 }
 0x1c9   : > { %v1246_v62 = vpop.f32.mrf.mxu0  ;;  %v4941_v19 = vld [vmem:[#allocation2 + $0x140] sm:$0xff]  ;;  %v2315_v63 = vpop.f32.mrf.mxu1  ;;  %2917 = vst.msk [vmem:[%s4839_s25 + $0x60] sm:$0xff] %vm2904_vm3, %v2852_v12 }
 0x1ca   : > { %2498 = vst.msk [vmem:[#allocation2 + $0x150] sm:$0xff] %vm188_vm6, %v2434_v58  ;;  %v1367_v26 = vadd.f32 %v1246_v62, %v918_v56  ;;  %2728 = vrot.lane.b32.xlu0 %v4941_v19, %s3743_s21  ;;  %v2675_v20 = vpop.permute.xlu1 %2674  ;;  %v922_v63 = vld [vmem:[#allocation2 + $0x188] sm:$0xff] }
 0x1cb   : > { %v1986_v4 = vld [vmem:[#allocation2 + $0x158] sm:$0xff]  ;;  %v1248_v6 = vpop.f32.mrf.mxu0  ;;  %v2316_v2 = vpop.f32.mrf.mxu1  ;;  %v2853_v35 = vadd.f32 %v2675_v20, %v4739_v33 }
 0x1cc   : > { %v2435_v10 = vadd.f32 %v2308_v45, %v1986_v4  ;;  %1431 = vst.msk [vmem:[#allocation2 + $0x168] sm:$0xff] %vm188_vm6, %v1367_v26 }
 0x1cd   : > { %v1251_v17 = vpop.f32.mrf.mxu0  ;;  %v4950_v34 = vld [vmem:[#allocation2 + $0x148] sm:$0xff]  ;;  %v2318_v16 = vpop.f32.mrf.mxu1  ;;  %2918 = vst.msk [vmem:[%s4839_s25 + $0x68] sm:$0xff] %vm2904_vm3, %v2853_v35 }
 0x1ce   : > { %2499 = vst.msk [vmem:[#allocation2 + $0x158] sm:$0xff] %vm188_vm6, %v2435_v10  ;;  %v1368_v47 = vadd.f32 %v1251_v17, %v919_v8  ;;  %2730 = vrot.lane.b32.xlu1 %v4950_v34, %s3743_s21  ;;  %v2677_v33 = vpop.permute.xlu0 %2676  ;;  %v923_v16 = vld [vmem:[#allocation2 + $0x190] sm:$0xff] }
 0x1cf   : > { %v1987_v18 = vld [vmem:[#allocation2 + $0x160] sm:$0xff]  ;;  %v1253_v27 = vpop.f32.mrf.mxu0  ;;  %v2321_v14 = vpop.f32.mrf.mxu1  ;;  %v2854_v53 = vadd.f32 %v2677_v33, %v4745_v43 }
 0x1d0   : > { %v2436_v31 = vadd.f32 %v2313_v57, %v1987_v18  ;;  %1432 = vst.msk [vmem:[#allocation2 + $0x170] sm:$0xff] %vm188_vm6, %v1368_v47 }
 0x1d1   : > { %v1254_v37 = vpop.f32.mrf.mxu0  ;;  %v4959_v45 = vld [vmem:[#allocation2 + $0x150] sm:$0xff]  ;;  %v2323_v39 = vpop.f32.mrf.mxu1  ;;  %2919 = vst.msk [vmem:[%s4839_s25 + $0x70] sm:$0xff] %vm2904_vm3, %v2854_v53 }
 0x1d2   : > { %2500 = vst.msk [vmem:[#allocation2 + $0x160] sm:$0xff] %vm188_vm6, %v2436_v31  ;;  %v1369_v55 = vadd.f32 %v1254_v37, %v920_v30  ;;  %2732 = vrot.lane.b32.xlu0 %v4959_v45, %s3743_s21  ;;  %v2679_v43 = vpop.permute.xlu1 %2678  ;;  %v924_v39 = vld [vmem:[#allocation2 + $0x198] sm:$0xff] }
 0x1d3   : > { %v1988_v41 = vld [vmem:[#allocation2 + $0x168] sm:$0xff]  ;;  %v1256_v46 = vpop.f32.mrf.mxu0  ;;  %v2324_v25 = vpop.f32.mrf.mxu1  ;;  %v2855_v6 = vadd.f32 %v2679_v43, %v4751_v54 }
 0x1d4   : > { %v2437_v40 = vadd.f32 %v2316_v2, %v1988_v41  ;;  %1433 = vst.msk [vmem:[#allocation2 + $0x178] sm:$0xff] %vm188_vm6, %v1369_v55 }
 0x1d5   : > { %v1259_v56 = vpop.f32.mrf.mxu0  ;;  %v4968_v57 = vld [vmem:[#allocation2 + $0x158] sm:$0xff]  ;;  %v2326_v58 = vpop.f32.mrf.mxu1  ;;  %2920 = vst.msk [vmem:[%s4839_s25 + $0x78] sm:$0xff] %vm2904_vm3, %v2855_v6 }
 0x1d6   : > { %2501 = vst.msk [vmem:[#allocation2 + $0x168] sm:$0xff] %vm188_vm6, %v2437_v40  ;;  %v1370_v0 = vadd.f32 %v1259_v56, %v921_v49  ;;  %2734 = vrot.lane.b32.xlu1 %v4968_v57, %s3743_s21  ;;  %v925_v58 = vld [vmem:[#allocation2 + $0x1a0] sm:$0xff] }
 0x1d7   : > { %v1989_v59 = vld [vmem:[#allocation2 + $0x170] sm:$0xff]  ;;  %v1261_v62 = vpop.f32.mrf.mxu0  ;;  %v2329_v26 = vpop.f32.mrf.mxu1 }
 0x1d8   : > { %v2438_v4 = vadd.f32 %v2321_v14, %v1989_v59  ;;  %1434 = vst.msk [vmem:[#allocation2 + $0x180] sm:$0xff] %vm188_vm6, %v1370_v0 }
 0x1d9   : > { %v1262_v8 = vpop.f32.mrf.mxu0  ;;  %v4977_v2 = vld [vmem:[#allocation2 + $0x160] sm:$0xff]  ;;  %v2331_v10 = vpop.f32.mrf.mxu1 }
 0x1da   : > { %2502 = vst.msk [vmem:[#allocation2 + $0x170] sm:$0xff] %vm188_vm6, %v2438_v4  ;;  %v1371_v9 = vadd.f32 %v1262_v8, %v922_v63  ;;  %2736 = vrot.lane.b32.xlu0 %v4977_v2, %s3743_s21  ;;  %v926_v10 = vld [vmem:[#allocation2 + $0x1a8] sm:$0xff] }
 0x1db   : > { %v1990_v12 = vld [vmem:[#allocation2 + $0x178] sm:$0xff]  ;;  %v1264_v17 = vpop.f32.mrf.mxu0  ;;  %v2332_v47 = vpop.f32.mrf.mxu1 }
 0x1dc   : > { %v2439_v18 = vadd.f32 %v2324_v25, %v1990_v12  ;;  %1435 = vst.msk [vmem:[#allocation2 + $0x188] sm:$0xff] %vm188_vm6, %v1371_v9  ;;  %v2681_v54 = vpop.permute.xlu0 %2680 }
 0x1dd   : > { %v2856_v27 = vadd.f32 %v2681_v54, %v4757_v1  ;;  %v1267_v30 = vpop.f32.mrf.mxu0  ;;  %v4986_v14 = vld [vmem:[#allocation2 + $0x168] sm:$0xff]  ;;  %v2334_v31 = vpop.f32.mrf.mxu1 }
 0x1de   : > { %2503 = vst.msk [vmem:[#allocation2 + $0x178] sm:$0xff] %vm188_vm6, %v2439_v18  ;;  %v1372_v20 = vadd.f32 %v1267_v30, %v923_v16  ;;  %2738 = vrot.lane.b32.xlu1 %v4986_v14, %s3743_s21  ;;  %v927_v31 = vld [vmem:[#allocation2 + $0x1b0] sm:$0xff] }
 0x1df   : > { %v1991_v35 = vld [vmem:[#allocation2 + $0x180] sm:$0xff]  ;;  %2921 = vst.msk [vmem:[%s4839_s25 + $0x80] sm:$0xff] %vm2904_vm3, %v2856_v27  ;;  %v1269_v37 = vpop.f32.mrf.mxu0  ;;  %v2337_v55 = vpop.f32.mrf.mxu1 }
 0x1e0   : > { %v2440_v41 = vadd.f32 %v2329_v26, %v1991_v35  ;;  %1436 = vst.msk [vmem:[#allocation2 + $0x190] sm:$0xff] %vm188_vm6, %v1372_v20  ;;  %v2683_v1 = vpop.permute.xlu1 %2682 }
 0x1e1   : > { %v2857_v46 = vadd.f32 %v2683_v1, %v4763_v11  ;;  %v1270_v49 = vpop.f32.mrf.mxu0  ;;  %v4995_v25 = vld [vmem:[#allocation2 + $0x170] sm:$0xff]  ;;  %v2339_v40 = vpop.f32.mrf.mxu1 }
 0x1e2   : > { %2504 = vst.msk [vmem:[#allocation2 + $0x180] sm:$0xff] %vm188_vm6, %v2440_v41  ;;  %v1373_v33 = vadd.f32 %v1270_v49, %v924_v39  ;;  %2740 = vrot.lane.b32.xlu0 %v4995_v25, %s3743_s21  ;;  %v928_v40 = vld [vmem:[#allocation2 + $0x1b8] sm:$0xff] }
 0x1e3   : > { %v1992_v53 = vld [vmem:[#allocation2 + $0x188] sm:$0xff]  ;;  %2922 = vst.msk [vmem:[%s4839_s25 + $0x88] sm:$0xff] %vm2904_vm3, %v2857_v46  ;;  %v1272_v56 = vpop.f32.mrf.mxu0  ;;  %v2340_v0 = vpop.f32.mrf.mxu1 }
 0x1e4   : > { %v2441_v59 = vadd.f32 %v2332_v47, %v1992_v53  ;;  %1437 = vst.msk [vmem:[#allocation2 + $0x198] sm:$0xff] %vm188_vm6, %v1373_v33  ;;  %v2685_v11 = vpop.permute.xlu0 %2684 }
 0x1e5   : > { %v2858_v62 = vadd.f32 %v2685_v11, %v4769_v23  ;;  %v1275_v63 = vpop.f32.mrf.mxu0  ;;  %v5004_v26 = vld [vmem:[#allocation2 + $0x178] sm:$0xff]  ;;  %v2342_v4 = vpop.f32.mrf.mxu1 }
 0x1e6   : > { %2505 = vst.msk [vmem:[#allocation2 + $0x188] sm:$0xff] %vm188_vm6, %v2441_v59  ;;  %v1374_v43 = vadd.f32 %v1275_v63, %v925_v58  ;;  %2742 = vrot.lane.b32.xlu1 %v5004_v26, %s3743_s21  ;;  %v929_v4 = vld [vmem:[#allocation2 + $0x1c0] sm:$0xff] }
 0x1e7   : > { %v1993_v6 = vld [vmem:[#allocation2 + $0x190] sm:$0xff]  ;;  %2923 = vst.msk [vmem:[%s4839_s25 + $0x90] sm:$0xff] %vm2904_vm3, %v2858_v62  ;;  %v1277_v8 = vpop.f32.mrf.mxu0  ;;  %v2345_v9 = vpop.f32.mrf.mxu1 }
 0x1e8   : > { %v2442_v12 = vadd.f32 %v2337_v55, %v1993_v6  ;;  %1438 = vst.msk [vmem:[#allocation2 + $0x1a0] sm:$0xff] %vm188_vm6, %v1374_v43  ;;  %v2687_v23 = vpop.permute.xlu1 %2686 }
 0x1e9   : > { %v2859_v17 = vadd.f32 %v2687_v23, %v4775_v38  ;;  %v1278_v16 = vpop.f32.mrf.mxu0  ;;  %v5013_v47 = vld [vmem:[#allocation2 + $0x180] sm:$0xff]  ;;  %v2347_v18 = vpop.f32.mrf.mxu1 }
 0x1ea   : > { %2506 = vst.msk [vmem:[#allocation2 + $0x190] sm:$0xff] %vm188_vm6, %v2442_v12  ;;  %v1375_v54 = vadd.f32 %v1278_v16, %v926_v10  ;;  %2744 = vrot.lane.b32.xlu0 %v5013_v47, %s3743_s21  ;;  %v930_v18 = vld [vmem:[#allocation2 + $0x1c8] sm:$0xff] }
 0x1eb   : > { %v1994_v27 = vld [vmem:[#allocation2 + $0x198] sm:$0xff]  ;;  %2924 = vst.msk [vmem:[%s4839_s25 + $0x98] sm:$0xff] %vm2904_vm3, %v2859_v17  ;;  %v1280_v30 = vpop.f32.mrf.mxu0  ;;  %v2348_v20 = vpop.f32.mrf.mxu1 }
 0x1ec   : > { %v2443_v35 = vadd.f32 %v2340_v0, %v1994_v27  ;;  %1439 = vst.msk [vmem:[#allocation2 + $0x1a8] sm:$0xff] %vm188_vm6, %v1375_v54  ;;  %v2689_v38 = vpop.permute.xlu0 %2688 }
 0x1ed   : > { %v2860_v37 = vadd.f32 %v2689_v38, %v4781_v50  ;;  %v1283_v39 = vpop.f32.mrf.mxu0  ;;  %v5022_v55 = vld [vmem:[#allocation2 + $0x188] sm:$0xff]  ;;  %v2350_v41 = vpop.f32.mrf.mxu1 }
 0x1ee   : > { %2507 = vst.msk [vmem:[#allocation2 + $0x198] sm:$0xff] %vm188_vm6, %v2443_v35  ;;  %v1376_v1 = vadd.f32 %v1283_v39, %v927_v31  ;;  %2746 = vrot.lane.b32.xlu1 %v5022_v55, %s3743_s21  ;;  %v931_v41 = vld [vmem:[#allocation2 + $0x1d0] sm:$0xff] }
 0x1ef   : > { %v1995_v46 = vld [vmem:[#allocation2 + $0x1a0] sm:$0xff]  ;;  %2925 = vst.msk [vmem:[%s4839_s25 + $0xa0] sm:$0xff] %vm2904_vm3, %v2860_v37  ;;  %v1285_v49 = vpop.f32.mrf.mxu0  ;;  %v2353_v33 = vpop.f32.mrf.mxu1 }
 0x1f0   : > { %v2444_v53 = vadd.f32 %v2345_v9, %v1995_v46  ;;  %1440 = vst.msk [vmem:[#allocation2 + $0x1b0] sm:$0xff] %vm188_vm6, %v1376_v1  ;;  %v2691_v50 = vpop.permute.xlu1 %2690 }
 0x1f1   : > { %v2861_v56 = vadd.f32 %v2691_v50, %v4787_v61  ;;  %v1286_v58 = vpop.f32.mrf.mxu0  ;;  %v5031_v0 = vld [vmem:[#allocation2 + $0x190] sm:$0xff]  ;;  %v2355_v59 = vpop.f32.mrf.mxu1 }
 0x1f2   : > { %2508 = vst.msk [vmem:[#allocation2 + $0x1a0] sm:$0xff] %vm188_vm6, %v2444_v53  ;;  %v1377_v11 = vadd.f32 %v1286_v58, %v928_v40  ;;  %2748 = vrot.lane.b32.xlu0 %v5031_v0, %s3743_s21  ;;  %v932_v59 = vld [vmem:[#allocation2 + $0x1d8] sm:$0xff] }
 0x1f3   : > { %v1996_v62 = vld [vmem:[#allocation2 + $0x1a8] sm:$0xff]  ;;  %2926 = vst.msk [vmem:[%s4839_s25 + $0xa8] sm:$0xff] %vm2904_vm3, %v2861_v56  ;;  %v1288_v63 = vpop.f32.mrf.mxu0  ;;  %v2356_v43 = vpop.f32.mrf.mxu1 }
 0x1f4   : > { %v2445_v6 = vadd.f32 %v2348_v20, %v1996_v62  ;;  %1441 = vst.msk [vmem:[#allocation2 + $0x1b8] sm:$0xff] %vm188_vm6, %v1377_v11  ;;  %v2693_v61 = vpop.permute.xlu0 %2692 }
 0x1f5   : > { %v2862_v8 = vadd.f32 %v2693_v61, %v4793_v29  ;;  %v1291_v10 = vpop.f32.mrf.mxu0  ;;  %v5040_v9 = vld [vmem:[#allocation2 + $0x198] sm:$0xff]  ;;  %v2358_v12 = vpop.f32.mrf.mxu1 }
 0x1f6   : > { %2509 = vst.msk [vmem:[#allocation2 + $0x1a8] sm:$0xff] %vm188_vm6, %v2445_v6  ;;  %v1378_v23 = vadd.f32 %v1291_v10, %v929_v4  ;;  %2750 = vrot.lane.b32.xlu1 %v5040_v9, %s3743_s21  ;;  %v933_v12 = vld [vmem:[#allocation2 + $0x1e0] sm:$0xff] }
 0x1f7   : > { %v1997_v17 = vld [vmem:[#allocation2 + $0x1b0] sm:$0xff]  ;;  %2927 = vst.msk [vmem:[%s4839_s25 + $0xb0] sm:$0xff] %vm2904_vm3, %v2862_v8  ;;  %v1293_v16 = vpop.f32.mrf.mxu0  ;;  %v2361_v54 = vpop.f32.mrf.mxu1 }
 0x1f8   : > { %v2446_v27 = vadd.f32 %v2353_v33, %v1997_v17  ;;  %1442 = vst.msk [vmem:[#allocation2 + $0x1c0] sm:$0xff] %vm188_vm6, %v1378_v23  ;;  %v2695_v29 = vpop.permute.xlu1 %2694 }
 0x1f9   : > { %v2863_v30 = vadd.f32 %v2695_v29, %v4799_v22  ;;  %v1294_v31 = vpop.f32.mrf.mxu0  ;;  %v5049_v20 = vld [vmem:[#allocation2 + $0x1a0] sm:$0xff]  ;;  %v2363_v35 = vpop.f32.mrf.mxu1 }
 0x1fa   : > { %2510 = vst.msk [vmem:[#allocation2 + $0x1b0] sm:$0xff] %vm188_vm6, %v2446_v27  ;;  %v1379_v38 = vadd.f32 %v1294_v31, %v930_v18  ;;  %2752 = vrot.lane.b32.xlu0 %v5049_v20, %s3743_s21  ;;  %v934_v35 = vld [vmem:[#allocation2 + $0x1e8] sm:$0xff] }
 0x1fb   : > { %v1998_v37 = vld [vmem:[#allocation2 + $0x1b8] sm:$0xff]  ;;  %2928 = vst.msk [vmem:[%s4839_s25 + $0xb8] sm:$0xff] %vm2904_vm3, %v2863_v30  ;;  %v1296_v39 = vpop.f32.mrf.mxu0  ;;  %v2364_v1 = vpop.f32.mrf.mxu1 }
 0x1fc   : > { %v2447_v46 = vadd.f32 %v2356_v43, %v1998_v37  ;;  %1443 = vst.msk [vmem:[#allocation2 + $0x1c8] sm:$0xff] %vm188_vm6, %v1379_v38  ;;  %v2697_v22 = vpop.permute.xlu0 %2696 }
 0x1fd   : > { %v2864_v49 = vadd.f32 %v2697_v22, %v4805_v24  ;;  %v1299_v40 = vpop.f32.mrf.mxu0  ;;  %v5058_v33 = vld [vmem:[#allocation2 + $0x1a8] sm:$0xff]  ;;  %v2366_v53 = vpop.f32.mrf.mxu1 }
 0x1fe   : > { %2511 = vst.msk [vmem:[#allocation2 + $0x1b8] sm:$0xff] %vm188_vm6, %v2447_v46  ;;  %v1380_v50 = vadd.f32 %v1299_v40, %v931_v41  ;;  %2754 = vrot.lane.b32.xlu1 %v5058_v33, %s3743_s21  ;;  %v935_v53 = vld [vmem:[#allocation2 + $0x1f0] sm:$0xff] }
 0x1ff   : > { %v1999_v56 = vld [vmem:[#allocation2 + $0x1c0] sm:$0xff]  ;;  %2929 = vst.msk [vmem:[%s4839_s25 + $0xc0] sm:$0xff] %vm2904_vm3, %v2864_v49  ;;  %v1301_v58 = vpop.f32.mrf.mxu0  ;;  %v2369_v11 = vpop.f32.mrf.mxu1 }
 0x200   : > { %v2448_v62 = vadd.f32 %v2361_v54, %v1999_v56  ;;  %1444 = vst.msk [vmem:[#allocation2 + $0x1d0] sm:$0xff] %vm188_vm6, %v1380_v50  ;;  %v2699_v24 = vpop.permute.xlu1 %2698 }
 0x201   : > { %v2865_v63 = vadd.f32 %v2699_v24, %v4811_v52  ;;  %v1302_v4 = vpop.f32.mrf.mxu0  ;;  %v5067_v43 = vld [vmem:[#allocation2 + $0x1b0] sm:$0xff]  ;;  %v2371_v6 = vpop.f32.mrf.mxu1 }
 0x202   : > { %2512 = vst.msk [vmem:[#allocation2 + $0x1c0] sm:$0xff] %vm188_vm6, %v2448_v62  ;;  %v1381_v61 = vadd.f32 %v1302_v4, %v932_v59  ;;  %2756 = vrot.lane.b32.xlu0 %v5067_v43, %s3743_s21  ;;  %v936_v6 = vld [vmem:[#allocation2 + $0x1f8] sm:$0xff] }
 0x203   : > { %v2000_v8 = vld [vmem:[#allocation2 + $0x1c8] sm:$0xff]  ;;  %2930 = vst.msk [vmem:[%s4839_s25 + $0xc8] sm:$0xff] %vm2904_vm3, %v2865_v63  ;;  %v1304_v10 = vpop.f32.mrf.mxu0  ;;  %v2372_v23 = vpop.f32.mrf.mxu1 }
 0x204   : > { %v2449_v17 = vadd.f32 %v2364_v1, %v2000_v8  ;;  %1445 = vst.msk [vmem:[#allocation2 + $0x1d8] sm:$0xff] %vm188_vm6, %v1381_v61  ;;  %v2701_v52 = vpop.permute.xlu0 %2700 }
 0x205   : > { %v2866_v16 = vadd.f32 %v2701_v52, %v4817_v3  ;;  %v1307_v18 = vpop.f32.mrf.mxu0  ;;  %v5076_v54 = vld [vmem:[#allocation2 + $0x1b8] sm:$0xff]  ;;  %v2374_v27 = vpop.f32.mrf.mxu1 }
 0x206   : > { %2513 = vst.msk [vmem:[#allocation2 + $0x1c8] sm:$0xff] %vm188_vm6, %v2449_v17  ;;  %v1382_v29 = vadd.f32 %v1307_v18, %v933_v12  ;;  %2758 = vrot.lane.b32.xlu1 %v5076_v54, %s3743_s21 }
 0x207   : > { %v2001_v30 = vld [vmem:[#allocation2 + $0x1d0] sm:$0xff]  ;;  %2931 = vst.msk [vmem:[%s4839_s25 + $0xd0] sm:$0xff] %vm2904_vm3, %v2866_v16  ;;  %v1309_v31 = vpop.f32.mrf.mxu0  ;;  %v2377_v38 = vpop.f32.mrf.mxu1 }
 0x208   : > { %v2450_v37 = vadd.f32 %v2369_v11, %v2001_v30  ;;  %1446 = vst.msk [vmem:[#allocation2 + $0x1e0] sm:$0xff] %vm188_vm6, %v1382_v29  ;;  %v2703_v3 = vpop.permute.xlu1 %2702 }
 0x209   : > { %v2867_v39 = vadd.f32 %v2703_v3, %v4823_v15  ;;  %v1310_v41 = vpop.f32.mrf.mxu0  ;;  %v5085_v1 = vld [vmem:[#allocation2 + $0x1c0] sm:$0xff]  ;;  %v2379_v46 = vpop.f32.mrf.mxu1 }
 0x20a   : > { %2514 = vst.msk [vmem:[#allocation2 + $0x1d0] sm:$0xff] %vm188_vm6, %v2450_v37  ;;  %v1383_v22 = vadd.f32 %v1310_v41, %v934_v35  ;;  %2760 = vrot.lane.b32.xlu0 %v5085_v1, %s3743_s21 }
 0x20b   : > { %v2002_v49 = vld [vmem:[#allocation2 + $0x1d8] sm:$0xff]  ;;  %2932 = vst.msk [vmem:[%s4839_s25 + $0xd8] sm:$0xff] %vm2904_vm3, %v2867_v39  ;;  %v1312_v40 = vpop.f32.mrf.mxu0  ;;  %v2380_v50 = vpop.f32.mrf.mxu1 }
 0x20c   : > { %v2451_v56 = vadd.f32 %v2372_v23, %v2002_v49  ;;  %1447 = vst.msk [vmem:[#allocation2 + $0x1e8] sm:$0xff] %vm188_vm6, %v1383_v22  ;;  %v2705_v15 = vpop.permute.xlu0 %2704 }
 0x20d   : > { %v2868_v58 = vadd.f32 %v2705_v15, %v4829_v32  ;;  %v1315_v59 = vpop.f32.mrf.mxu0  ;;  %v5094_v11 = vld [vmem:[#allocation2 + $0x1c8] sm:$0xff]  ;;  %v2382_v62 = vpop.f32.mrf.mxu1 }
 0x20e   : > { %2515 = vst.msk [vmem:[#allocation2 + $0x1d8] sm:$0xff] %vm188_vm6, %v2451_v56  ;;  %v1384_v24 = vadd.f32 %v1315_v59, %v935_v53  ;;  %2762 = vrot.lane.b32.xlu1 %v5094_v11, %s3743_s21 }
 0x20f   : > { %v2003_v63 = vld [vmem:[#allocation2 + $0x1e0] sm:$0xff]  ;;  %2933 = vst.msk [vmem:[%s4839_s25 + $0xe0] sm:$0xff] %vm2904_vm3, %v2868_v58  ;;  %v1317_v4 = vpop.f32.mrf.mxu0  ;;  %v2385_v61 = vpop.f32.mrf.mxu1 }
 0x210   : > { %v2452_v8 = vadd.f32 %v2377_v38, %v2003_v63  ;;  %1448 = vst.msk [vmem:[#allocation2 + $0x1f0] sm:$0xff] %vm188_vm6, %v1384_v24  ;;  %v2707_v32 = vpop.permute.xlu1 %2706 }
 0x211   : > { %v2869_v10 = vadd.f32 %v2707_v32, %v4842_v51  ;;  %v1318_v12 = vpop.f32.mrf.mxu0  ;;  %v5103_v23 = vld [vmem:[#allocation2 + $0x1d0] sm:$0xff]  ;;  %v2387_v17 = vpop.f32.mrf.mxu1 }
 0x212   : > { %2516 = vst.msk [vmem:[#allocation2 + $0x1e0] sm:$0xff] %vm188_vm6, %v2452_v8  ;;  %v1385_v52 = vadd.f32 %v1318_v12, %v936_v6  ;;  %2764 = vrot.lane.b32.xlu0 %v5103_v23, %s3743_s21 }
 0x213   : > { %v2004_v16 = vld [vmem:[#allocation2 + $0x1e8] sm:$0xff]  ;;  %2934 = vst.msk [vmem:[%s4839_s25 + $0xe8] sm:$0xff] %vm2904_vm3, %v2869_v10  ;;  %v1320_v18 = vpop.f32.mrf.mxu0  ;;  %v2388_v27 = vpop.f32.mrf.mxu1 }
 0x214   : > { %v2453_v29 = vadd.f32 %v2380_v50, %v2004_v16  ;;  %1449 = vst.msk [vmem:[#allocation2 + $0x1f8] sm:$0xff] %vm188_vm6, %v1385_v52  ;;  %v2709_v51 = vpop.permute.xlu0 %2708 }
 0x215   : > { %v2870_v30 = vadd.f32 %v2709_v51, %v4851_v5  ;;  %v5112_v31 = vld [vmem:[#allocation2 + $0x1d8] sm:$0xff]  ;;  %v2390_v35 = vpop.f32.mrf.mxu1 }
 0x216   : > { %2517 = vst.msk [vmem:[#allocation2 + $0x1e8] sm:$0xff] %vm188_vm6, %v2453_v29  ;;  %2766 = vrot.lane.b32.xlu1 %v5112_v31, %s3743_s21 }
 0x217   : > { %v2005_v38 = vld [vmem:[#allocation2 + $0x1f0] sm:$0xff]  ;;  %2935 = vst.msk [vmem:[%s4839_s25 + $0xf0] sm:$0xff] %vm2904_vm3, %v2870_v30 }
 0x218   : > { %v2454_v37 = vadd.f32 %v2385_v61, %v2005_v38  ;;  %v2711_v3 = vpop.permute.xlu1 %2710 }
 0x219   : > { %v2871_v39 = vadd.f32 %v2711_v3, %v4860_v21  ;;  %v5120_v41 = vld [vmem:[#allocation2 + $0x1e0] sm:$0xff] }
 0x21a   : > { %2518 = vst.msk [vmem:[#allocation2 + $0x1f0] sm:$0xff] %vm188_vm6, %v2454_v37  ;;  %2768 = vrot.lane.b32.xlu0 %v5120_v41, %s3743_s21 }
 0x21b   : > { %v2006_v5 = vld [vmem:[#allocation2 + $0x1f8] sm:$0xff]  ;;  %2936 = vst.msk [vmem:[%s4839_s25 + $0xf8] sm:$0xff] %vm2904_vm3, %v2871_v39 }
 0x21c   : > { %v2455_v46 = vadd.f32 %v2388_v27, %v2006_v5  ;;  %v2713_v22 = vpop.permute.xlu0 %2712 }
 0x21d   : > { %v2872_v49 = vadd.f32 %v2713_v22, %v4869_v42  ;;  %v5128_v40 = vld [vmem:[#allocation2 + $0x1e8] sm:$0xff] }
 0x21e   : > { %2519 = vst.msk [vmem:[#allocation2 + $0x1f8] sm:$0xff] %vm188_vm6, %v2455_v46  ;;  %2770 = vrot.lane.b32.xlu1 %v5128_v40, %s3743_s21 }
 0x21f   : > { %2937 = vst.msk [vmem:[%s4839_s25 + $0x100] sm:$0xff] %vm2904_vm3, %v2872_v49 }
 0x220   : > { %v2715_v21 = vpop.permute.xlu1 %2714 }
 0x221   : > { %v2873_v53 = vadd.f32 %v2715_v21, %v4878_v60  ;;  %v5136_v50 = vld [vmem:[#allocation2 + $0x1f0] sm:$0xff] }
 0x222   : > { %2772 = vrot.lane.b32.xlu0 %v5136_v50, %s3743_s21 }
 0x223   : > { %2938 = vst.msk [vmem:[%s4839_s25 + $0x108] sm:$0xff] %vm2904_vm3, %v2873_v53 }
 0x224   : > { %v2717_v42 = vpop.permute.xlu0 %2716 }
 0x225   : > { %v2874_v56 = vadd.f32 %v2717_v42, %v4887_v13  ;;  %v5143_v15 = vld [vmem:[#allocation2 + $0x1f8] sm:$0xff] }
 0x226   : > { %2774 = vrot.lane.b32.xlu1 %v5143_v15, %s3743_s21 }
 0x227   : > { %2939 = vst.msk [vmem:[%s4839_s25 + $0x110] sm:$0xff] %vm2904_vm3, %v2874_v56 }
 0x228   : > { %v2719_v60 = vpop.permute.xlu1 %2718 }
 0x229   : > { %v2875_v58 = vadd.f32 %v2719_v60, %v4896_v36 }
 0x22b   : > { %2940 = vst.msk [vmem:[%s4839_s25 + $0x118] sm:$0xff] %vm2904_vm3, %v2875_v58 }
 0x22c   : > { %v2721_v59 = vpop.permute.xlu0 %2720 }
 0x22d   : > { %v2876_v62 = vadd.f32 %v2721_v59, %v4905_v44 }
 0x22f   : > { %2941 = vst.msk [vmem:[%s4839_s25 + $0x120] sm:$0xff] %vm2904_vm3, %v2876_v62 }
 0x230   : > { %v2723_v13 = vpop.permute.xlu1 %2722 }
 0x231   : > { %v2877_v24 = vadd.f32 %v2723_v13, %v4914_v7 }
 0x233   : > { %2942 = vst.msk [vmem:[%s4839_s25 + $0x128] sm:$0xff] %vm2904_vm3, %v2877_v24 }
 0x234   : > { %v2725_v63 = vpop.permute.xlu0 %2724 }
 0x235   : > { %v2878_v4 = vadd.f32 %v2725_v63, %v4923_v28 }
 0x237   : > { %2943 = vst.msk [vmem:[%s4839_s25 + $0x130] sm:$0xff] %vm2904_vm3, %v2878_v4 }
 0x238   : > { %v2727_v36 = vpop.permute.xlu1 %2726 }
 0x239   : > { %v2879_v6 = vadd.f32 %v2727_v36, %v4932_v48 }
 0x23b   : > { %2944 = vst.msk [vmem:[%s4839_s25 + $0x138] sm:$0xff] %vm2904_vm3, %v2879_v6 }
 0x23c   : > { %v2729_v44 = vpop.permute.xlu0 %2728 }
 0x23d   : > { %v2880_v61 = vadd.f32 %v2729_v44, %v4941_v19 }
 0x23f   : > { %2945 = vst.msk [vmem:[%s4839_s25 + $0x140] sm:$0xff] %vm2904_vm3, %v2880_v61 }
 0x240   : > { %v2731_v7 = vpop.permute.xlu1 %2730 }
 0x241   : > { %v2881_v8 = vadd.f32 %v2731_v7, %v4950_v34 }
 0x243   : > { %2946 = vst.msk [vmem:[%s4839_s25 + $0x148] sm:$0xff] %vm2904_vm3, %v2881_v8 }
 0x244   : > { %v2733_v28 = vpop.permute.xlu0 %2732 }
 0x245   : > { %v2882_v32 = vadd.f32 %v2733_v28, %v4959_v45 }
 0x247   : > { %2947 = vst.msk [vmem:[%s4839_s25 + $0x150] sm:$0xff] %vm2904_vm3, %v2882_v32 }
 0x248   : > { %v2735_v48 = vpop.permute.xlu1 %2734 }
 0x249   : > { %v2883_v10 = vadd.f32 %v2735_v48, %v4968_v57 }
 0x24b   : > { %2948 = vst.msk [vmem:[%s4839_s25 + $0x158] sm:$0xff] %vm2904_vm3, %v2883_v10 }
 0x24c   : > { %v2737_v19 = vpop.permute.xlu0 %2736 }
 0x24d   : > { %v2884_v12 = vadd.f32 %v2737_v19, %v4977_v2 }
 0x24f   : > { %2949 = vst.msk [vmem:[%s4839_s25 + $0x160] sm:$0xff] %vm2904_vm3, %v2884_v12 }
 0x250   : > { %v2739_v34 = vpop.permute.xlu1 %2738 }
 0x251   : > { %v2885_v17 = vadd.f32 %v2739_v34, %v4986_v14 }
 0x253   : > { %2950 = vst.msk [vmem:[%s4839_s25 + $0x168] sm:$0xff] %vm2904_vm3, %v2885_v17 }
 0x254   : > { %v2741_v45 = vpop.permute.xlu0 %2740 }
 0x255   : > { %v2886_v52 = vadd.f32 %v2741_v45, %v4995_v25 }
 0x257   : > { %2951 = vst.msk [vmem:[%s4839_s25 + $0x170] sm:$0xff] %vm2904_vm3, %v2886_v52 }
 0x258   : > { %v2743_v57 = vpop.permute.xlu1 %2742 }
 0x259   : > { %v2887_v16 = vadd.f32 %v2743_v57, %v5004_v26 }
 0x25b   : > { %2952 = vst.msk [vmem:[%s4839_s25 + $0x178] sm:$0xff] %vm2904_vm3, %v2887_v16 }
 0x25c   : > { %v2745_v2 = vpop.permute.xlu0 %2744 }
 0x25d   : > { %v2888_v18 = vadd.f32 %v2745_v2, %v5013_v47 }
 0x25f   : > { %2953 = vst.msk [vmem:[%s4839_s25 + $0x180] sm:$0xff] %vm2904_vm3, %v2888_v18 }
 0x260   : > { %v2747_v14 = vpop.permute.xlu1 %2746 }
 0x261   : > { %v2889_v27 = vadd.f32 %v2747_v14, %v5022_v55 }
 0x263   : > { %2954 = vst.msk [vmem:[%s4839_s25 + $0x188] sm:$0xff] %vm2904_vm3, %v2889_v27 }
 0x264   : > { %v2749_v25 = vpop.permute.xlu0 %2748 }
 0x265   : > { %v2890_v29 = vadd.f32 %v2749_v25, %v5031_v0 }
 0x267   : > { %2955 = vst.msk [vmem:[%s4839_s25 + $0x190] sm:$0xff] %vm2904_vm3, %v2890_v29 }
 0x268   : > { %v2751_v26 = vpop.permute.xlu1 %2750 }
 0x269   : > { %v2891_v51 = vadd.f32 %v2751_v26, %v5040_v9 }
 0x26b   : > { %2956 = vst.msk [vmem:[%s4839_s25 + $0x198] sm:$0xff] %vm2904_vm3, %v2891_v51 }
 0x26c   : > { %v2753_v47 = vpop.permute.xlu0 %2752 }
 0x26d   : > { %v2892_v30 = vadd.f32 %v2753_v47, %v5049_v20 }
 0x26f   : > { %2957 = vst.msk [vmem:[%s4839_s25 + $0x1a0] sm:$0xff] %vm2904_vm3, %v2892_v30 }
 0x270   : > { %v2755_v55 = vpop.permute.xlu1 %2754 }
 0x271   : > { %v2893_v35 = vadd.f32 %v2755_v55, %v5058_v33 }
 0x273   : > { %2958 = vst.msk [vmem:[%s4839_s25 + $0x1a8] sm:$0xff] %vm2904_vm3, %v2893_v35 }
 0x274   : > { %v2757_v0 = vpop.permute.xlu0 %2756 }
 0x275   : > { %v2894_v38 = vadd.f32 %v2757_v0, %v5067_v43 }
 0x277   : > { %2959 = vst.msk [vmem:[%s4839_s25 + $0x1b0] sm:$0xff] %vm2904_vm3, %v2894_v38 }
 0x278   : > { %v2759_v9 = vpop.permute.xlu1 %2758 }
 0x279   : > { %v2895_v37 = vadd.f32 %v2759_v9, %v5076_v54 }
 0x27b   : > { %2960 = vst.msk [vmem:[%s4839_s25 + $0x1b8] sm:$0xff] %vm2904_vm3, %v2895_v37 }
 0x27c   : > { %v2761_v20 = vpop.permute.xlu0 %2760 }
 0x27d   : > { %v2896_v3 = vadd.f32 %v2761_v20, %v5085_v1 }
 0x27f   : > { %2961 = vst.msk [vmem:[%s4839_s25 + $0x1c0] sm:$0xff] %vm2904_vm3, %v2896_v3 }
 0x280   : > { %v2763_v33 = vpop.permute.xlu1 %2762 }
 0x281   : > { %v2897_v39 = vadd.f32 %v2763_v33, %v5094_v11 }
 0x283   : > { %2962 = vst.msk [vmem:[%s4839_s25 + $0x1c8] sm:$0xff] %vm2904_vm3, %v2897_v39 }
 0x284   : > { %v2765_v43 = vpop.permute.xlu0 %2764 }
 0x285   : > { %v2898_v5 = vadd.f32 %v2765_v43, %v5103_v23 }
 0x287   : > { %2963 = vst.msk [vmem:[%s4839_s25 + $0x1d0] sm:$0xff] %vm2904_vm3, %v2898_v5 }
 0x288   : > { %v2767_v54 = vpop.permute.xlu1 %2766 }
 0x289   : > { %v2899_v46 = vadd.f32 %v2767_v54, %v5112_v31 }
 0x28b   : > { %2964 = vst.msk [vmem:[%s4839_s25 + $0x1d8] sm:$0xff] %vm2904_vm3, %v2899_v46 }
 0x28c   : > { %v2769_v1 = vpop.permute.xlu0 %2768 }
 0x28d   : > { %v2900_v22 = vadd.f32 %v2769_v1, %v5120_v41 }
 0x28f   : > { %2965 = vst.msk [vmem:[%s4839_s25 + $0x1e0] sm:$0xff] %vm2904_vm3, %v2900_v22 }
 0x290   : > { %v2771_v11 = vpop.permute.xlu1 %2770 }
 0x291   : > { %v2901_v49 = vadd.f32 %v2771_v11, %v5128_v40 }
 0x293   : > { %2966 = vst.msk [vmem:[%s4839_s25 + $0x1e8] sm:$0xff] %vm2904_vm3, %v2901_v49 }
 0x294   : > { %v2773_v21 = vpop.permute.xlu0 %2772 }
 0x295   : > { %v2902_v23 = vadd.f32 %v2773_v21, %v5136_v50 }
 0x297   : > { %2967 = vst.msk [vmem:[%s4839_s25 + $0x1f0] sm:$0xff] %vm2904_vm3, %v2902_v23 }
 0x298   : > { %v2775_v53 = vpop.permute.xlu1 %2774 }
 0x299   : > { %v2903_v31 = vadd.f32 %v2775_v53, %v5143_v15 }
 0x29b   : > { %2968 = vst.msk [vmem:[%s4839_s25 + $0x1f8] sm:$0xff] %vm2904_vm3, %v2903_v31 }
 0x29c PF: > { %s12_s11 = sadd.s32 1, %s3738_s11   ;;  %s5256_s9 = smov %s3734_s10 }
 0x29d   : > { %p9_p5 = scmp.ge.s32.totalorder %s12_s11, 4   ;;  %s5257_s10 = smov %s5259_s12 }
 0x29f   :  { %11 = sbr.rel (!%p9_p5) target bundleno = 2 (0x2), region = 63 }

</bundles_post_ra>
